<compile_context>
chip_gen: v7x
topology: tpu7x:2x2x1
jax: 0.10.0
libtpu: 0.0.40
codegen_flags: <defaults>
</compile_context>

<pallas_src>
import functools
import math

import jax
import jax.numpy as jnp
from jax.experimental import pallas as pl
from jax.experimental.pallas import tpu as pltpu


ROW_TILE_TARGET = 16  # output rows per grid step; tunable per chip (16-32 typical)


# ----------------------------------------------------------------------------
# Fused kernel: deconv GEMM + virtual concat + 3x3 conv + bias + ReLU.
# One grid step = `rpb` output rows of one batch image.
#
# slab_ref (scratch, bf16) holds the "paired-column" activation slab:
#   slab[t, p, off*cu + c]        = up  row (r0-1+t), spatial col 2*(p-1)+off, ch c
#   slab[t, p, 2*cu + off*cs + c] = skip row (r0-1+t), spatial col 2*(p-1)+off, ch c
# with pair p=0 and p=W+1 being the conv zero padding.
# ----------------------------------------------------------------------------
def _decoder_kernel(x1a_ref, x1b_ref, ska_ref, skb_ref,
                    wt_ref, bt_ref, weff_ref, bc_ref,
                    o_ref, slab_ref, *, rpb, w, cin, cu, cs):
    h = rpb // 2
    c2u = 2 * cu
    ctot = 2 * (cu + cs)
    i = pl.program_id(1)
    nblk = pl.num_programs(1)

    # (1) zero the left/right padding column-pairs (also clears stale scratch).
    zcol = jnp.zeros((rpb + 2, ctot), jnp.bfloat16)
    slab_ref[:, 0, :] = zcol
    slab_ref[:, w + 1, :] = zcol

    # (2) skip branch: straight lane-dense copies (rows already zero padded).
    slab_ref[0:rpb, 1:w + 1, c2u:ctot] = ska_ref[0]
    slab_ref[rpb:rpb + 2, 1:w + 1, c2u:ctot] = skb_ref[0]

    # (3) ConvTranspose2d(k=2, s=2) as in-VMEM GEMMs with fused bias; the GEMM
    #     rows drop straight into the paired-column slab (interleave is free).
    wt = wt_ref[...]
    bt = bt_ref[...]

    def emit_up_rows(x_ref, n_rows, t_base):
        x = x_ref[0].reshape(n_rows * w, cin)
        y = jnp.dot(x, wt, preferred_element_type=jnp.float32) + bt
        y = y.astype(jnp.bfloat16)
        for t1 in range(n_rows):
            for ky in range(2):
                t = t_base + 2 * t1 + ky
                if t < 0 or t > rpb + 1:
                    continue
                slab_ref[t, 1:w + 1, 0:c2u] = (
                    y[t1 * w:(t1 + 1) * w, ky * c2u:(ky + 1) * c2u])

    emit_up_rows(x1a_ref, h, -1)          # slab rows 0 .. rpb-2
    emit_up_rows(x1b_ref, 2, rpb - 1)     # slab rows rpb-1 .. rpb+1

    # (4) conv zero-padding rows at the image top/bottom: the skip part is
    #     already zero; the up part holds the deconv bias generated from the
    #     zero-padded x1 row and must be cleared.
    zrow = jnp.zeros((w + 2, ctot), jnp.bfloat16)

    @pl.when(i == 0)
    def _():
        slab_ref[0, :, :] = zrow

    @pl.when(i == nblk - 1)
    def _():
        slab_ref[rpb + 1, :, :] = zrow

    # (5) Conv2d(3x3, pad=1) over the virtual concat as 9 dense GEMMs in
    #     paired-column space; column shift hoisted to one slab load per dp,
    #     per-tap weight loaded inside the loop, f32 acc, fused bias + ReLU.
    acc = jnp.zeros((rpb * w, c2u), jnp.float32)
    for dp in range(3):
        s = slab_ref[:, dp:dp + w, :].reshape((rpb + 2) * w, ctot)
        for ky in range(3):
            lhs = s[ky * w:(ky + rpb) * w]
            acc = acc + jnp.dot(lhs, weff_ref[ky * 3 + dp],
                                preferred_element_type=jnp.float32)
    acc = jnp.maximum(acc + bc_ref[...], 0.0)
    # TODO(synk): emit bf16 here if the consumer tolerates it (halves writeback).
    o_ref[...] = acc.reshape(1, rpb, w, c2u)


# ----------------------------------------------------------------------------
# Conv weights re-expressed for the paired-column layout.
#   K axis: [up off=0 (U) | up off=1 (U) | skip off=0 (S) | skip off=1 (S)]
#   N axis: [output col parity q=0 (U) | q=1 (U)]
# Note: ~half the entries are structural zeros (2x MXU MACs) -- a fine trade
# here since the op is memory/overhead bound, not MXU bound.
# ----------------------------------------------------------------------------
def _build_paired_conv_weights(wc, u, s):
    parts = (wc[:, :u], wc[:, u:])                 # (U,U,3,3), (U,S,3,3)
    taps = []
    for ky in range(3):
        for dpi in range(3):
            dp = dpi - 1
            rows = []
            for part in parts:
                for off in range(2):
                    cols = []
                    for q in range(2):
                        kx = 2 * dp + off + 1 - q
                        if 0 <= kx <= 2:
                            cols.append(part[:, :, ky, kx].T)        # (Cpart, U)
                        else:
                            cols.append(jnp.zeros((part.shape[1], u), wc.dtype))
                    rows.append(jnp.concatenate(cols, axis=1))       # (Cpart, 2U)
            taps.append(jnp.concatenate(rows, axis=0))               # (2C, 2U)
    return jnp.stack(taps, axis=0)                                   # (9, 2C, 2U)


def _pick_row_tile(oh, target):
    rpb = 4
    for cand in range(4, min(target, oh) + 1, 4):
        if oh % cand == 0:
            rpb = cand
    return rpb


# ----------------------------------------------------------------------------
# Decoder forward (PyTorch semantics: NCHW f32 in / out)
# ----------------------------------------------------------------------------
@jax.jit
def decoder_forward(params, x1, x2):
    """x1: (B, Cin, H, W), x2: (B, S, 2H, 2W)  ->  (B, U, 2H, 2W)."""
    wt, bt = params["up_w"], params["up_b"]        # (Cin, U, 2, 2), (U,)
    wc, bc = params["conv_w"], params["conv_b"]    # (U, U+S, 3, 3), (U,)
    B, cin, H, W = x1.shape
    U = wt.shape[1]
    S = x2.shape[1]
    C = U + S
    oh, ow = 2 * H, 2 * W
    assert wc.shape[1] == C, "middle_channels must equal out + skip channels"
    assert oh % 4 == 0 and W % 8 == 0, "kernel assumes H even and W % 8 == 0"

    rpb = _pick_row_tile(oh, ROW_TILE_TARGET)
    nblk = oh // rpb
    h = rpb // 2

    # ---- one fused XLA pass per input: NCHW->NHWC, f32->bf16, 1-row halo pad
    x1_p = jnp.pad(x1.transpose(0, 2, 3, 1).astype(jnp.bfloat16),
                   ((0, 0), (1, 1), (0, 0), (0, 0)))            # (B, H+2,  W, Cin)
    x2_p = jnp.pad(x2.transpose(0, 2, 3, 1).astype(jnp.bfloat16),
                   ((0, 0), (1, 1), (0, 0), (0, 0)))            # (B, 2H+2, 2W, S)
    x2_p = x2_p.reshape(B, oh + 2, W, 2 * S)                    # paired cols (free)

    # ---- weights -------------------------------------------------------------
    wt2 = wt.transpose(0, 2, 3, 1).reshape(cin, 4 * U).astype(jnp.bfloat16)
    bt2 = jnp.tile(bt, 4)[None, :].astype(jnp.float32)          # (1, 4U)
    weff = _build_paired_conv_weights(wc, U, S).astype(jnp.bfloat16)  # (9, 2C, 2U)
    bc2 = jnp.tile(bc, 2)[None, :].astype(jnp.float32)          # (1, 2U)

    kernel = functools.partial(_decoder_kernel,
                               rpb=rpb, w=W, cin=cin, cu=U, cs=S)

    out2 = pl.pallas_call(
        kernel,
        out_shape=jax.ShapeDtypeStruct((B, oh, W, 2 * U), jnp.float32),
        grid=(B, nblk),
        in_specs=[
            # x1 main rows + 2-row bottom halo (paired with the next block)
            pl.BlockSpec((1, h, W, cin), lambda b, i: (b, i, 0, 0)),
            pl.BlockSpec((1, 2, W, cin), lambda b, i: (b, (i + 1) * (h // 2), 0, 0)),
            # skip main rows + 2-row bottom halo
            pl.BlockSpec((1, rpb, W, 2 * S), lambda b, i: (b, i, 0, 0)),
            pl.BlockSpec((1, 2, W, 2 * S),
                         lambda b, i: (b, (i + 1) * (rpb // 2), 0, 0)),
            # weights / biases (constant block index -> DMA'd once)
            pl.BlockSpec((cin, 4 * U), lambda b, i: (0, 0)),
            pl.BlockSpec((1, 4 * U), lambda b, i: (0, 0)),
            pl.BlockSpec((9, 2 * C, 2 * U), lambda b, i: (0, 0, 0)),
            pl.BlockSpec((1, 2 * U), lambda b, i: (0, 0)),
        ],
        out_specs=pl.BlockSpec((1, rpb, W, 2 * U), lambda b, i: (b, i, 0, 0)),
        scratch_shapes=[pltpu.VMEM((rpb + 2, W + 2, 2 * C), jnp.bfloat16)],
        compiler_params=pltpu.CompilerParams(
            dimension_semantics=("parallel", "parallel"),
            # actual footprint is a few MiB; 32 MiB is within every chip's budget
            vmem_limit_bytes=32 * 1024 * 1024),
    )(x1_p, x1_p, x2_p, x2_p, wt2, bt2, weff, bc2)

    # paired-column output -> NHWC is a free reshape; NCHW once for the module.
    out = out2.reshape(B, oh, ow, U)
    return out.transpose(0, 3, 1, 2)


# ----------------------------------------------------------------------------
# Deterministic parameters + plain-JAX reference (PyTorch-equivalent math)
# ----------------------------------------------------------------------------
def make_decoder_params(key, in_channels, middle_channels, out_channels):
    k1, k2, k3, k4 = jax.random.split(key, 4)
    up_w = (1.0 / math.sqrt(in_channels * 4)) * jax.random.normal(
        k1, (in_channels, out_channels, 2, 2), jnp.float32)
    up_b = 0.02 * jax.random.normal(k2, (out_channels,), jnp.float32)
    conv_w = (1.0 / math.sqrt(middle_channels * 9)) * jax.random.normal(
        k3, (out_channels, middle_channels, 3, 3), jnp.float32)
    conv_b = 0.02 * jax.random.normal(k4, (out_channels,), jnp.float32)
    return {"up_w": up_w, "up_b": up_b, "conv_w": conv_w, "conv_b": conv_b}


def decoder_reference(params, x1, x2):
    wt, bt = params["up_w"], params["up_b"]
    wc, bc = params["conv_w"], params["conv_b"]
    B, _, H, W = x1.shape
    cout = wt.shape[1]
    t = jnp.einsum("bihw,iokl->bhwklo", x1, wt)
    up = t.transpose(0, 1, 3, 2, 4, 5).reshape(B, 2 * H, 2 * W, cout) + bt
    cat = jnp.concatenate([up, x2.transpose(0, 2, 3, 1)], axis=-1)
    catp = jnp.pad(cat, ((0, 0), (1, 1), (1, 1), (0, 0)))
    out = jnp.zeros((B, 2 * H, 2 * W, cout), jnp.float32)
    for ky in range(3):
        for kx in range(3):
            out = out + jnp.einsum(
                "bhwc,oc->bhwo",
                catp[:, ky:ky + 2 * H, kx:kx + 2 * W, :], wc[:, :, ky, kx])
    out = jnp.maximum(out + bc, 0.0)
    return out.transpose(0, 3, 1, 2)


# ----------------------------------------------------------------------------
if __name__ == "__main__":
    B, Cin, Cout, Cskip, H, W = 2, 64, 64, 64, 16, 16
    Cmid = Cout + Cskip
    key = jax.random.PRNGKey(0)
    kp, kx1, kx2 = jax.random.split(key, 3)
    params = make_decoder_params(kp, Cin, Cmid, Cout)
    x1 = jax.random.normal(kx1, (B, Cin, H, W), jnp.float32)
    x2 = jax.random.normal(kx2, (B, Cskip, 2 * H, 2 * W), jnp.float32)

    out = jax.block_until_ready(decoder_forward(params, x1, x2))
    assert out.shape == (B, Cout, 2 * H, 2 * W), out.shape
    assert bool(jnp.all(jnp.isfinite(out)))

    ref = decoder_reference(params, x1, x2)
    err = float(jnp.max(jnp.abs(out - ref)))
    scale = float(jnp.max(jnp.abs(ref))) + 1e-6
    assert err <= 0.05 * scale + 0.05, (err, scale)  # bf16-operand tolerance

    print("KERNEL_OK")
</pallas_src>

<mosaic_0001>
module attributes {stable_mosaic.version = 11 : i64} {
  func.func @_decoder_kernel(%arg0: i32, %arg1: i32, %arg2: memref<1x8x16x64xbf16, #tpu.memory_space<vmem>>, %arg3: memref<1x2x16x64xbf16, #tpu.memory_space<vmem>>, %arg4: memref<1x16x16x128xbf16, #tpu.memory_space<vmem>>, %arg5: memref<1x2x16x128xbf16, #tpu.memory_space<vmem>>, %arg6: memref<64x256xbf16, #tpu.memory_space<vmem>>, %arg7: memref<1x256xf32, #tpu.memory_space<vmem>>, %arg8: memref<9x256x128xbf16, #tpu.memory_space<vmem>>, %arg9: memref<1x128xf32, #tpu.memory_space<vmem>>, %arg10: memref<1x16x16x128xf32, #tpu.memory_space<vmem>>, %arg11: memref<18x18x256xbf16, #tpu.memory_space<vmem>>) attributes {dimension_semantics = [#tpu.dimension_semantics<parallel>, #tpu.dimension_semantics<parallel>], iteration_bounds = array<i64: 2, 2>, scalar_prefetch = 0 : i64, scratch_operands = 1 : i64, tpu.core_type = #tpu.core_type<tc>, window_params = [{transform_indices = @transform_0, window_bounds = array<i64: 1, 8, 16, 64>}, {transform_indices = @transform_1, window_bounds = array<i64: 1, 2, 16, 64>}, {transform_indices = @transform_2, window_bounds = array<i64: 1, 16, 16, 128>}, {transform_indices = @transform_3, window_bounds = array<i64: 1, 2, 16, 128>}, {pipeline_mode = #tpu.pipeline_mode<synchronous>, transform_indices = @transform_4, window_bounds = array<i64: 64, 256>}, {pipeline_mode = #tpu.pipeline_mode<synchronous>, transform_indices = @transform_5, window_bounds = array<i64: 1, 256>}, {pipeline_mode = #tpu.pipeline_mode<synchronous>, transform_indices = @transform_6, window_bounds = array<i64: 9, 256, 128>}, {pipeline_mode = #tpu.pipeline_mode<synchronous>, transform_indices = @transform_7, window_bounds = array<i64: 1, 128>}, {transform_indices = @transform_8, window_bounds = array<i64: 1, 16, 16, 128>}]} {
    %cst = arith.constant 0.000000e+00 : bf16
    %0 = vector.broadcast %cst : bf16 to vector<18x256xbf16>
    %c0 = arith.constant 0 : index
    %c0_0 = arith.constant 0 : index
    %c0_1 = arith.constant 0 : index
    %1 = vector.load %arg11[%c0, %c0_0, %c0_1] : memref<18x18x256xbf16, #tpu.memory_space<vmem>>, vector<18x1x256xbf16>
    %2 = vector.shape_cast %1 : vector<18x1x256xbf16> to vector<18x256xbf16>
    %3 = vector.shape_cast %0 : vector<18x256xbf16> to vector<18x1x256xbf16>
    tpu.vector_store %arg11[%c0, %c0_0, %c0_1], %3 {strides = array<i32>} : memref<18x18x256xbf16, #tpu.memory_space<vmem>>, vector<18x1x256xbf16>,
    %c0_2 = arith.constant 0 : index
    %c17 = arith.constant 17 : index
    %c0_3 = arith.constant 0 : index
    %4 = vector.load %arg11[%c0_2, %c17, %c0_3] : memref<18x18x256xbf16, #tpu.memory_space<vmem>>, vector<18x1x256xbf16>
    %5 = vector.shape_cast %4 : vector<18x1x256xbf16> to vector<18x256xbf16>
    %6 = vector.shape_cast %0 : vector<18x256xbf16> to vector<18x1x256xbf16>
    tpu.vector_store %arg11[%c0_2, %c17, %c0_3], %6 {strides = array<i32>} : memref<18x18x256xbf16, #tpu.memory_space<vmem>>, vector<18x1x256xbf16>,
    %c0_4 = arith.constant 0 : index
    %c0_5 = arith.constant 0 : index
    %c0_6 = arith.constant 0 : index
    %c0_7 = arith.constant 0 : index
    %7 = vector.load %arg4[%c0_4, %c0_5, %c0_6, %c0_7] : memref<1x16x16x128xbf16, #tpu.memory_space<vmem>>, vector<1x16x16x128xbf16>
    %8 = vector.shape_cast %7 : vector<1x16x16x128xbf16> to vector<16x16x128xbf16>
    %c0_8 = arith.constant 0 : index
    %c1 = arith.constant 1 : index
    %c128 = arith.constant 128 : index
    %9 = vector.load %arg11[%c0_8, %c1, %c128] : memref<18x18x256xbf16, #tpu.memory_space<vmem>>, vector<16x16x128xbf16>
    tpu.vector_store %arg11[%c0_8, %c1, %c128], %8 {strides = array<i32>} : memref<18x18x256xbf16, #tpu.memory_space<vmem>>, vector<16x16x128xbf16>,
    %c0_9 = arith.constant 0 : index
    %c0_10 = arith.constant 0 : index
    %c0_11 = arith.constant 0 : index
    %c0_12 = arith.constant 0 : index
    %10 = vector.load %arg5[%c0_9, %c0_10, %c0_11, %c0_12] : memref<1x2x16x128xbf16, #tpu.memory_space<vmem>>, vector<1x2x16x128xbf16>
    %11 = vector.shape_cast %10 : vector<1x2x16x128xbf16> to vector<2x16x128xbf16>
    %c16 = arith.constant 16 : index
    %c1_13 = arith.constant 1 : index
    %c128_14 = arith.constant 128 : index
    %12 = vector.load %arg11[%c16, %c1_13, %c128_14] : memref<18x18x256xbf16, #tpu.memory_space<vmem>>, vector<2x16x128xbf16>
    tpu.vector_store %arg11[%c16, %c1_13, %c128_14], %11 {strides = array<i32>} : memref<18x18x256xbf16, #tpu.memory_space<vmem>>, vector<2x16x128xbf16>,
    %c0_15 = arith.constant 0 : index
    %c0_16 = arith.constant 0 : index
    %13 = vector.load %arg6[%c0_15, %c0_16] : memref<64x256xbf16, #tpu.memory_space<vmem>>, vector<64x256xbf16>
    %c0_17 = arith.constant 0 : index
    %c0_18 = arith.constant 0 : index
    %14 = vector.load %arg7[%c0_17, %c0_18] : memref<1x256xf32, #tpu.memory_space<vmem>>, vector<1x256xf32>
    %c0_19 = arith.constant 0 : index
    %c0_20 = arith.constant 0 : index
    %c0_21 = arith.constant 0 : index
    %c0_22 = arith.constant 0 : index
    %15 = vector.load %arg2[%c0_19, %c0_20, %c0_21, %c0_22] : memref<1x8x16x64xbf16, #tpu.memory_space<vmem>>, vector<1x8x16x64xbf16>
    %16 = vector.shape_cast %15 : vector<1x8x16x64xbf16> to vector<8x16x64xbf16>
    %17 = vector.shape_cast %16 : vector<8x16x64xbf16> to vector<128x64xbf16>
    %cst_23 = arith.constant dense<0.000000e+00> : vector<128x256xf32>
    %18 = tpu.matmul %17, %13, %cst_23 {dimension_numbers = #tpu.dot_dimension_numbers<[1], [0], [0], [1], [0, 0, 1, 1], [], []>} : vector<128x64xbf16>, vector<64x256xbf16>, vector<128x256xf32> -> vector<128x256xf32>
    %19 = vector.broadcast %14 : vector<1x256xf32> to vector<128x256xf32>
    %20 = arith.addf %18, %19 : vector<128x256xf32>
    %21 = arith.truncf %20 : vector<128x256xf32> to vector<128x256xbf16>
    %22 = vector.extract_strided_slice %21 {offsets = [0, 128], sizes = [16, 128], strides = [1, 1]} : vector<128x256xbf16> to vector<16x128xbf16>
    %c0_24 = arith.constant 0 : index
    %c1_25 = arith.constant 1 : index
    %c0_26 = arith.constant 0 : index
    %23 = vector.load %arg11[%c0_24, %c1_25, %c0_26] : memref<18x18x256xbf16, #tpu.memory_space<vmem>>, vector<1x16x128xbf16>
    %24 = vector.shape_cast %23 : vector<1x16x128xbf16> to vector<16x128xbf16>
    %25 = vector.shape_cast %22 : vector<16x128xbf16> to vector<1x16x128xbf16>
    tpu.vector_store %arg11[%c0_24, %c1_25, %c0_26], %25 {strides = array<i32>} : memref<18x18x256xbf16, #tpu.memory_space<vmem>>, vector<1x16x128xbf16>,
    %26 = vector.extract_strided_slice %21 {offsets = [16, 0], sizes = [16, 128], strides = [1, 1]} : vector<128x256xbf16> to vector<16x128xbf16>
    %c1_27 = arith.constant 1 : index
    %c1_28 = arith.constant 1 : index
    %c0_29 = arith.constant 0 : index
    %27 = vector.load %arg11[%c1_27, %c1_28, %c0_29] : memref<18x18x256xbf16, #tpu.memory_space<vmem>>, vector<1x16x128xbf16>
    %28 = vector.shape_cast %27 : vector<1x16x128xbf16> to vector<16x128xbf16>
    %29 = vector.shape_cast %26 : vector<16x128xbf16> to vector<1x16x128xbf16>
    tpu.vector_store %arg11[%c1_27, %c1_28, %c0_29], %29 {strides = array<i32>} : memref<18x18x256xbf16, #tpu.memory_space<vmem>>, vector<1x16x128xbf16>,
    %30 = vector.extract_strided_slice %21 {offsets = [16, 128], sizes = [16, 128], strides = [1, 1]} : vector<128x256xbf16> to vector<16x128xbf16>
    %c2 = arith.constant 2 : index
    %c1_30 = arith.constant 1 : index
    %c0_31 = arith.constant 0 : index
    %31 = vector.load %arg11[%c2, %c1_30, %c0_31] : memref<18x18x256xbf16, #tpu.memory_space<vmem>>, vector<1x16x128xbf16>
    %32 = vector.shape_cast %31 : vector<1x16x128xbf16> to vector<16x128xbf16>
    %33 = vector.shape_cast %30 : vector<16x128xbf16> to vector<1x16x128xbf16>
    tpu.vector_store %arg11[%c2, %c1_30, %c0_31], %33 {strides = array<i32>} : memref<18x18x256xbf16, #tpu.memory_space<vmem>>, vector<1x16x128xbf16>,
    %34 = vector.extract_strided_slice %21 {offsets = [32, 0], sizes = [16, 128], strides = [1, 1]} : vector<128x256xbf16> to vector<16x128xbf16>
    %c3 = arith.constant 3 : index
    %c1_32 = arith.constant 1 : index
    %c0_33 = arith.constant 0 : index
    %35 = vector.load %arg11[%c3, %c1_32, %c0_33] : memref<18x18x256xbf16, #tpu.memory_space<vmem>>, vector<1x16x128xbf16>
    %36 = vector.shape_cast %35 : vector<1x16x128xbf16> to vector<16x128xbf16>
    %37 = vector.shape_cast %34 : vector<16x128xbf16> to vector<1x16x128xbf16>
    tpu.vector_store %arg11[%c3, %c1_32, %c0_33], %37 {strides = array<i32>} : memref<18x18x256xbf16, #tpu.memory_space<vmem>>, vector<1x16x128xbf16>,
    %38 = vector.extract_strided_slice %21 {offsets = [32, 128], sizes = [16, 128], strides = [1, 1]} : vector<128x256xbf16> to vector<16x128xbf16>
    %c4 = arith.constant 4 : index
    %c1_34 = arith.constant 1 : index
    %c0_35 = arith.constant 0 : index
    %39 = vector.load %arg11[%c4, %c1_34, %c0_35] : memref<18x18x256xbf16, #tpu.memory_space<vmem>>, vector<1x16x128xbf16>
    %40 = vector.shape_cast %39 : vector<1x16x128xbf16> to vector<16x128xbf16>
    %41 = vector.shape_cast %38 : vector<16x128xbf16> to vector<1x16x128xbf16>
    tpu.vector_store %arg11[%c4, %c1_34, %c0_35], %41 {strides = array<i32>} : memref<18x18x256xbf16, #tpu.memory_space<vmem>>, vector<1x16x128xbf16>,
    %42 = vector.extract_strided_slice %21 {offsets = [48, 0], sizes = [16, 128], strides = [1, 1]} : vector<128x256xbf16> to vector<16x128xbf16>
    %c5 = arith.constant 5 : index
    %c1_36 = arith.constant 1 : index
    %c0_37 = arith.constant 0 : index
    %43 = vector.load %arg11[%c5, %c1_36, %c0_37] : memref<18x18x256xbf16, #tpu.memory_space<vmem>>, vector<1x16x128xbf16>
    %44 = vector.shape_cast %43 : vector<1x16x128xbf16> to vector<16x128xbf16>
    %45 = vector.shape_cast %42 : vector<16x128xbf16> to vector<1x16x128xbf16>
    tpu.vector_store %arg11[%c5, %c1_36, %c0_37], %45 {strides = array<i32>} : memref<18x18x256xbf16, #tpu.memory_space<vmem>>, vector<1x16x128xbf16>,
    %46 = vector.extract_strided_slice %21 {offsets = [48, 128], sizes = [16, 128], strides = [1, 1]} : vector<128x256xbf16> to vector<16x128xbf16>
    %c6 = arith.constant 6 : index
    %c1_38 = arith.constant 1 : index
    %c0_39 = arith.constant 0 : index
    %47 = vector.load %arg11[%c6, %c1_38, %c0_39] : memref<18x18x256xbf16, #tpu.memory_space<vmem>>, vector<1x16x128xbf16>
    %48 = vector.shape_cast %47 : vector<1x16x128xbf16> to vector<16x128xbf16>
    %49 = vector.shape_cast %46 : vector<16x128xbf16> to vector<1x16x128xbf16>
    tpu.vector_store %arg11[%c6, %c1_38, %c0_39], %49 {strides = array<i32>} : memref<18x18x256xbf16, #tpu.memory_space<vmem>>, vector<1x16x128xbf16>,
    %50 = vector.extract_strided_slice %21 {offsets = [64, 0], sizes = [16, 128], strides = [1, 1]} : vector<128x256xbf16> to vector<16x128xbf16>
    %c7 = arith.constant 7 : index
    %c1_40 = arith.constant 1 : index
    %c0_41 = arith.constant 0 : index
    %51 = vector.load %arg11[%c7, %c1_40, %c0_41] : memref<18x18x256xbf16, #tpu.memory_space<vmem>>, vector<1x16x128xbf16>
    %52 = vector.shape_cast %51 : vector<1x16x128xbf16> to vector<16x128xbf16>
    %53 = vector.shape_cast %50 : vector<16x128xbf16> to vector<1x16x128xbf16>
    tpu.vector_store %arg11[%c7, %c1_40, %c0_41], %53 {strides = array<i32>} : memref<18x18x256xbf16, #tpu.memory_space<vmem>>, vector<1x16x128xbf16>,
    %54 = vector.extract_strided_slice %21 {offsets = [64, 128], sizes = [16, 128], strides = [1, 1]} : vector<128x256xbf16> to vector<16x128xbf16>
    %c8 = arith.constant 8 : index
    %c1_42 = arith.constant 1 : index
    %c0_43 = arith.constant 0 : index
    %55 = vector.load %arg11[%c8, %c1_42, %c0_43] : memref<18x18x256xbf16, #tpu.memory_space<vmem>>, vector<1x16x128xbf16>
    %56 = vector.shape_cast %55 : vector<1x16x128xbf16> to vector<16x128xbf16>
    %57 = vector.shape_cast %54 : vector<16x128xbf16> to vector<1x16x128xbf16>
    tpu.vector_store %arg11[%c8, %c1_42, %c0_43], %57 {strides = array<i32>} : memref<18x18x256xbf16, #tpu.memory_space<vmem>>, vector<1x16x128xbf16>,
    %58 = vector.extract_strided_slice %21 {offsets = [80, 0], sizes = [16, 128], strides = [1, 1]} : vector<128x256xbf16> to vector<16x128xbf16>
    %c9 = arith.constant 9 : index
    %c1_44 = arith.constant 1 : index
    %c0_45 = arith.constant 0 : index
    %59 = vector.load %arg11[%c9, %c1_44, %c0_45] : memref<18x18x256xbf16, #tpu.memory_space<vmem>>, vector<1x16x128xbf16>
    %60 = vector.shape_cast %59 : vector<1x16x128xbf16> to vector<16x128xbf16>
    %61 = vector.shape_cast %58 : vector<16x128xbf16> to vector<1x16x128xbf16>
    tpu.vector_store %arg11[%c9, %c1_44, %c0_45], %61 {strides = array<i32>} : memref<18x18x256xbf16, #tpu.memory_space<vmem>>, vector<1x16x128xbf16>,
    %62 = vector.extract_strided_slice %21 {offsets = [80, 128], sizes = [16, 128], strides = [1, 1]} : vector<128x256xbf16> to vector<16x128xbf16>
    %c10 = arith.constant 10 : index
    %c1_46 = arith.constant 1 : index
    %c0_47 = arith.constant 0 : index
    %63 = vector.load %arg11[%c10, %c1_46, %c0_47] : memref<18x18x256xbf16, #tpu.memory_space<vmem>>, vector<1x16x128xbf16>
    %64 = vector.shape_cast %63 : vector<1x16x128xbf16> to vector<16x128xbf16>
    %65 = vector.shape_cast %62 : vector<16x128xbf16> to vector<1x16x128xbf16>
    tpu.vector_store %arg11[%c10, %c1_46, %c0_47], %65 {strides = array<i32>} : memref<18x18x256xbf16, #tpu.memory_space<vmem>>, vector<1x16x128xbf16>,
    %66 = vector.extract_strided_slice %21 {offsets = [96, 0], sizes = [16, 128], strides = [1, 1]} : vector<128x256xbf16> to vector<16x128xbf16>
    %c11 = arith.constant 11 : index
    %c1_48 = arith.constant 1 : index
    %c0_49 = arith.constant 0 : index
    %67 = vector.load %arg11[%c11, %c1_48, %c0_49] : memref<18x18x256xbf16, #tpu.memory_space<vmem>>, vector<1x16x128xbf16>
    %68 = vector.shape_cast %67 : vector<1x16x128xbf16> to vector<16x128xbf16>
    %69 = vector.shape_cast %66 : vector<16x128xbf16> to vector<1x16x128xbf16>
    tpu.vector_store %arg11[%c11, %c1_48, %c0_49], %69 {strides = array<i32>} : memref<18x18x256xbf16, #tpu.memory_space<vmem>>, vector<1x16x128xbf16>,
    %70 = vector.extract_strided_slice %21 {offsets = [96, 128], sizes = [16, 128], strides = [1, 1]} : vector<128x256xbf16> to vector<16x128xbf16>
    %c12 = arith.constant 12 : index
    %c1_50 = arith.constant 1 : index
    %c0_51 = arith.constant 0 : index
    %71 = vector.load %arg11[%c12, %c1_50, %c0_51] : memref<18x18x256xbf16, #tpu.memory_space<vmem>>, vector<1x16x128xbf16>
    %72 = vector.shape_cast %71 : vector<1x16x128xbf16> to vector<16x128xbf16>
    %73 = vector.shape_cast %70 : vector<16x128xbf16> to vector<1x16x128xbf16>
    tpu.vector_store %arg11[%c12, %c1_50, %c0_51], %73 {strides = array<i32>} : memref<18x18x256xbf16, #tpu.memory_space<vmem>>, vector<1x16x128xbf16>,
    %74 = vector.extract_strided_slice %21 {offsets = [112, 0], sizes = [16, 128], strides = [1, 1]} : vector<128x256xbf16> to vector<16x128xbf16>
    %c13 = arith.constant 13 : index
    %c1_52 = arith.constant 1 : index
    %c0_53 = arith.constant 0 : index
    %75 = vector.load %arg11[%c13, %c1_52, %c0_53] : memref<18x18x256xbf16, #tpu.memory_space<vmem>>, vector<1x16x128xbf16>
    %76 = vector.shape_cast %75 : vector<1x16x128xbf16> to vector<16x128xbf16>
    %77 = vector.shape_cast %74 : vector<16x128xbf16> to vector<1x16x128xbf16>
    tpu.vector_store %arg11[%c13, %c1_52, %c0_53], %77 {strides = array<i32>} : memref<18x18x256xbf16, #tpu.memory_space<vmem>>, vector<1x16x128xbf16>,
    %78 = vector.extract_strided_slice %21 {offsets = [112, 128], sizes = [16, 128], strides = [1, 1]} : vector<128x256xbf16> to vector<16x128xbf16>
    %c14 = arith.constant 14 : index
    %c1_54 = arith.constant 1 : index
    %c0_55 = arith.constant 0 : index
    %79 = vector.load %arg11[%c14, %c1_54, %c0_55] : memref<18x18x256xbf16, #tpu.memory_space<vmem>>, vector<1x16x128xbf16>
    %80 = vector.shape_cast %79 : vector<1x16x128xbf16> to vector<16x128xbf16>
    %81 = vector.shape_cast %78 : vector<16x128xbf16> to vector<1x16x128xbf16>
    tpu.vector_store %arg11[%c14, %c1_54, %c0_55], %81 {strides = array<i32>} : memref<18x18x256xbf16, #tpu.memory_space<vmem>>, vector<1x16x128xbf16>,
    %c0_56 = arith.constant 0 : index
    %c0_57 = arith.constant 0 : index
    %c0_58 = arith.constant 0 : index
    %c0_59 = arith.constant 0 : index
    %82 = vector.load %arg3[%c0_56, %c0_57, %c0_58, %c0_59] : memref<1x2x16x64xbf16, #tpu.memory_space<vmem>>, vector<1x2x16x64xbf16>
    %83 = vector.shape_cast %82 : vector<1x2x16x64xbf16> to vector<2x16x64xbf16>
    %84 = vector.shape_cast %83 : vector<2x16x64xbf16> to vector<32x64xbf16>
    %cst_60 = arith.constant dense<0.000000e+00> : vector<32x256xf32>
    %85 = tpu.matmul %84, %13, %cst_60 {dimension_numbers = #tpu.dot_dimension_numbers<[1], [0], [0], [1], [0, 0, 1, 1], [], []>} : vector<32x64xbf16>, vector<64x256xbf16>, vector<32x256xf32> -> vector<32x256xf32>
    %86 = vector.broadcast %14 : vector<1x256xf32> to vector<32x256xf32>
    %87 = arith.addf %85, %86 : vector<32x256xf32>
    %88 = arith.truncf %87 : vector<32x256xf32> to vector<32x256xbf16>
    %89 = vector.extract_strided_slice %88 {offsets = [0, 0], sizes = [16, 128], strides = [1, 1]} : vector<32x256xbf16> to vector<16x128xbf16>
    %c15 = arith.constant 15 : index
    %c1_61 = arith.constant 1 : index
    %c0_62 = arith.constant 0 : index
    %90 = vector.load %arg11[%c15, %c1_61, %c0_62] : memref<18x18x256xbf16, #tpu.memory_space<vmem>>, vector<1x16x128xbf16>
    %91 = vector.shape_cast %90 : vector<1x16x128xbf16> to vector<16x128xbf16>
    %92 = vector.shape_cast %89 : vector<16x128xbf16> to vector<1x16x128xbf16>
    tpu.vector_store %arg11[%c15, %c1_61, %c0_62], %92 {strides = array<i32>} : memref<18x18x256xbf16, #tpu.memory_space<vmem>>, vector<1x16x128xbf16>,
    %93 = vector.extract_strided_slice %88 {offsets = [0, 128], sizes = [16, 128], strides = [1, 1]} : vector<32x256xbf16> to vector<16x128xbf16>
    %c16_63 = arith.constant 16 : index
    %c1_64 = arith.constant 1 : index
    %c0_65 = arith.constant 0 : index
    %94 = vector.load %arg11[%c16_63, %c1_64, %c0_65] : memref<18x18x256xbf16, #tpu.memory_space<vmem>>, vector<1x16x128xbf16>
    %95 = vector.shape_cast %94 : vector<1x16x128xbf16> to vector<16x128xbf16>
    %96 = vector.shape_cast %93 : vector<16x128xbf16> to vector<1x16x128xbf16>
    tpu.vector_store %arg11[%c16_63, %c1_64, %c0_65], %96 {strides = array<i32>} : memref<18x18x256xbf16, #tpu.memory_space<vmem>>, vector<1x16x128xbf16>,
    %97 = vector.extract_strided_slice %88 {offsets = [16, 0], sizes = [16, 128], strides = [1, 1]} : vector<32x256xbf16> to vector<16x128xbf16>
    %c17_66 = arith.constant 17 : index
    %c1_67 = arith.constant 1 : index
    %c0_68 = arith.constant 0 : index
    %98 = vector.load %arg11[%c17_66, %c1_67, %c0_68] : memref<18x18x256xbf16, #tpu.memory_space<vmem>>, vector<1x16x128xbf16>
    %99 = vector.shape_cast %98 : vector<1x16x128xbf16> to vector<16x128xbf16>
    %100 = vector.shape_cast %97 : vector<16x128xbf16> to vector<1x16x128xbf16>
    tpu.vector_store %arg11[%c17_66, %c1_67, %c0_68], %100 {strides = array<i32>} : memref<18x18x256xbf16, #tpu.memory_space<vmem>>, vector<1x16x128xbf16>,
    %cst_69 = arith.constant 0.000000e+00 : bf16
    %101 = vector.broadcast %cst_69 : bf16 to vector<18x256xbf16>
    %c0_i32 = arith.constant 0 : i32
    %102 = arith.cmpi eq, %arg1, %c0_i32 : i32
    %103 = arith.extui %102 : i1 to i32
    %c0_i32_70 = arith.constant 0 : i32
    %104 = arith.cmpi ne, %103, %c0_i32_70 : i32
    scf.if %104 {
      %c0_125 = arith.constant 0 : index
      %c0_126 = arith.constant 0 : index
      %c0_127 = arith.constant 0 : index
      %167 = vector.load %arg11[%c0_125, %c0_126, %c0_127] : memref<18x18x256xbf16, #tpu.memory_space<vmem>>, vector<1x18x256xbf16>
      %168 = vector.shape_cast %167 : vector<1x18x256xbf16> to vector<18x256xbf16>
      %169 = vector.shape_cast %101 : vector<18x256xbf16> to vector<1x18x256xbf16>
      tpu.vector_store %arg11[%c0_125, %c0_126, %c0_127], %169 {strides = array<i32>} : memref<18x18x256xbf16, #tpu.memory_space<vmem>>, vector<1x18x256xbf16>,
    } else {
    }
    %c1_i32 = arith.constant 1 : i32
    %105 = arith.cmpi eq, %arg1, %c1_i32 : i32
    %106 = arith.extui %105 : i1 to i32
    %c0_i32_71 = arith.constant 0 : i32
    %107 = arith.cmpi ne, %106, %c0_i32_71 : i32
    scf.if %107 {
      %c17_125 = arith.constant 17 : index
      %c0_126 = arith.constant 0 : index
      %c0_127 = arith.constant 0 : index
      %167 = vector.load %arg11[%c17_125, %c0_126, %c0_127] : memref<18x18x256xbf16, #tpu.memory_space<vmem>>, vector<1x18x256xbf16>
      %168 = vector.shape_cast %167 : vector<1x18x256xbf16> to vector<18x256xbf16>
      %169 = vector.shape_cast %101 : vector<18x256xbf16> to vector<1x18x256xbf16>
      tpu.vector_store %arg11[%c17_125, %c0_126, %c0_127], %169 {strides = array<i32>} : memref<18x18x256xbf16, #tpu.memory_space<vmem>>, vector<1x18x256xbf16>,
    } else {
    }
    %cst_72 = arith.constant 0.000000e+00 : f32
    %108 = vector.broadcast %cst_72 : f32 to vector<256x128xf32>
    %c0_73 = arith.constant 0 : index
    %c0_74 = arith.constant 0 : index
    %c0_75 = arith.constant 0 : index
    %109 = vector.load %arg11[%c0_73, %c0_74, %c0_75] : memref<18x18x256xbf16, #tpu.memory_space<vmem>>, vector<18x16x256xbf16>
    %110 = vector.shape_cast %109 : vector<18x16x256xbf16> to vector<288x256xbf16>
    %111 = vector.extract_strided_slice %110 {offsets = [0, 0], sizes = [256, 256], strides = [1, 1]} : vector<288x256xbf16> to vector<256x256xbf16>
    %c0_76 = arith.constant 0 : index
    %c0_77 = arith.constant 0 : index
    %c0_78 = arith.constant 0 : index
    %112 = vector.load %arg8[%c0_76, %c0_77, %c0_78] : memref<9x256x128xbf16, #tpu.memory_space<vmem>>, vector<1x256x128xbf16>
    %113 = vector.shape_cast %112 : vector<1x256x128xbf16> to vector<256x128xbf16>
    %cst_79 = arith.constant dense<0.000000e+00> : vector<256x128xf32>
    %114 = tpu.matmul %111, %113, %cst_79 {dimension_numbers = #tpu.dot_dimension_numbers<[1], [0], [0], [1], [0, 0, 1, 1], [], []>} : vector<256x256xbf16>, vector<256x128xbf16>, vector<256x128xf32> -> vector<256x128xf32>
    %115 = arith.addf %108, %114 : vector<256x128xf32>
    %116 = vector.extract_strided_slice %110 {offsets = [16, 0], sizes = [256, 256], strides = [1, 1]} : vector<288x256xbf16> to vector<256x256xbf16>
    %c3_80 = arith.constant 3 : index
    %c0_81 = arith.constant 0 : index
    %c0_82 = arith.constant 0 : index
    %117 = vector.load %arg8[%c3_80, %c0_81, %c0_82] : memref<9x256x128xbf16, #tpu.memory_space<vmem>>, vector<1x256x128xbf16>
    %118 = vector.shape_cast %117 : vector<1x256x128xbf16> to vector<256x128xbf16>
    %cst_83 = arith.constant dense<0.000000e+00> : vector<256x128xf32>
    %119 = tpu.matmul %116, %118, %cst_83 {dimension_numbers = #tpu.dot_dimension_numbers<[1], [0], [0], [1], [0, 0, 1, 1], [], []>} : vector<256x256xbf16>, vector<256x128xbf16>, vector<256x128xf32> -> vector<256x128xf32>
    %120 = arith.addf %115, %119 : vector<256x128xf32>
    %121 = vector.extract_strided_slice %110 {offsets = [32, 0], sizes = [256, 256], strides = [1, 1]} : vector<288x256xbf16> to vector<256x256xbf16>
    %c6_84 = arith.constant 6 : index
    %c0_85 = arith.constant 0 : index
    %c0_86 = arith.constant 0 : index
    %122 = vector.load %arg8[%c6_84, %c0_85, %c0_86] : memref<9x256x128xbf16, #tpu.memory_space<vmem>>, vector<1x256x128xbf16>
    %123 = vector.shape_cast %122 : vector<1x256x128xbf16> to vector<256x128xbf16>
    %cst_87 = arith.constant dense<0.000000e+00> : vector<256x128xf32>
    %124 = tpu.matmul %121, %123, %cst_87 {dimension_numbers = #tpu.dot_dimension_numbers<[1], [0], [0], [1], [0, 0, 1, 1], [], []>} : vector<256x256xbf16>, vector<256x128xbf16>, vector<256x128xf32> -> vector<256x128xf32>
    %125 = arith.addf %120, %124 : vector<256x128xf32>
    %c0_88 = arith.constant 0 : index
    %c1_89 = arith.constant 1 : index
    %c0_90 = arith.constant 0 : index
    %126 = vector.load %arg11[%c0_88, %c1_89, %c0_90] : memref<18x18x256xbf16, #tpu.memory_space<vmem>>, vector<18x16x256xbf16>
    %127 = vector.shape_cast %126 : vector<18x16x256xbf16> to vector<288x256xbf16>
    %128 = vector.extract_strided_slice %127 {offsets = [0, 0], sizes = [256, 256], strides = [1, 1]} : vector<288x256xbf16> to vector<256x256xbf16>
    %c1_91 = arith.constant 1 : index
    %c0_92 = arith.constant 0 : index
    %c0_93 = arith.constant 0 : index
    %129 = vector.load %arg8[%c1_91, %c0_92, %c0_93] : memref<9x256x128xbf16, #tpu.memory_space<vmem>>, vector<1x256x128xbf16>
    %130 = vector.shape_cast %129 : vector<1x256x128xbf16> to vector<256x128xbf16>
    %cst_94 = arith.constant dense<0.000000e+00> : vector<256x128xf32>
    %131 = tpu.matmul %128, %130, %cst_94 {dimension_numbers = #tpu.dot_dimension_numbers<[1], [0], [0], [1], [0, 0, 1, 1], [], []>} : vector<256x256xbf16>, vector<256x128xbf16>, vector<256x128xf32> -> vector<256x128xf32>
    %132 = arith.addf %125, %131 : vector<256x128xf32>
    %133 = vector.extract_strided_slice %127 {offsets = [16, 0], sizes = [256, 256], strides = [1, 1]} : vector<288x256xbf16> to vector<256x256xbf16>
    %c4_95 = arith.constant 4 : index
    %c0_96 = arith.constant 0 : index
    %c0_97 = arith.constant 0 : index
    %134 = vector.load %arg8[%c4_95, %c0_96, %c0_97] : memref<9x256x128xbf16, #tpu.memory_space<vmem>>, vector<1x256x128xbf16>
    %135 = vector.shape_cast %134 : vector<1x256x128xbf16> to vector<256x128xbf16>
    %cst_98 = arith.constant dense<0.000000e+00> : vector<256x128xf32>
    %136 = tpu.matmul %133, %135, %cst_98 {dimension_numbers = #tpu.dot_dimension_numbers<[1], [0], [0], [1], [0, 0, 1, 1], [], []>} : vector<256x256xbf16>, vector<256x128xbf16>, vector<256x128xf32> -> vector<256x128xf32>
    %137 = arith.addf %132, %136 : vector<256x128xf32>
    %138 = vector.extract_strided_slice %127 {offsets = [32, 0], sizes = [256, 256], strides = [1, 1]} : vector<288x256xbf16> to vector<256x256xbf16>
    %c7_99 = arith.constant 7 : index
    %c0_100 = arith.constant 0 : index
    %c0_101 = arith.constant 0 : index
    %139 = vector.load %arg8[%c7_99, %c0_100, %c0_101] : memref<9x256x128xbf16, #tpu.memory_space<vmem>>, vector<1x256x128xbf16>
    %140 = vector.shape_cast %139 : vector<1x256x128xbf16> to vector<256x128xbf16>
    %cst_102 = arith.constant dense<0.000000e+00> : vector<256x128xf32>
    %141 = tpu.matmul %138, %140, %cst_102 {dimension_numbers = #tpu.dot_dimension_numbers<[1], [0], [0], [1], [0, 0, 1, 1], [], []>} : vector<256x256xbf16>, vector<256x128xbf16>, vector<256x128xf32> -> vector<256x128xf32>
    %142 = arith.addf %137, %141 : vector<256x128xf32>
    %c0_103 = arith.constant 0 : index
    %c2_104 = arith.constant 2 : index
    %c0_105 = arith.constant 0 : index
    %143 = vector.load %arg11[%c0_103, %c2_104, %c0_105] : memref<18x18x256xbf16, #tpu.memory_space<vmem>>, vector<18x16x256xbf16>
    %144 = vector.shape_cast %143 : vector<18x16x256xbf16> to vector<288x256xbf16>
    %145 = vector.extract_strided_slice %144 {offsets = [0, 0], sizes = [256, 256], strides = [1, 1]} : vector<288x256xbf16> to vector<256x256xbf16>
    %c2_106 = arith.constant 2 : index
    %c0_107 = arith.constant 0 : index
    %c0_108 = arith.constant 0 : index
    %146 = vector.load %arg8[%c2_106, %c0_107, %c0_108] : memref<9x256x128xbf16, #tpu.memory_space<vmem>>, vector<1x256x128xbf16>
    %147 = vector.shape_cast %146 : vector<1x256x128xbf16> to vector<256x128xbf16>
    %cst_109 = arith.constant dense<0.000000e+00> : vector<256x128xf32>
    %148 = tpu.matmul %145, %147, %cst_109 {dimension_numbers = #tpu.dot_dimension_numbers<[1], [0], [0], [1], [0, 0, 1, 1], [], []>} : vector<256x256xbf16>, vector<256x128xbf16>, vector<256x128xf32> -> vector<256x128xf32>
    %149 = arith.addf %142, %148 : vector<256x128xf32>
    %150 = vector.extract_strided_slice %144 {offsets = [16, 0], sizes = [256, 256], strides = [1, 1]} : vector<288x256xbf16> to vector<256x256xbf16>
    %c5_110 = arith.constant 5 : index
    %c0_111 = arith.constant 0 : index
    %c0_112 = arith.constant 0 : index
    %151 = vector.load %arg8[%c5_110, %c0_111, %c0_112] : memref<9x256x128xbf16, #tpu.memory_space<vmem>>, vector<1x256x128xbf16>
    %152 = vector.shape_cast %151 : vector<1x256x128xbf16> to vector<256x128xbf16>
    %cst_113 = arith.constant dense<0.000000e+00> : vector<256x128xf32>
    %153 = tpu.matmul %150, %152, %cst_113 {dimension_numbers = #tpu.dot_dimension_numbers<[1], [0], [0], [1], [0, 0, 1, 1], [], []>} : vector<256x256xbf16>, vector<256x128xbf16>, vector<256x128xf32> -> vector<256x128xf32>
    %154 = arith.addf %149, %153 : vector<256x128xf32>
    %155 = vector.extract_strided_slice %144 {offsets = [32, 0], sizes = [256, 256], strides = [1, 1]} : vector<288x256xbf16> to vector<256x256xbf16>
    %c8_114 = arith.constant 8 : index
    %c0_115 = arith.constant 0 : index
    %c0_116 = arith.constant 0 : index
    %156 = vector.load %arg8[%c8_114, %c0_115, %c0_116] : memref<9x256x128xbf16, #tpu.memory_space<vmem>>, vector<1x256x128xbf16>
    %157 = vector.shape_cast %156 : vector<1x256x128xbf16> to vector<256x128xbf16>
    %cst_117 = arith.constant dense<0.000000e+00> : vector<256x128xf32>
    %158 = tpu.matmul %155, %157, %cst_117 {dimension_numbers = #tpu.dot_dimension_numbers<[1], [0], [0], [1], [0, 0, 1, 1], [], []>} : vector<256x256xbf16>, vector<256x128xbf16>, vector<256x128xf32> -> vector<256x128xf32>
    %159 = arith.addf %154, %158 : vector<256x128xf32>
    %c0_118 = arith.constant 0 : index
    %c0_119 = arith.constant 0 : index
    %160 = vector.load %arg9[%c0_118, %c0_119] : memref<1x128xf32, #tpu.memory_space<vmem>>, vector<1x128xf32>
    %161 = vector.broadcast %160 : vector<1x128xf32> to vector<256x128xf32>
    %162 = arith.addf %159, %161 : vector<256x128xf32>
    %cst_120 = arith.constant 0.000000e+00 : f32
    %163 = vector.broadcast %cst_120 : f32 to vector<256x128xf32>
    %164 = arith.maximumf %162, %163 : vector<256x128xf32>
    %165 = vector.shape_cast %164 : vector<256x128xf32> to vector<1x16x16x128xf32>
    %c0_121 = arith.constant 0 : index
    %c0_122 = arith.constant 0 : index
    %c0_123 = arith.constant 0 : index
    %c0_124 = arith.constant 0 : index
    %166 = vector.load %arg10[%c0_121, %c0_122, %c0_123, %c0_124] : memref<1x16x16x128xf32, #tpu.memory_space<vmem>>, vector<1x16x16x128xf32>
    tpu.vector_store %arg10[%c0_121, %c0_122, %c0_123, %c0_124], %165 {strides = array<i32>} : memref<1x16x16x128xf32, #tpu.memory_space<vmem>>, vector<1x16x16x128xf32>,
    return
  }
  func.func @transform_0(%arg0: i32, %arg1: i32) -> (i32, i32, i32, i32) {
    %c0_i32 = arith.constant 0 : i32
    %c0_i32_0 = arith.constant 0 : i32
    %c0_i32_1 = arith.constant 0 : i32
    return %arg0, %arg1, %c0_i32, %c0_i32_0 : i32, i32, i32, i32
  }
  func.func @transform_1(%arg0: i32, %arg1: i32) -> (i32, i32, i32, i32) {
    %c1_i32 = arith.constant 1 : i32
    %0 = arith.addi %arg1, %c1_i32 : i32
    %c4_i32 = arith.constant 4 : i32
    %1 = arith.muli %0, %c4_i32 : i32
    %c0_i32 = arith.constant 0 : i32
    %c0_i32_0 = arith.constant 0 : i32
    %c0_i32_1 = arith.constant 0 : i32
    return %arg0, %1, %c0_i32, %c0_i32_0 : i32, i32, i32, i32
  }
  func.func @transform_2(%arg0: i32, %arg1: i32) -> (i32, i32, i32, i32) {
    %c0_i32 = arith.constant 0 : i32
    %c0_i32_0 = arith.constant 0 : i32
    %c0_i32_1 = arith.constant 0 : i32
    return %arg0, %arg1, %c0_i32, %c0_i32_0 : i32, i32, i32, i32
  }
  func.func @transform_3(%arg0: i32, %arg1: i32) -> (i32, i32, i32, i32) {
    %c1_i32 = arith.constant 1 : i32
    %0 = arith.addi %arg1, %c1_i32 : i32
    %c8_i32 = arith.constant 8 : i32
    %1 = arith.muli %0, %c8_i32 : i32
    %c0_i32 = arith.constant 0 : i32
    %c0_i32_0 = arith.constant 0 : i32
    %c0_i32_1 = arith.constant 0 : i32
    return %arg0, %1, %c0_i32, %c0_i32_0 : i32, i32, i32, i32
  }
  func.func @transform_4(%arg0: i32, %arg1: i32) -> (i32, i32) {
    %c0_i32 = arith.constant 0 : i32
    %c0_i32_0 = arith.constant 0 : i32
    %c0_i32_1 = arith.constant 0 : i32
    return %c0_i32, %c0_i32_0 : i32, i32
  }
  func.func @transform_5(%arg0: i32, %arg1: i32) -> (i32, i32) {
    %c0_i32 = arith.constant 0 : i32
    %c0_i32_0 = arith.constant 0 : i32
    %c0_i32_1 = arith.constant 0 : i32
    return %c0_i32, %c0_i32_0 : i32, i32
  }
  func.func @transform_6(%arg0: i32, %arg1: i32) -> (i32, i32, i32) {
    %c0_i32 = arith.constant 0 : i32
    %c0_i32_0 = arith.constant 0 : i32
    %c0_i32_1 = arith.constant 0 : i32
    %c0_i32_2 = arith.constant 0 : i32
    return %c0_i32, %c0_i32_0, %c0_i32_1 : i32, i32, i32
  }
  func.func @transform_7(%arg0: i32, %arg1: i32) -> (i32, i32) {
    %c0_i32 = arith.constant 0 : i32
    %c0_i32_0 = arith.constant 0 : i32
    %c0_i32_1 = arith.constant 0 : i32
    return %c0_i32, %c0_i32_0 : i32, i32
  }
  func.func @transform_8(%arg0: i32, %arg1: i32) -> (i32, i32, i32, i32) {
    %c0_i32 = arith.constant 0 : i32
    %c0_i32_0 = arith.constant 0 : i32
    %c0_i32_1 = arith.constant 0 : i32
    return %arg0, %arg1, %c0_i32, %c0_i32_0 : i32, i32, i32, i32
  }
}

</mosaic_0001>

<bundles_post_ra>
// kernel: tile.13
= control target key start
LH: loop header
LB: loop body
LE: loop exit
PB: predicated region body
PF: predicated region fallthrough
CT: control target
= control target key end

     0   :  { %s22_s0 = inlined_call_operand.vmem [shape: f32[64], index: 0, kind: input, shape index: {}]   ;;  %s23_s1 = inlined_call_operand.vmem [shape: f32[4,64], index: 1, kind: output, shape index: {}]  }
   0x1   :  { %v4_v0 = vld [vmem:[%s22_s0] ss:$0 sm:$0xff] }
   0x2   :  { %5 = vst [vmem:[%s23_s1] sm:$0xf] %v4_v0 }

// kernel: tile.14
= control target key start
LH: loop header
LB: loop body
LE: loop exit
PB: predicated region body
PF: predicated region fallthrough
CT: control target
= control target key end

     0   :  { %s6_s8 = smov 3  ;;  %vm8_vm0 = vcmask 523264   ;;  %s30_s9 = smov 64   ;;  %vm15_vm1 = vcmask 1048064   ;;  %s50_s0 = inlined_call_operand.vmem [shape: f32[4,64], index: 0, kind: input, shape index: {}]   ;;  %s51_s1 = inlined_call_operand.vmem [shape: f32[1,256], index: 1, kind: output, shape index: {}]  }
   0x1   :  { %v4_v0 = vld [vmem:[%s50_s0] sm:$0xf]  ;;  %s11_s0 = smov 3 }
   0x2   :  { %5 = vst [vmem:[#allocation1] sm:$0xf] %v4_v0 }
   0x9   :  { %v12_v1 = vld [vmem:[#allocation1 + $0x1] ss:$2 sm:%s11_s0]   ;;  %v7_v2 = vld [vmem:[#allocation1] ss:$2 sm:%s6_s8]  }
   0xa   :  { %13 = vrot.lane.b32.xlu0 %v12_v1, %s30_s9  ;;  %9 = vst.msk [vmem:[#allocation0] ss:$8 sm:$0x3] %vm8_vm0, %v7_v2  }
  0x7c   :  { %v14_v3 = vpop.permute.xlu0 %13  }
  0x7d   :  { %16 = vst.msk [vmem:[#allocation0] ss:$8 sm:$0x3] %vm15_vm1, %v14_v3  }
  0x84   :  { %v20_v4 = vld [vmem:[#allocation0] sm:$0x1]  ;;  %v24_v5 = vld [vmem:[#allocation0 + $0x8] sm:$0x1] }
  0x85   :  { %22 = vst [vmem:[%s51_s1] sm:$0x1] %v20_v4  ;;  %28 = vst [vmem:[%s51_s1 + $0x1] sm:$0x1] %v24_v5 }

// kernel: tile.18
= control target key start
LH: loop header
LB: loop body
LE: loop exit
PB: predicated region body
PF: predicated region fallthrough
CT: control target
= control target key end

     0   :  { %s22_s0 = inlined_call_operand.vmem [shape: f32[64], index: 0, kind: input, shape index: {}]   ;;  %s23_s1 = inlined_call_operand.vmem [shape: f32[2,64], index: 1, kind: output, shape index: {}]  }
   0x1   :  { %v4_v0 = vld [vmem:[%s22_s0] ss:$0 sm:$0xff] }
   0x2   :  { %5 = vst [vmem:[%s23_s1] sm:$0x3] %v4_v0 }

// kernel: tile.19
= control target key start
LH: loop header
LB: loop body
LE: loop exit
PB: predicated region body
PF: predicated region fallthrough
CT: control target
= control target key end

     0   :  { %vm7_vm0 = vcmask 523264   ;;  %vm13_vm1 = vcmask 1048064   ;;  %s39_s0 = inlined_call_operand.vmem [shape: f32[2,64], index: 0, kind: input, shape index: {}]   ;;  %s40_s1 = inlined_call_operand.vmem [shape: f32[1,128], index: 1, kind: output, shape index: {}]  }
   0x1   :  { %v4_v0 = vld [vmem:[%s39_s0] sm:$0x3]  ;;  %s22_s0 = smov 64  }
   0x2   :  { %5 = vst [vmem:[#allocation1] sm:$0x3] %v4_v0 }
   0x9   :  { %v10_v1 = vld [vmem:[#allocation1 + $0x1] sm:$0x1]   ;;  %v6_v2 = vld [vmem:[#allocation1] sm:$0x1]  }
   0xa   :  { %11 = vrot.lane.b32.xlu0 %v10_v1, %s22_s0  ;;  %8 = vst.msk [vmem:[#allocation0] sm:$0x1] %vm7_vm0, %v6_v2  }
  0x7c   :  { %v12_v3 = vpop.permute.xlu0 %11  }
  0x7d   :  { %14 = vst.msk [vmem:[#allocation0] sm:$0x1] %vm13_vm1, %v12_v3  }
  0x84   :  { %v18_v4 = vld [vmem:[#allocation0] sm:$0x1] }
  0x85   :  { %20 = vst [vmem:[%s40_s1] sm:$0x1] %v18_v4 }

// kernel: decoder_forward.1
= control target key start
LH: loop header
LB: loop body
LE: loop exit
PB: predicated region body
PF: predicated region fallthrough
CT: control target
= control target key end

     0   :  { %s8524_s27 = smov 0   ;;  %s8526_s28 = smov 0   ;;  %s11064_s0 = inlined_call_operand.vmem [shape: bf16[2,18,16,64], index: 0, kind: input, shape index: {}, may-alias: {0,1}]   ;;  %s11065_s1 = inlined_call_operand.vmem [shape: bf16[2,18,16,64], index: 1, kind: input, shape index: {}, may-alias: {0,1}]   ;;  %s11066_s2 = inlined_call_operand.vmem [shape: bf16[2,34,16,128], index: 2, kind: input, shape index: {}, may-alias: {2,3}]   ;;  %s11067_s3 = inlined_call_operand.vmem [shape: bf16[2,34,16,128], index: 3, kind: input, shape index: {}, may-alias: {2,3}]   ;;  %s11068_s4 = inlined_call_operand.vmem [shape: bf16[64,256], index: 4, kind: input, shape index: {}]   ;;  %s11069_s5 = inlined_call_operand.vmem [shape: f32[1,256], index: 5, kind: input, shape index: {}]   ;;  %s11070_s6 = inlined_call_operand.vmem [shape: bf16[9,256,128], index: 6, kind: input, shape index: {}]   ;;  %s11071_s7 = inlined_call_operand.vmem [shape: f32[1,128], index: 7, kind: input, shape index: {}]   ;;  %s11072_s8 = inlined_call_operand.vmem [shape: f32[2,32,16,128], index: 8, kind: output, shape index: {}]  }
   0x1   :  { %s8528_s29 = smov 0   ;;  %s8530_s30 = smov 0  }
   0x2   :  { %s8532_s9 = smov 0  }
   0x3 LB: > { %s27_s10 = sadd.s32 1, %s8466_s29  ;;  %s30_s11 = sadd.s32 1, %s8470_s30  ;;  %s8474_s9 = sphi %s8532_s9, %s18_s9   ;;  %s8470_s30 = sphi %s8530_s30, %s11208_s30   ;;  %s8466_s29 = sphi %s8528_s29, %s11207_s29   ;;  %s8462_s28 = sphi %s8526_s28, %s11206_s28   ;;  %s8458_s27 = sphi %s8524_s27, %s11205_s27  }
   0x4   : > { %p28_p0 = scmp.ge.s32.totalorder %s27_s10, 2  ;;  %p6440_p1 = scmp.ge.s32.totalorder %s8474_s9, 1 }
   0x5   : > { %p374_p2 = scmp.lt.s32.totalorder %s8474_s9, 5 }
   0x6   : > { %s11210_s10 = smov (%p28_p0, %s27_s10), 0  ;;  %s11212_s11 = smov (!%p28_p0, %s30_s11), %s8470_s30 }
   0x7   : > { %p375_p3 = pnand %p6440_p1, %p374_p2  ;;  %p32_p4 = scmp.ge.s32.totalorder %s11212_s11, 2 }
   0x9   : > { %s11214_s11 = smov (%p32_p4, %s11212_s11), 0  ;;  %378 = sbr.rel (%p375_p3) target bundleno = 1179 (0x49b), region = 52 }
  0x10   : > { %v8177_v0 = vld [vmem:[%s11068_s4 + $0x4] ss:$8 sps:$4 sm:$0xff]   ;;  %s8560_s14 = sshll.u32 %s8458_s27, 3  ;;  %v8179_v1 = vld [vmem:[%s11068_s4] ss:$8 sps:$4 sm:$0xff]   ;;  %v8476_v2 = vmov 0  }
  0x11   : > { %1366 = vmatprep.mubr.bf16.mxu0 %v8476_v2  ;;  %p468_p5 = scmp.lt.s32.totalorder %s8462_s28, 1  ;;  %p470_p6 = scmp.lt.s32.totalorder %s8560_s14, 17  ;;  %2006 = vmatprep.mubr.bf16.mxu1 %v8476_v2  ;;  %v8180_v3 = vld [vmem:[%s11068_s4 + $0x14] ss:$8 sps:$4 sm:$0xff]   ;;  %v8182_v4 = vld [vmem:[%s11068_s4 + $0x10] ss:$8 sps:$4 sm:$0xff]  }
  0x12   : > { %1334 = vmatprep.subr.bf16.mxu0 %v8177_v0  ;;  %1974 = vmatprep.subr.bf16.mxu1 %v8177_v0  ;;  %v8183_v5 = vld [vmem:[%s11068_s4 + $0x24] ss:$8 sps:$4 sm:$0xff]   ;;  %s7105_s26 = sadd.s32 8, %s8560_s14  ;;  %v8185_v6 = vld [vmem:[%s11068_s4 + $0x20] ss:$8 sps:$4 sm:$0xff]   ;;  %vm1309_vm0 = vcmask 523264  }
  0x13   : > { %1335 = vmatpush1.bf16.msra.mxu0 %v8179_v1  ;;  %s11216_s28 = smov (!%p468_p5, %s8462_s28), 1  ;;  %1975 = vmatpush1.bf16.msra.mxu1 %v8179_v1  ;;  %p488_p7 = scmp.lt.s32.totalorder %s7105_s26, 17  ;;  %v8186_v7 = vld [vmem:[%s11068_s4 + $0x34] ss:$8 sps:$4 sm:$0xff]   ;;  %v8188_v8 = vld [vmem:[%s11068_s4 + $0x30] ss:$8 sps:$4 sm:$0xff]  }
  0x14   : > { %1336 = vmatprep.subr.bf16.mxu0 %v8180_v3  ;;  %s471_s23 = scalar_select %p470_p6, %s8560_s14, 17  ;;  %1976 = vmatprep.subr.bf16.mxu1 %v8180_v3  ;;  %vm546_vm1 = vcmask 1040384   ;;  %vm547_vm2 = vsmask.f32 256  ;;  %vm549_vm3 = vcmask 1044484   ;;  %vm1020_vm13 = vcmask 1043456  }
  0x15   : > { %s8132_s24 = smul.u32 36, %s11216_s28  ;;  %s11218_s26 = smov (!%p488_p7, %s7105_s26), 17  ;;  %vm8632_vm4 = vmand %vm546_vm1, %vm547_vm2  ;;  %vm550_vm5 = vsmask.f32 4352  ;;  %v553_v20 = vld [vmem:[#allocation2] sm:$0x11] }
  0x16   : > { %s6442_s25 = sshll.u32 %s471_s23, 1  ;;  %s6446_s23 = sshll.u32 %s11218_s26, 1  ;;  %vm551_vm6 = vmand %vm549_vm3, %vm550_vm5  ;;  %vm607_vm7 = vsmask.f32 7938  ;;  %vm609_vm9 = vsmask.f32 7954 }
  0x17   : > { %1337 = vmatpush1.bf16.msra.mxu0 %v8182_v4  ;;  %s474_s15 = sadd.s32 %s8132_s24, %s6442_s25  ;;  %1977 = vmatpush1.bf16.msra.mxu1 %v8182_v4  ;;  %s492_s25 = sadd.s32 %s8132_s24, %s6446_s23  ;;  %vm8642_vm8 = vmor %vm551_vm6, %vm8632_vm4  ;;  %v612_v23 = vld [vmem:[#allocation2 + $0x10] sm:$0x11]  ;;  %v556_v27 = vld [vmem:[#allocation2 + $0x18] sm:$0x11]  ;;  %vm698_vm15 = vsmask.f32 4368 }
  0x18   : > { %1338 = vmatprep.subr.bf16.mxu0 %v8183_v5  ;;  %s6443_s18 = sshll.u32 %s474_s15, 2  ;;  %1978 = vmatprep.subr.bf16.mxu1 %v8183_v5  ;;  %s6447_s12 = sshll.u32 %s492_s25, 2  ;;  %v554_v22 = vsel %vm8642_vm8, 0, %v553_v20  ;;  %vm608_vm10 = vmand %vm546_vm1, %vm607_vm7  ;;  %v557_v30 = vsel %vm8642_vm8, 0, %v556_v27  ;;  %v559_v31 = vld [vmem:[#allocation2 + $0x30] sm:$0x11] }
  0x19   : > { %s8591_s21 = scalar_lea.vmem %s11064_s0, %s6443_s18  ;;  %s494_s16 = scalar_lea.vmem %s11065_s1, %s6447_s12  ;;  %555 = vst [vmem:[#allocation2] sm:$0x11] %v554_v22  ;;  %vm610_vm11 = vmand %vm549_vm3, %vm609_vm9  ;;  %v560_v32 = vsel %vm8642_vm8, 0, %v559_v31  ;;  %v615_v33 = vld [vmem:[#allocation2 + $0x28] sm:$0x11] }
  0x1a   : > { %v8189_v9 = vld [vmem:[%s8591_s21] sm:$0xff]   ;;  %v8190_v11 = vld [vmem:[%s8591_s21 + $0x8] sm:$0xff]   ;;  %v8191_v13 = vld [vmem:[%s8591_s21 + $0x10] sm:$0xff]   ;;  %s8626_s24 = sshll.u32 %s8458_s27, 4  ;;  %s6457_s26 = sshll.u32 %s11216_s28, 6 }
  0x1b   : > { %1339 = vmatpush1.bf16.msra.mxu0 %v8185_v6  ;;  %1979 = vmatpush1.bf16.msra.mxu1 %v8185_v6  ;;  %v8195_v10 = vld [vmem:[%s494_s16] sm:$0xff]   ;;  %v8197_v12 = vld [vmem:[%s494_s16 + $0x8] sm:$0xff]   ;;  %v8192_v14 = vld [vmem:[%s8591_s21 + $0x18] sm:$0xff]   ;;  %p506_p8 = scmp.lt.s32.totalorder %s8626_s24, 33  ;;  %p537_p9 = scmp.lt.s32.totalorder %s8626_s24, 31 }
  0x1c   : > { %1340 = vmatprep.subr.bf16.mxu0 %v8186_v7  ;;  %1980 = vmatprep.subr.bf16.mxu1 %v8186_v7  ;;  %v8193_v15 = vld [vmem:[%s8591_s21 + $0x20] sm:$0xff]   ;;  %v8194_v16 = vld [vmem:[%s8591_s21 + $0x28] sm:$0xff]   ;;  %v8196_v17 = vld [vmem:[%s8591_s21 + $0x30] sm:$0xff]   ;;  %s8133_s17 = smul.u32 68, %s11216_s28  ;;  %558 = vst [vmem:[#allocation2 + $0x18] sm:$0x11] %v557_v30 }
  0x1d   : > { %v8198_v18 = vld [vmem:[%s8591_s21 + $0x38] sm:$0xff]   ;;  %s507_s18 = scalar_select %p506_p8, %s8626_s24, 33  ;;  %vm8654_vm12 = vmor %vm610_vm11, %vm608_vm10  ;;  %561 = vst [vmem:[#allocation2 + $0x30] sm:$0x11] %v560_v32  ;;  %v618_v38 = vld [vmem:[#allocation2 + $0x40] sm:$0x11] }
  0x1e   : > { %s538_s19 = scalar_select %p537_p9, %s8626_s24, 31  ;;  %v613_v25 = vsel %vm8654_vm12, 0, %v612_v23  ;;  %v616_v35 = vsel %vm8654_vm12, 0, %v615_v33  ;;  %vm8679_vm14 = vmand %vm1020_vm13, %vm607_vm7  ;;  %v619_v44 = vsel %vm8654_vm12, 0, %v618_v38  ;;  %v562_v60 = vld [vmem:[#allocation2 + $0x48] sm:$0x11] }
  0x1f   : > { %1341 = vmatpush1.bf16.msra.mxu0 %v8188_v8  ;;  %1981 = vmatpush1.bf16.msra.mxu1 %v8188_v8  ;;  %s6449_s20 = sshll.u32 %s507_s18, 1  ;;  %614 = vst [vmem:[#allocation2 + $0x10] sm:$0x11] %v613_v25  ;;  %617 = vst [vmem:[#allocation2 + $0x28] sm:$0x11] %v616_v35  ;;  %p6523_p11 = scmp.ne.s32.totalorder %s8458_s27, 0 }
  0x20   : > { %s510_s21 = sadd.s32 %s8133_s17, %s6449_s20  ;;  %s6456_s14 = sshll.u32 %s538_s19, 1  ;;  %v1022_v36 = vld [vmem:[#allocation2 + $0x4] sm:$0xf]  ;;  %620 = vst [vmem:[#allocation2 + $0x40] sm:$0x11] %v619_v44  ;;  %v8477_v42 = vmov (!%p6523_p11), 0  }
  0x21   : > { %s6450_s22 = sshll.u32 %s510_s21, 2  ;;  %s541_s23 = sadd.s32 %s6457_s26, %s6456_s14  ;;  %v624_v31 = vld [vmem:[#allocation2 + $0x70] sm:$0x11] }
  0x22   : > { %6475 = vmatmul.mubr.msk.bf16.vlgmr.msra.gmra.mrb[0].mxu0 %vm1309_vm0, %v8189_v9  ;;  %6515 = vmatmul.mubr.msk.bf16.vlgmr.msra.gmra.mrb[0].mxu1 %vm1309_vm0, %v8195_v10  ;;  %s8661_s13 = scalar_lea.vmem %s11066_s2, %s6450_s22  ;;  %s6458_s15 = sshll.u32 %s541_s23, 3  ;;  %v563_v9 = vsel %vm8642_vm8, 0, %v562_v60  ;;  %v625_v35 = vsel %vm8654_vm12, 0, %v624_v31 }
  0x23   : > { %1374 = vmatprep.mubr.bf16.mxu0 %v8476_v2  ;;  %2016 = vmatprep.mubr.bf16.mxu1 %v8476_v2  ;;  %s8668_s19 = scalar_lea.vmem %s11072_s8, %s6458_s15  ;;  %v666_v26 = vld [vmem:[%s8661_s13] sm:$0xf]  ;;  %v667_v37 = vld [vmem:[%s8661_s13 + $0x4] sm:$0xf]  ;;  %v668_v43 = vld [vmem:[%s8661_s13 + $0x8] sm:$0xf] }
  0x24   : > { %v701_v28 = vshrl.u32 %v666_v26, 16  ;;  %v704_v29 = vshll.u32 %v666_v26, 16  ;;  %v709_v40 = vshrl.u32 %v667_v37, 16  ;;  %v712_v41 = vshll.u32 %v667_v37, 16  ;;  %v1029_v55 = vld [vmem:[#allocation2 + $0x1c] sm:$0xf] }
  0x25   : > { %v718_v48 = vshrl.u32 %v668_v43, 16  ;;  %v721_v50 = vshll.u32 %v668_v43, 16  ;;  %v670_v59 = vld [vmem:[%s8661_s13 + $0x10] sm:$0xf]  ;;  %v669_v63 = vld [vmem:[%s8661_s13 + $0xc] sm:$0xf] }
  0x26   : > { %v703_v34 = vrot.slane %v701_v28, 7  ;;  %v711_v47 = vrot.slane %v709_v40, 7  ;;  %v1026_v49 = vld [vmem:[#allocation2 + $0x14] sm:$0x1]  ;;  %v735_v61 = vshrl.u32 %v670_v59, 16  ;;  %v738_v62 = vshll.u32 %v670_v59, 16 }
  0x27   : > { %v720_v53 = vrot.slane %v718_v48, 7  ;;  %v1036_v1 = vld [vmem:[#allocation2 + $0x34] sm:$0xf]  ;;  %v729_v3 = vshll.u32 %v669_v63, 16  ;;  %v1033_v6 = vld [vmem:[#allocation2 + $0x2c] sm:$0x1] }
  0x28   : > { %v706_v39 = vor.u32 %v704_v29, %v703_v34  ;;  %v707_v45 = vrot.slane %v703_v34, 4  ;;  %v714_v51 = vor.u32 %v712_v41, %v711_v47  ;;  %v716_v52 = vrot.slane %v711_v47, 4  ;;  %v671_v4 = vld [vmem:[%s8661_s13 + $0x14] sm:$0xf]  ;;  %564 = vst [vmem:[#allocation2 + $0x48] sm:$0x11] %v563_v9 }
  0x29   : > { %v723_v58 = vor.u32 %v721_v50, %v720_v53  ;;  %v737_v5 = vrot.slane %v735_v61, 7  ;;  %v743_v7 = vshrl.u32 %v671_v4, 16  ;;  %v746_v8 = vshll.u32 %v671_v4, 16  ;;  %v621_v26 = vld [vmem:[#allocation2 + $0x58] sm:$0x11]  ;;  %s7107_s26 = sadd.s32 16, %s8626_s24 }
  0x2a   : > { %6476 = vmatmul.mubr.msk.bf16.gmra.mrb[4].mxu0 %vm1309_vm0, %v8190_v11  ;;  %6516 = vmatmul.mubr.msk.bf16.gmra.mrb[4].mxu1 %vm1309_vm0, %v8197_v12  ;;  %v1023_v46 = vsel %vm8679_vm14, %v706_v39, %v1022_v36  ;;  %v1027_v57 = vsel %vm8632_vm4, %v716_v52, %v1026_v49  ;;  %v724_v10 = vrot.slane %v720_v53, 4  ;;  %v1040_v12 = vld [vmem:[#allocation2 + $0x44] sm:$0x1]  ;;  %v622_v34 = vsel %vm8654_vm12, 0, %v621_v26  ;;  %v568_v36 = vld [vmem:[#allocation2 + $0x78] sm:$0x11] }
  0x2b   : > { %1384 = vmatprep.mubr.bf16.mxu0 %v8476_v2  ;;  %1024 = vst [vmem:[#allocation2 + $0x4] sm:$0xf] %v1023_v46  ;;  %1028 = vst [vmem:[#allocation2 + $0x14] sm:$0x1] %v1027_v57  ;;  %v1030_v0 = vsel %vm8679_vm14, %v723_v58, %v1029_v55  ;;  %v674_v40 = vld [vmem:[%s8661_s13 + $0x20] sm:$0xf] }
  0x2c   : > { %1031 = vst [vmem:[#allocation2 + $0x1c] sm:$0xf] %v1030_v0  ;;  %623 = vst [vmem:[#allocation2 + $0x58] sm:$0x11] %v622_v34  ;;  %v571_v41 = vld [vmem:[#allocation2 + $0x90] sm:$0x11] }
  0x2d   : > { %626 = vst [vmem:[#allocation2 + $0x70] sm:$0x11] %v625_v35  ;;  %v769_v43 = vshrl.u32 %v674_v40, 16  ;;  %v772_v44 = vshll.u32 %v674_v40, 16  ;;  %v572_v46 = vsel %vm8642_vm8, 0, %v571_v41  ;;  %p524_p10 = scmp.lt.s32.totalorder %s7107_s26, 33 }
  0x2e   : > { %v627_v47 = vld [vmem:[#allocation2 + $0x88] sm:$0x11]  ;;  %v673_v49 = vld [vmem:[%s8661_s13 + $0x1c] sm:$0xf]  ;;  %573 = vst [vmem:[#allocation2 + $0x90] sm:$0x11] %v572_v46 }
  0x2f   : > { %v1043_v48 = vld [vmem:[#allocation2 + $0x4c] sm:$0xf]  ;;  %v760_v52 = vshrl.u32 %v673_v49, 16  ;;  %v763_v53 = vshll.u32 %v673_v49, 16  ;;  %v675_v55 = vld [vmem:[%s8661_s13 + $0x24] sm:$0xf] }
  0x30   : > { %v780_v57 = vshll.u32 %v675_v55, 16  ;;  %v628_v58 = vsel %vm8654_vm12, 0, %v627_v47  ;;  %v630_v59 = vld [vmem:[#allocation2 + $0xa0] sm:$0x11]  ;;  %v677_v26 = vld [vmem:[%s8661_s13 + $0x2c] sm:$0xf] }
  0x31   : > { %629 = vst [vmem:[#allocation2 + $0x88] sm:$0x11] %v628_v58  ;;  %v574_v34 = vld [vmem:[#allocation2 + $0xa8] sm:$0x11]  ;;  %v577_v49 = vld [vmem:[#allocation2 + $0xc0] sm:$0x11] }
  0x32   : > { %6477 = vmatmul.mubr.msk.bf16.gmra.mrb[8].mxu0 %vm1309_vm0, %v8191_v13  ;;  %v672_v13 = vld [vmem:[%s8661_s13 + $0x18] sm:$0xf]  ;;  %s11220_s26 = smov (!%p524_p10, %s7107_s26), 33 }
  0x33   : > { %1394 = vmatprep.mubr.bf16.mxu0 %v8476_v2  ;;  %v755_v23 = vshll.u32 %v672_v13, 16  ;;  %s6453_s24 = sshll.u32 %s11220_s26, 1 }
  0x34   : > { %s528_s20 = sadd.s32 %s8133_s17, %s6453_s24 }
  0x35   : > { %s6454_s21 = sshll.u32 %s528_s20, 2 }
  0x36   : > { %s8822_s28 = scalar_lea.vmem %s11067_s3, %s6454_s21 }
  0x3a   : > { %6478 = vmatmul.mubr.msk.bf16.gmra.mrb[12].mxu0 %vm1309_vm0, %v8192_v14  ;;  %v740_v14 = vor.u32 %v738_v62, %v737_v5 }
  0x3b   : > { %1404 = vmatprep.mubr.bf16.mxu0 %v8476_v2 }
  0x3c   : > { %v1037_v27 = vsel %vm8679_vm14, %v740_v14, %v1036_v1 }
  0x3d   : > { %1038 = vst [vmem:[#allocation2 + $0x34] sm:$0xf] %v1037_v27  ;;  %v1064_v27 = vld [vmem:[#allocation2 + $0x94] sm:$0xf] }
  0x42   : > { %6479 = vmatmul.mubr.msk.bf16.gmra.mrb[16].mxu0 %vm1309_vm0, %v8193_v15  ;;  %v741_v15 = vrot.slane %v737_v5, 4 }
  0x43   : > { %1414 = vmatprep.mubr.bf16.mxu0 %v8476_v2 }
  0x4a   : > { %6480 = vmatmul.mubr.msk.bf16.gmra.mrb[20].mxu0 %vm1309_vm0, %v8194_v16  ;;  %v745_v16 = vrot.slane %v743_v7, 7  ;;  %v1047_v7 = vld [vmem:[#allocation2 + $0x5c] sm:$0x1] }
  0x4b   : > { %1424 = vmatprep.mubr.bf16.mxu0 %v8476_v2 }
  0x4c   : > { %v748_v28 = vor.u32 %v746_v8, %v745_v16  ;;  %v750_v29 = vrot.slane %v745_v16, 4 }
  0x4e   : > { %v1041_v38 = vsel %vm8632_vm4, %v750_v29, %v1040_v12  ;;  %v797_v29 = vshll.u32 %v677_v26, 16 }
  0x4f   : > { %1042 = vst [vmem:[#allocation2 + $0x44] sm:$0x1] %v1041_v38 }
  0x52   : > { %6481 = vmatmul.mubr.msk.bf16.gmra.mrb[24].mxu0 %vm1309_vm0, %v8196_v17  ;;  %v752_v17 = vshrl.u32 %v672_v13, 16 }
  0x53   : > { %1434 = vmatprep.mubr.bf16.mxu0 %v8476_v2  ;;  %v726_v2 = vshrl.u32 %v669_v63, 16  ;;  %v762_v63 = vrot.slane %v760_v52, 7  ;;  %v578_v52 = vsel %vm8642_vm8, 0, %v577_v49 }
  0x54   : > { %v754_v30 = vrot.slane %v752_v17, 7  ;;  %579 = vst [vmem:[#allocation2 + $0xc0] sm:$0x11] %v578_v52 }
  0x55   : > { %v728_v11 = vrot.slane %v726_v2, 7  ;;  %v676_v2 = vld [vmem:[%s8661_s13 + $0x28] sm:$0xf]  ;;  %v765_v5 = vor.u32 %v763_v53, %v762_v63  ;;  %v682_v53 = vld [vmem:[%s8661_s13 + $0x40] sm:$0xf] }
  0x56   : > { %v757_v39 = vor.u32 %v755_v23, %v754_v30  ;;  %v758_v60 = vrot.slane %v754_v30, 4  ;;  %v786_v8 = vshrl.u32 %v676_v2, 16  ;;  %v789_v12 = vshll.u32 %v676_v2, 16 }
  0x57   : > { %v731_v20 = vor.u32 %v729_v3, %v728_v11  ;;  %v733_v22 = vrot.slane %v728_v11, 4  ;;  %v631_v3 = vsel %vm8654_vm12, 0, %v630_v59  ;;  %v1054_v11 = vld [vmem:[#allocation2 + $0x74] sm:$0x1] }
  0x58   : > { %v1044_v50 = vsel %vm8679_vm14, %v757_v39, %v1043_v48  ;;  %632 = vst [vmem:[#allocation2 + $0xa0] sm:$0x11] %v631_v3  ;;  %v575_v39 = vsel %vm8642_vm8, 0, %v574_v34 }
  0x59   : > { %v1034_v33 = vsel %vm8632_vm4, %v733_v22, %v1033_v6  ;;  %1045 = vst [vmem:[#allocation2 + $0x4c] sm:$0xf] %v1044_v50  ;;  %v767_v6 = vrot.slane %v762_v63, 4  ;;  %576 = vst [vmem:[#allocation2 + $0xa8] sm:$0x11] %v575_v39  ;;  %v837_v63 = vshrl.u32 %v682_v53, 16 }
  0x5a   : > { %6482 = vmatmul.mubr.msk.bf16.gmra.mrb[28].mxu0 %vm1309_vm0, %v8198_v18  ;;  %vm8689_vm0 = vmor %vm547_vm2, %vm698_vm15  ;;  %v565_v18 = vld [vmem:[#allocation2 + $0x60] sm:$0x11]  ;;  %1035 = vst [vmem:[#allocation2 + $0x2c] sm:$0x1] %v1034_v33  ;;  %v679_v33 = vld [vmem:[%s8661_s13 + $0x34] sm:$0xf] }
  0x5b   : > { %v715_v56 = vsel %vm8689_vm0, %v707_v45, %v714_v51  ;;  %v566_v25 = vsel %vm8642_vm8, 0, %v565_v18  ;;  %v732_v32 = vsel %vm8689_vm0, %v724_v10, %v731_v20  ;;  %v749_v37 = vsel %vm8689_vm0, %v741_v15, %v748_v28  ;;  %v678_v20 = vld [vmem:[%s8661_s13 + $0x30] sm:$0xf] }
  0x5c   : > { %1025 = vst [vmem:[#allocation2 + $0xc] sm:$0xf] %v715_v56  ;;  %567 = vst [vmem:[#allocation2 + $0x60] sm:$0x11] %v566_v25  ;;  %v569_v45 = vsel %vm8642_vm8, 0, %v568_v36  ;;  %v771_v51 = vrot.slane %v769_v43, 7  ;;  %v766_v13 = vsel %vm8689_vm0, %v758_v60, %v765_v5  ;;  %v1048_v14 = vsel %vm8632_vm4, %v767_v6, %v1047_v7 }
  0x5d   : > { %1032 = vst [vmem:[#allocation2 + $0x24] sm:$0xf] %v732_v32  ;;  %1039 = vst [vmem:[#allocation2 + $0x3c] sm:$0xf] %v749_v37  ;;  %v777_v56 = vshrl.u32 %v675_v55, 16  ;;  %v788_v15 = vrot.slane %v786_v8, 7 }
  0x5e   : > { %570 = vst [vmem:[#allocation2 + $0x78] sm:$0x11] %v569_v45  ;;  %v774_v61 = vor.u32 %v772_v44, %v771_v51  ;;  %v775_v0 = vrot.slane %v771_v51, 4  ;;  %1046 = vst [vmem:[#allocation2 + $0x54] sm:$0xf] %v766_v13  ;;  %v803_v23 = vshrl.u32 %v678_v20, 16 }
  0x5f   : > { %v779_v1 = vrot.slane %v777_v56, 7  ;;  %1049 = vst [vmem:[#allocation2 + $0x5c] sm:$0x1] %v1048_v14  ;;  %v791_v22 = vor.u32 %v789_v12, %v788_v15  ;;  %v806_v25 = vshll.u32 %v678_v20, 16  ;;  %v794_v28 = vshrl.u32 %v677_v26, 16 }
  0x60   : > { %v792_v30 = vrot.slane %v788_v15, 4  ;;  %v805_v32 = vrot.slane %v803_v23, 7  ;;  %v1061_v36 = vld [vmem:[#allocation2 + $0x8c] sm:$0x1]  ;;  %v811_v37 = vshrl.u32 %v679_v33, 16  ;;  %v814_v38 = vshll.u32 %v679_v33, 16 }
  0x61   : > { %v782_v9 = vor.u32 %v780_v57, %v779_v1  ;;  %v784_v10 = vrot.slane %v779_v1, 4  ;;  %v796_v35 = vrot.slane %v794_v28, 7  ;;  %v1068_v43 = vld [vmem:[#allocation2 + $0xa4] sm:$0x1]  ;;  %v680_v44 = vld [vmem:[%s8661_s13 + $0x38] sm:$0xf] }
  0x62   : > { %v808_v40 = vor.u32 %v806_v25, %v805_v32  ;;  %v809_v41 = vrot.slane %v805_v32, 4  ;;  %v813_v47 = vrot.slane %v811_v37, 7  ;;  %v820_v48 = vshrl.u32 %v680_v44, 16  ;;  %v633_v55 = vld [vmem:[#allocation2 + $0xb8] sm:$0x11] }
  0x63   : > { %v1050_v62 = vld [vmem:[#allocation2 + $0x64] sm:$0xf]  ;;  %v783_v16 = vsel %vm8689_vm0, %v775_v0, %v782_v9  ;;  %v1055_v17 = vsel %vm8632_vm4, %v784_v10, %v1054_v11  ;;  %v799_v45 = vor.u32 %v797_v29, %v796_v35  ;;  %v801_v46 = vrot.slane %v796_v35, 4  ;;  %v681_v60 = vld [vmem:[%s8661_s13 + $0x3c] sm:$0xf] }
  0x64   : > { %v1051_v4 = vsel %vm8679_vm14, %v774_v61, %v1050_v62  ;;  %1053 = vst [vmem:[#allocation2 + $0x6c] sm:$0xf] %v783_v16  ;;  %1056 = vst [vmem:[#allocation2 + $0x74] sm:$0x1] %v1055_v17  ;;  %v1065_v50 = vsel %vm8679_vm14, %v808_v40, %v1064_v27  ;;  %v823_v51 = vshll.u32 %v680_v44, 16  ;;  %v816_v58 = vor.u32 %v814_v38, %v813_v47 }
  0x65   : > { %1052 = vst [vmem:[#allocation2 + $0x64] sm:$0xf] %v1051_v4  ;;  %v1057_v18 = vld [vmem:[#allocation2 + $0x7c] sm:$0xf]  ;;  %1066 = vst [vmem:[#allocation2 + $0x94] sm:$0xf] %v1065_v50  ;;  %v800_v56 = vsel %vm8689_vm0, %v792_v30, %v799_v45  ;;  %v1062_v57 = vsel %vm8632_vm4, %v801_v46, %v1061_v36 }
  0x66   : > { %v1058_v31 = vsel %vm8679_vm14, %v791_v22, %v1057_v18  ;;  %v818_v59 = vrot.slane %v813_v47, 4  ;;  %v636_v61 = vld [vmem:[#allocation2 + $0xd0] sm:$0x11]  ;;  %1060 = vst [vmem:[#allocation2 + $0x84] sm:$0xf] %v800_v56  ;;  %v822_v62 = vrot.slane %v820_v48, 7  ;;  %v817_v2 = vsel %vm8689_vm0, %v809_v41, %v816_v58 }
  0x67   : > { %1059 = vst [vmem:[#allocation2 + $0x7c] sm:$0xf] %v1058_v31  ;;  %1063 = vst [vmem:[#allocation2 + $0x8c] sm:$0x1] %v1062_v57  ;;  %v840_v0 = vshll.u32 %v682_v53, 16  ;;  %v634_v1 = vsel %vm8654_vm12, 0, %v633_v55 }
  0x68   : > { %v1069_v3 = vsel %vm8632_vm4, %v818_v59, %v1068_v43  ;;  %635 = vst [vmem:[#allocation2 + $0xb8] sm:$0x11] %v634_v1  ;;  %v828_v4 = vshrl.u32 %v681_v60, 16  ;;  %v831_v5 = vshll.u32 %v681_v60, 16  ;;  %v683_v6 = vld [vmem:[%s8661_s13 + $0x44] sm:$0xf]  ;;  %v825_v7 = vor.u32 %v823_v51, %v822_v62 }
  0x69   : > { %1067 = vst [vmem:[#allocation2 + $0x9c] sm:$0xf] %v817_v2  ;;  %1070 = vst [vmem:[#allocation2 + $0xa4] sm:$0x1] %v1069_v3  ;;  %v839_v8 = vrot.slane %v837_v63, 7  ;;  %v637_v9 = vsel %vm8654_vm12, 0, %v636_v61 }
  0x6a   : > { %v580_v10 = vld [vmem:[#allocation2 + $0xd8] sm:$0x11]  ;;  %v826_v11 = vrot.slane %v822_v62, 4  ;;  %v1071_v12 = vld [vmem:[#allocation2 + $0xac] sm:$0xf]  ;;  %v830_v13 = vrot.slane %v828_v4, 7 }
  0x6b   : > { %638 = vst [vmem:[#allocation2 + $0xd0] sm:$0x11] %v637_v9  ;;  %v845_v14 = vshrl.u32 %v683_v6, 16  ;;  %v1072_v15 = vsel %vm8679_vm14, %v825_v7, %v1071_v12  ;;  %v842_v16 = vor.u32 %v840_v0, %v839_v8  ;;  %v843_v17 = vrot.slane %v839_v8, 4  ;;  %v583_v20 = vld [vmem:[#allocation2 + $0xf0] sm:$0x11] }
  0x6c   : > { %v848_v18 = vshll.u32 %v683_v6, 16  ;;  %1073 = vst [vmem:[#allocation2 + $0xac] sm:$0xf] %v1072_v15  ;;  %v833_v22 = vor.u32 %v831_v5, %v830_v13  ;;  %v835_v23 = vrot.slane %v830_v13, 4  ;;  %v581_v26 = vsel %vm8642_vm8, 0, %v580_v10 }
  0x6d   : > { %v847_v25 = vrot.slane %v845_v14, 7  ;;  %v684_v27 = vld [vmem:[%s8661_s13 + $0x48] sm:$0xf]  ;;  %v1078_v28 = vld [vmem:[#allocation2 + $0xc4] sm:$0xf]  ;;  %v584_v40 = vsel %vm8642_vm8, 0, %v583_v20 }
  0x6e   : > { %582 = vst [vmem:[#allocation2 + $0xd8] sm:$0x11] %v581_v26  ;;  %v854_v29 = vshrl.u32 %v684_v27, 16  ;;  %v857_v30 = vshll.u32 %v684_v27, 16  ;;  %v639_v31 = vld [vmem:[#allocation2 + $0xe8] sm:$0x11]  ;;  %v1079_v32 = vsel %vm8679_vm14, %v842_v16, %v1078_v28  ;;  %v834_v33 = vsel %vm8689_vm0, %v826_v11, %v833_v22 }
  0x6f   : > { %v850_v34 = vor.u32 %v848_v18, %v847_v25  ;;  %v852_v35 = vrot.slane %v847_v25, 4  ;;  %v686_v36 = vld [vmem:[%s8661_s13 + $0x50] sm:$0xf]  ;;  %v642_v37 = vld [vmem:[#allocation2 + $0x100] sm:$0x11]  ;;  %v640_v51 = vsel %vm8654_vm12, 0, %v639_v31 }
  0x70   : > { %1080 = vst [vmem:[#allocation2 + $0xc4] sm:$0xf] %v1079_v32  ;;  %1074 = vst [vmem:[#allocation2 + $0xb4] sm:$0xf] %v834_v33  ;;  %v1075_v38 = vld [vmem:[#allocation2 + $0xbc] sm:$0x1] }
  0x71   : > { %v856_v39 = vrot.slane %v854_v29, 7  ;;  %v598_v41 = vld [vmem:[#allocation2 + $0x168] sm:$0x11]  ;;  %v1076_v43 = vsel %vm8632_vm4, %v835_v23, %v1075_v38  ;;  %v851_v44 = vsel %vm8689_vm0, %v843_v17, %v850_v34  ;;  %585 = vst [vmem:[#allocation2 + $0xf0] sm:$0x11] %v584_v40  ;;  %v871_v45 = vshrl.u32 %v686_v36, 16 }
  0x72   : > { %v874_v46 = vshll.u32 %v686_v36, 16  ;;  %v685_v47 = vld [vmem:[%s8661_s13 + $0x4c] sm:$0xf]  ;;  %v687_v48 = vld [vmem:[%s8661_s13 + $0x54] sm:$0xf]  ;;  %v643_v58 = vsel %vm8654_vm12, 0, %v642_v37 }
  0x73   : > { %1077 = vst [vmem:[#allocation2 + $0xbc] sm:$0x1] %v1076_v43  ;;  %1081 = vst [vmem:[#allocation2 + $0xcc] sm:$0xf] %v851_v44  ;;  %v1082_v49 = vld [vmem:[#allocation2 + $0xd4] sm:$0x1]  ;;  %v859_v50 = vor.u32 %v857_v30, %v856_v39 }
  0x74   : > { %v1083_v52 = vsel %vm8632_vm4, %v852_v35, %v1082_v49  ;;  %v873_v53 = vrot.slane %v871_v45, 7  ;;  %641 = vst [vmem:[#allocation2 + $0xe8] sm:$0x11] %v640_v51  ;;  %v862_v55 = vshrl.u32 %v685_v47, 16  ;;  %v865_v56 = vshll.u32 %v685_v47, 16 }
  0x75   : > { %v696_v57 = vld [vmem:[%s8661_s13 + $0x78] sm:$0xf]  ;;  %1084 = vst [vmem:[#allocation2 + $0xd4] sm:$0x1] %v1083_v52  ;;  %v879_v59 = vshrl.u32 %v687_v48, 16  ;;  %v882_v60 = vshll.u32 %v687_v48, 16 }
  0x76   : > { %v599_v61 = vsel %vm8642_vm8, 0, %v598_v41  ;;  %v860_v62 = vrot.slane %v856_v39, 4  ;;  %v1085_v63 = vld [vmem:[#allocation2 + $0xdc] sm:$0xf]  ;;  %v876_v0 = vor.u32 %v874_v46, %v873_v53  ;;  %v877_v1 = vrot.slane %v873_v53, 4 }
  0x77   : > { %v864_v2 = vrot.slane %v862_v55, 7  ;;  %644 = vst [vmem:[#allocation2 + $0x100] sm:$0x11] %v643_v58  ;;  %600 = vst [vmem:[#allocation2 + $0x168] sm:$0x11] %v599_v61  ;;  %v1086_v3 = vsel %vm8679_vm14, %v859_v50, %v1085_v63  ;;  %v881_v4 = vrot.slane %v879_v59, 7 }
  0x78   : > { %v956_v5 = vshrl.u32 %v696_v57, 16  ;;  %v959_v6 = vshll.u32 %v696_v57, 16  ;;  %v601_v7 = vld [vmem:[#allocation2 + $0x180] sm:$0x11]  ;;  %1087 = vst [vmem:[#allocation2 + $0xdc] sm:$0xf] %v1086_v3 }
  0x79   : > { %v867_v8 = vor.u32 %v865_v56, %v864_v2  ;;  %v869_v9 = vrot.slane %v864_v2, 4  ;;  %v602_v10 = vsel %vm8642_vm8, 0, %v601_v7  ;;  %v657_v11 = vld [vmem:[#allocation2 + $0x178] sm:$0x11]  ;;  %v1092_v13 = vld [vmem:[#allocation2 + $0xf4] sm:$0xf]  ;;  %v884_v14 = vor.u32 %v882_v60, %v881_v4 }
  0x7a   : > { %v697_v12 = vld [vmem:[%s8661_s13 + $0x7c] sm:$0xf]  ;;  %v886_v15 = vrot.slane %v881_v4, 4  ;;  %v958_v16 = vrot.slane %v956_v5, 7  ;;  %603 = vst [vmem:[#allocation2 + $0x180] sm:$0x11] %v602_v10  ;;  %v1093_v17 = vsel %vm8679_vm14, %v876_v0, %v1092_v13 }
  0x7b   : > { %v868_v18 = vsel %vm8689_vm0, %v860_v62, %v867_v8  ;;  %v658_v20 = vsel %vm8654_vm12, 0, %v657_v11  ;;  %v964_v22 = vshrl.u32 %v697_v12, 16  ;;  %v660_v23 = vld [vmem:[#allocation2 + $0x190] sm:$0x11]  ;;  %1094 = vst [vmem:[#allocation2 + $0xf4] sm:$0xf] %v1093_v17  ;;  %v885_v26 = vsel %vm8689_vm0, %v877_v1, %v884_v14 }
  0x7c   : > { %1088 = vst [vmem:[#allocation2 + $0xe4] sm:$0xf] %v868_v18  ;;  %v1089_v25 = vld [vmem:[#allocation2 + $0xec] sm:$0x1]  ;;  %v961_v27 = vor.u32 %v959_v6, %v958_v16  ;;  %659 = vst [vmem:[#allocation2 + $0x178] sm:$0x11] %v658_v20 }
  0x7d   : > { %v967_v28 = vshll.u32 %v697_v12, 16  ;;  %v1090_v29 = vsel %vm8632_vm4, %v869_v9, %v1089_v25  ;;  %1095 = vst [vmem:[#allocation2 + $0xfc] sm:$0xf] %v885_v26  ;;  %v962_v30 = vrot.slane %v958_v16, 4  ;;  %v966_v31 = vrot.slane %v964_v22, 7 }
  0x7e   : > { %v661_v32 = vsel %vm8654_vm12, 0, %v660_v23  ;;  %v586_v33 = vld [vmem:[#allocation2 + $0x108] sm:$0x11]  ;;  %1091 = vst [vmem:[#allocation2 + $0xec] sm:$0x1] %v1090_v29 }
  0x7f   : > { %v1096_v34 = vld [vmem:[#allocation2 + $0x104] sm:$0x1]  ;;  %v1127_v35 = vld [vmem:[#allocation2 + $0x16c] sm:$0xf]  ;;  %662 = vst [vmem:[#allocation2 + $0x190] sm:$0x11] %v661_v32  ;;  %v969_v39 = vor.u32 %v967_v28, %v966_v31 }
  0x80   : > { %v1097_v36 = vsel %vm8632_vm4, %v886_v15, %v1096_v34  ;;  %v1128_v37 = vsel %vm8679_vm14, %v961_v27, %v1127_v35  ;;  %v1134_v38 = vld [vmem:[%s8822_s28] sm:$0xf]  ;;  %v971_v43 = vrot.slane %v966_v31, 4  ;;  %v1135_v44 = vld [vmem:[%s8822_s28 + $0x4] sm:$0xf]  ;;  %v587_v45 = vsel %vm8642_vm8, 0, %v586_v33 }
  0x81   : > { %1098 = vst [vmem:[#allocation2 + $0x104] sm:$0x1] %v1097_v36  ;;  %1129 = vst [vmem:[#allocation2 + $0x16c] sm:$0xf] %v1128_v37  ;;  %v1139_v40 = vshrl.u32 %v1134_v38, 16  ;;  %v1142_v41 = vshll.u32 %v1134_v38, 16  ;;  %v970_v46 = vsel %vm8689_vm0, %v962_v30, %v969_v39 }
  0x82   : > { %v1147_v47 = vshrl.u32 %v1135_v44, 16  ;;  %v1150_v48 = vshll.u32 %v1135_v44, 16  ;;  %588 = vst [vmem:[#allocation2 + $0x108] sm:$0x11] %v587_v45  ;;  %v1179_v50 = vld [vmem:[#allocation2 + $0x184] sm:$0xf] }
  0x83   : > { %v1141_v49 = vrot.slane %v1139_v40, 7  ;;  %1130 = vst [vmem:[#allocation2 + $0x174] sm:$0xf] %v970_v46  ;;  %v688_v51 = vld [vmem:[%s8661_s13 + $0x58] sm:$0xf] }
  0x84   : > { %v1131_v52 = vld [vmem:[#allocation2 + $0x17c] sm:$0x1]  ;;  %v1149_v53 = vrot.slane %v1147_v47, 7  ;;  %v888_v55 = vshrl.u32 %v688_v51, 16  ;;  %v589_v56 = vld [vmem:[#allocation2 + $0x120] sm:$0x11] }
  0x85   : > { %v1144_v57 = vor.u32 %v1142_v41, %v1141_v49  ;;  %v1145_v58 = vrot.slane %v1141_v49, 4  ;;  %v1132_v59 = vsel %vm8632_vm4, %v971_v43, %v1131_v52  ;;  %v891_v60 = vshll.u32 %v688_v51, 16  ;;  %v690_v61 = vld [vmem:[%s8661_s13 + $0x60] sm:$0xf]  ;;  %v645_v2 = vld [vmem:[#allocation2 + $0x118] sm:$0x11] }
  0x86   : > { %1133 = vst [vmem:[#allocation2 + $0x17c] sm:$0x1] %v1132_v59  ;;  %v1152_v62 = vor.u32 %v1150_v48, %v1149_v53  ;;  %v1154_v63 = vrot.slane %v1149_v53, 4  ;;  %v1183_v0 = vld [vmem:[#allocation2 + $0x194] sm:$0x1]  ;;  %v890_v1 = vrot.slane %v888_v55, 7 }
  0x87   : > { %v1180_v3 = vsel %vm8679_vm14, %v1144_v57, %v1179_v50  ;;  %v590_v4 = vsel %vm8642_vm8, 0, %v589_v56  ;;  %v905_v5 = vshrl.u32 %v690_v61, 16  ;;  %v689_v6 = vld [vmem:[%s8661_s13 + $0x5c] sm:$0xf]  ;;  %v908_v10 = vshll.u32 %v690_v61, 16 }
  0x88   : > { %1181 = vst [vmem:[#allocation2 + $0x184] sm:$0xf] %v1180_v3  ;;  %v1153_v7 = vsel %vm8689_vm0, %v1145_v58, %v1152_v62  ;;  %v1184_v8 = vsel %vm8632_vm4, %v1154_v63, %v1183_v0  ;;  %v893_v9 = vor.u32 %v891_v60, %v890_v1  ;;  %591 = vst [vmem:[#allocation2 + $0x120] sm:$0x11] %v590_v4  ;;  %v648_v11 = vld [vmem:[#allocation2 + $0x130] sm:$0x11] }
  0x89   : > { %v691_v12 = vld [vmem:[%s8661_s13 + $0x64] sm:$0xf]  ;;  %1182 = vst [vmem:[#allocation2 + $0x18c] sm:$0xf] %v1153_v7  ;;  %1185 = vst [vmem:[#allocation2 + $0x194] sm:$0x1] %v1184_v8 }
  0x8a   : > { %v1099_v13 = vld [vmem:[#allocation2 + $0x10c] sm:$0xf]  ;;  %v907_v14 = vrot.slane %v905_v5, 7  ;;  %v646_v15 = vsel %vm8654_vm12, 0, %v645_v2  ;;  %v896_v17 = vshrl.u32 %v689_v6, 16  ;;  %v899_v18 = vshll.u32 %v689_v6, 16 }
  0x8b   : > { %v1100_v16 = vsel %vm8679_vm14, %v893_v9, %v1099_v13  ;;  %647 = vst [vmem:[#allocation2 + $0x118] sm:$0x11] %v646_v15  ;;  %v649_v20 = vsel %vm8654_vm12, 0, %v648_v11  ;;  %v604_v22 = vld [vmem:[#allocation2 + $0x198] sm:$0x11]  ;;  %v894_v23 = vrot.slane %v890_v1, 4 }
  0x8c   : > { %1101 = vst [vmem:[#allocation2 + $0x10c] sm:$0xf] %v1100_v16  ;;  %650 = vst [vmem:[#allocation2 + $0x130] sm:$0x11] %v649_v20  ;;  %v913_v25 = vshrl.u32 %v691_v12, 16  ;;  %v916_v26 = vshll.u32 %v691_v12, 16  ;;  %v910_v28 = vor.u32 %v908_v10, %v907_v14 }
  0x8d   : > { %v1136_v27 = vld [vmem:[%s8822_s28 + $0x8] sm:$0xf]  ;;  %v898_v29 = vrot.slane %v896_v17, 7  ;;  %v605_v30 = vsel %vm8642_vm8, 0, %v604_v22  ;;  %v911_v33 = vrot.slane %v907_v14, 4 }
  0x8e   : > { %v1156_v31 = vshrl.u32 %v1136_v27, 16  ;;  %v663_v32 = vld [vmem:[#allocation2 + $0x1a8] sm:$0x11]  ;;  %v915_v34 = vrot.slane %v913_v25, 7  ;;  %606 = vst [vmem:[#allocation2 + $0x198] sm:$0x11] %v605_v30 }
  0x8f   : > { %v1159_v35 = vshll.u32 %v1136_v27, 16  ;;  %v664_v36 = vsel %vm8654_vm12, 0, %v663_v32  ;;  %v1137_v37 = vld [vmem:[%s8822_s28 + $0xc] sm:$0xf]  ;;  %v901_v38 = vor.u32 %v899_v18, %v898_v29  ;;  %v903_v39 = vrot.slane %v898_v29, 4 }
  0x90   : > { %v1158_v40 = vrot.slane %v1156_v31, 7  ;;  %665 = vst [vmem:[#allocation2 + $0x1a8] sm:$0x11] %v664_v36  ;;  %v1164_v41 = vshrl.u32 %v1137_v37, 16  ;;  %v592_v43 = vld [vmem:[#allocation2 + $0x138] sm:$0x11]  ;;  %v918_v45 = vor.u32 %v916_v26, %v915_v34 }
  0x91   : > { %v1106_v44 = vld [vmem:[#allocation2 + $0x124] sm:$0xf]  ;;  %v920_v46 = vrot.slane %v915_v34, 4  ;;  %v1167_v47 = vshll.u32 %v1137_v37, 16  ;;  %v692_v48 = vld [vmem:[%s8661_s13 + $0x68] sm:$0xf]  ;;  %v902_v50 = vsel %vm8689_vm0, %v894_v23, %v901_v38 }
  0x92   : > { %v1107_v49 = vsel %vm8679_vm14, %v910_v28, %v1106_v44  ;;  %v1162_v51 = vrot.slane %v1158_v40, 4  ;;  %v595_v52 = vld [vmem:[#allocation2 + $0x150] sm:$0x11]  ;;  %1102 = vst [vmem:[#allocation2 + $0x114] sm:$0xf] %v902_v50  ;;  %v919_v55 = vsel %vm8689_vm0, %v911_v33, %v918_v45  ;;  %v1161_v56 = vor.u32 %v1159_v35, %v1158_v40 }
  0x93   : > { %1108 = vst [vmem:[#allocation2 + $0x124] sm:$0xf] %v1107_v49  ;;  %v1103_v53 = vld [vmem:[#allocation2 + $0x11c] sm:$0x1]  ;;  %v1166_v57 = vrot.slane %v1164_v41, 7  ;;  %v593_v58 = vsel %vm8642_vm8, 0, %v592_v43  ;;  %v1219_v45 = vlaneseq }
  0x94   : > { %v694_v59 = vld [vmem:[%s8661_s13 + $0x70] sm:$0xf]  ;;  %v1104_v60 = vsel %vm8632_vm4, %v903_v39, %v1103_v53  ;;  %1109 = vst [vmem:[#allocation2 + $0x12c] sm:$0xf] %v919_v55  ;;  %v1110_v61 = vld [vmem:[#allocation2 + $0x134] sm:$0x1] }
  0x95   : > { %594 = vst [vmem:[#allocation2 + $0x138] sm:$0x11] %v593_v58  ;;  %v922_v62 = vshrl.u32 %v692_v48, 16  ;;  %v925_v63 = vshll.u32 %v692_v48, 16  ;;  %1105 = vst [vmem:[#allocation2 + $0x11c] sm:$0x1] %v1104_v60  ;;  %v1111_v0 = vsel %vm8632_vm4, %v920_v46, %v1110_v61  ;;  %v1169_v1 = vor.u32 %v1167_v47, %v1166_v57 }
  0x96   : > { %v1171_v2 = vrot.slane %v1166_v57, 4  ;;  %v596_v3 = vsel %vm8642_vm8, 0, %v595_v52  ;;  %v651_v4 = vld [vmem:[#allocation2 + $0x148] sm:$0x11]  ;;  %1112 = vst [vmem:[#allocation2 + $0x134] sm:$0x1] %v1111_v0 }
  0x97   : > { %v1186_v5 = vld [vmem:[#allocation2 + $0x19c] sm:$0xf]  ;;  %v924_v6 = vrot.slane %v922_v62, 7  ;;  %597 = vst [vmem:[#allocation2 + $0x150] sm:$0x11] %v596_v3  ;;  %v939_v7 = vshrl.u32 %v694_v59, 16  ;;  %v1170_v10 = vsel %vm8689_vm0, %v1162_v51, %v1169_v1 }
  0x98   : > { %v693_v8 = vld [vmem:[%s8661_s13 + $0x6c] sm:$0xf]  ;;  %v1187_v9 = vsel %vm8679_vm14, %v1161_v56, %v1186_v5  ;;  %v942_v12 = vshll.u32 %v694_v59, 16  ;;  %v652_v21 = vsel %vm8654_vm12, 0, %v651_v4  ;;  %1189 = vst [vmem:[#allocation2 + $0x1a4] sm:$0xf] %v1170_v10 }
  0x99   : > { %v1190_v11 = vld [vmem:[#allocation2 + $0x1ac] sm:$0x1]  ;;  %1188 = vst [vmem:[#allocation2 + $0x19c] sm:$0xf] %v1187_v9  ;;  %v927_v14 = vor.u32 %v925_v63, %v924_v6  ;;  %v941_v15 = vrot.slane %v939_v7, 7  ;;  %v930_v18 = vshrl.u32 %v693_v8, 16 }
  0x9a   : > { %v1191_v13 = vsel %vm8632_vm4, %v1171_v2, %v1190_v11  ;;  %653 = vst [vmem:[#allocation2 + $0x148] sm:$0x11] %v652_v21  ;;  %v654_v16 = vld [vmem:[#allocation2 + $0x160] sm:$0x11]  ;;  %v695_v17 = vld [vmem:[%s8661_s13 + $0x74] sm:$0xf] }
  0x9b   : > { %1192 = vst [vmem:[#allocation2 + $0x1ac] sm:$0x1] %v1191_v13  ;;  %v933_v20 = vshll.u32 %v693_v8, 16  ;;  %v655_v22 = vsel %vm8654_vm12, 0, %v654_v16  ;;  %v947_v23 = vshrl.u32 %v695_v17, 16  ;;  %v944_v25 = vor.u32 %v942_v12, %v941_v15 }
  0x9c   : > { %656 = vst [vmem:[#allocation2 + $0x160] sm:$0x11] %v655_v22  ;;  %v950_v26 = vshll.u32 %v695_v17, 16  ;;  %v928_v27 = vrot.slane %v924_v6, 4  ;;  %v1113_v28 = vld [vmem:[#allocation2 + $0x13c] sm:$0xf] }
  0x9d   : > { %v945_v29 = vrot.slane %v941_v15, 4  ;;  %v932_v30 = vrot.slane %v930_v18, 7  ;;  %v949_v31 = vrot.slane %v947_v23, 7  ;;  %v1114_v32 = vsel %vm8679_vm14, %v927_v14, %v1113_v28  ;;  %v1201_v48 = vld [vmem:[%s11069_s5] sm:$0x3] }
  0x9e   : > { %1115 = vst [vmem:[#allocation2 + $0x13c] sm:$0xf] %v1114_v32  ;;  %v1120_v33 = vld [vmem:[#allocation2 + $0x154] sm:$0xf]  ;;  %v1220_v46 = vshrl.u32 %v1219_v45, 7 }
  0x9f   : > { %v935_v34 = vor.u32 %v933_v20, %v932_v30  ;;  %v937_v35 = vrot.slane %v932_v30, 4  ;;  %v952_v36 = vor.u32 %v950_v26, %v949_v31  ;;  %v1121_v24 = vsel %vm8679_vm14, %v944_v25, %v1120_v33  ;;  %v2054_v13 = vld [vmem:[#allocation2 + $0x168] sm:$0xf]  ;;  %v1485_v26 = vld [vmem:[#allocation2] sm:$0xf] }
  0xa0   : > { %v954_v37 = vrot.slane %v949_v31, 4  ;;  %1122 = vst [vmem:[#allocation2 + $0x154] sm:$0xf] %v1121_v24  ;;  %v1225_v47 = vsub.s32 1, %v1220_v46  ;;  %v1221_v49 = vsub.s32 0, %v1220_v46 }
  0xa1   : > { %v936_v38 = vsel %vm8689_vm0, %v928_v27, %v935_v34  ;;  %v1117_v39 = vld [vmem:[#allocation2 + $0x14c] sm:$0x1]  ;;  %v953_v40 = vsel %vm8689_vm0, %v945_v29, %v952_v36 }
  0xa2   : > { %1116 = vst [vmem:[#allocation2 + $0x144] sm:$0xf] %v936_v38  ;;  %v1118_v41 = vsel %vm8632_vm4, %v937_v35, %v1117_v39  ;;  %1123 = vst [vmem:[#allocation2 + $0x15c] sm:$0xf] %v953_v40  ;;  %v8903_v50 = vrot.slane %v1201_v48, %v1225_v47  ;;  %v8905_v51 = vrot.slane %v1201_v48, %v1221_v49  ;;  %v1489_v38 = vld [vmem:[#allocation2 + $0x10] sm:$0x1] }
  0xa3   : > { %1119 = vst [vmem:[#allocation2 + $0x14c] sm:$0x1] %v1118_v41  ;;  %v1124_v43 = vld [vmem:[#allocation2 + $0x164] sm:$0x1] }
  0xa4   : > { %v1125_v44 = vsel %vm8632_vm4, %v954_v37, %v1124_v43 }
  0xa5   : > { %1126 = vst [vmem:[#allocation2 + $0x164] sm:$0x1] %v1125_v44 }
  0xf5   : > { %v1368_v52 = vpop.f32.mrb[0].mxu0  ;;  %v2008_v53 = vpop.f32.mrb[0].mxu1 }
  0xf6   : > { %v1369_v55 = vpop.f32.mrb[1].mxu0  ;;  %v2009_v56 = vadd.f32 %v2008_v53, %v8905_v51  ;;  %v2010_v57 = vpop.f32.mrb[1].mxu1 }
  0xf7   : > { %v1370_v58 = vadd.f32 %v1369_v55, %v8903_v50  ;;  %v1371_v59 = vpop.f32.mrb[2].mxu0  ;;  %v2011_v60 = vadd.f32 %v2010_v57, %v8903_v50  ;;  %v2012_v61 = vpop.f32.mrb[2].mxu1  ;;  %v2086_v57 = vld [vmem:[#allocation2 + $0x180] sm:$0xf] }
  0xf8   : > { %v1372_v62 = vpop.f32.mrb[3].mxu0  ;;  %v7098_v63 = vpack.c.bf16 %v2009_v56, %v2009_v56  ;;  %v2013_v0 = vadd.f32 %v2012_v61, %v8905_v51  ;;  %v2014_v1 = vpop.f32.mrb[3].mxu1 }
  0xf9   : > { %v7068_v2 = vpack.c.bf16 %v1370_v58, %v1370_v58  ;;  %v1373_v3 = vadd.f32 %v1372_v62, %v8903_v50  ;;  %v7100_v4 = vpack.c.bf16 %v2011_v60, %v2011_v60  ;;  %v8915_v8 = vadd.f32 %v2014_v1, %v8903_v50 }
  0xfa   : > { %v2034_v5 = vshrl.u32 %v7098_v63, 16  ;;  %v2037_v6 = vshll.u32 %v7098_v63, 16  ;;  %v8912_v7 = vpack.c.bf16 %v2013_v0, %v2013_v0 }
  0xfb   : > { %v1466_v9 = vshrl.u32 %v7068_v2, 16  ;;  %v1469_v10 = vshll.u32 %v7068_v2, 16  ;;  %v7069_v11 = vpack.c.bf16 %v1373_v3, %v1373_v3  ;;  %v2067_v12 = vshrl.u32 %v7100_v4, 16  ;;  %v1518_v2 = vld [vmem:[#allocation2 + $0x18] sm:$0xf] }
  0xfc   : > { %v8917_v21 = vrot.slane %v2034_v5, 7  ;;  %v2070_v14 = vshll.u32 %v7100_v4, 16  ;;  %v2042_v15 = vshrl.u32 %v8912_v7, 16  ;;  %v2045_v16 = vshll.u32 %v8912_v7, 16 }
  0xfd   : > { %v1468_v17 = vrot.slane %v1466_v9, 7  ;;  %v1474_v18 = vshrl.u32 %v7069_v11, 16  ;;  %v1477_v20 = vshll.u32 %v7069_v11, 16  ;;  %v1376_v22 = vpop.f32.mrb[4].mxu0  ;;  %v8921_v23 = vrot.slane %v2067_v12, 7  ;;  %v8923_v25 = vpop.f32.mrb[4].mxu1 }
  0xfe   : > { %v1377_v27 = vadd.f32 %v1376_v22, %v8905_v51  ;;  %v1378_v28 = vpop.f32.mrb[5].mxu0  ;;  %v2039_v29 = vor.u32 %v2037_v6, %v8917_v21  ;;  %v2040_v30 = vrot.slane %v8917_v21, 4  ;;  %v8928_v31 = vrot.slane %v2042_v15, 7  ;;  %v2020_v32 = vpop.f32.mrb[5].mxu1  ;;  %v1551_v11 = vld [vmem:[#allocation2 + $0x30] sm:$0xf] }
  0xff   : > { %v1471_v33 = vor.u32 %v1469_v10, %v1468_v17  ;;  %v1472_v34 = vrot.slane %v1468_v17, 4  ;;  %v1476_v35 = vrot.slane %v1474_v18, 7  ;;  %v1379_v36 = vadd.f32 %v1378_v28, %v8903_v50  ;;  %v1380_v24 = vpop.f32.mrb[6].mxu0  ;;  %v8931_v37 = vpop.f32.mrb[6].mxu1  ;;  %v1522_v18 = vld [vmem:[#allocation2 + $0x28] sm:$0x1] }
 0x100   : > { %v7070_v39 = vpack.c.bf16 %v1377_v27, %v1377_v27  ;;  %v1381_v40 = vadd.f32 %v1380_v24, %v8905_v51  ;;  %v1382_v41 = vpop.f32.mrb[7].mxu0  ;;  %v2055_v43 = vsel %vm8679_vm14, %v2039_v29, %v2054_v13  ;;  %v2072_v44 = vor.u32 %v2070_v14, %v8921_v23  ;;  %v2023_v45 = vpop.f32.mrb[7].mxu1 }
 0x101   : > { %v1486_v46 = vsel %vm8679_vm14, %v1471_v33, %v1485_v26  ;;  %v1479_v47 = vor.u32 %v1477_v20, %v1476_v35  ;;  %v1481_v48 = vrot.slane %v1476_v35, 4  ;;  %v7072_v49 = vpack.c.bf16 %v1379_v36, %v1379_v36  ;;  %2056 = vst [vmem:[#allocation2 + $0x168] sm:$0xf] %v2055_v43 }
 0x102   : > { %1487 = vst [vmem:[#allocation2] sm:$0xf] %v1486_v46  ;;  %v1498_v52 = vshrl.u32 %v7070_v39, 16  ;;  %v1501_v53 = vshll.u32 %v7070_v39, 16  ;;  %v7071_v55 = vpack.c.bf16 %v1381_v40, %v1381_v40  ;;  %v1383_v56 = vadd.f32 %v1382_v41, %v8903_v50 }
 0x103   : > { %v1480_v58 = vsel %vm8689_vm0, %v1472_v34, %v1479_v47  ;;  %v1490_v59 = vsel %vm8632_vm4, %v1481_v48, %v1489_v38  ;;  %v1531_v60 = vshrl.u32 %v7072_v49, 16  ;;  %v1534_v61 = vshll.u32 %v7072_v49, 16  ;;  %v1555_v34 = vld [vmem:[#allocation2 + $0x40] sm:$0x1]  ;;  %2130 = vst [vmem:[#allocation2] sm:$0xff] (!%p6523_p11), %v8477_v42 }
 0x104   : > { %1488 = vst [vmem:[#allocation2 + $0x8] sm:$0xf] %v1480_v58  ;;  %1491 = vst [vmem:[#allocation2 + $0x10] sm:$0x1] %v1490_v59  ;;  %v1500_v62 = vrot.slane %v1498_v52, 7  ;;  %v1506_v63 = vshrl.u32 %v7071_v55, 16  ;;  %v7073_v1 = vpack.c.bf16 %v1383_v56, %v1383_v56  ;;  %v2087_v6 = vsel %vm8679_vm14, %v2072_v44, %v2086_v57 }
 0x105   : > { %v1509_v0 = vshll.u32 %v7071_v55, 16  ;;  %v1533_v3 = vrot.slane %v1531_v60, 7  ;;  %v1386_v4 = vpop.f32.mrb[8].mxu0  ;;  %v2073_v5 = vrot.slane %v8921_v23, 4  ;;  %v2047_v7 = vor.u32 %v2045_v16, %v8928_v31  ;;  %2088 = vst [vmem:[#allocation2 + $0x180] sm:$0xf] %v2087_v6 }
 0x106   : > { %v1503_v9 = vor.u32 %v1501_v53, %v1500_v62  ;;  %v1504_v10 = vrot.slane %v1500_v62, 4  ;;  %v1508_v12 = vrot.slane %v1506_v63, 7  ;;  %v1539_v13 = vshrl.u32 %v7073_v1, 16  ;;  %v1388_v14 = vpop.f32.mrb[9].mxu0  ;;  %v1584_v59 = vld [vmem:[#allocation2 + $0x48] sm:$0xf] }
 0x107   : > { %v1536_v15 = vor.u32 %v1534_v61, %v1533_v3  ;;  %v1537_v17 = vrot.slane %v1533_v3, 4  ;;  %v1542_v20 = vshll.u32 %v7073_v1, 16  ;;  %v1387_v22 = vadd.f32 %v1386_v4, %v8905_v51  ;;  %v1390_v26 = vpop.f32.mrb[10].mxu0  ;;  %v1617_v4 = vld [vmem:[#allocation2 + $0x60] sm:$0xf]  ;;  %2131 = vst [vmem:[#allocation2 + $0x8] sm:$0xff] (!%p6523_p11), %v8477_v42 }
 0x108   : > { %v1519_v27 = vsel %vm8679_vm14, %v1503_v9, %v1518_v2  ;;  %v1511_v28 = vor.u32 %v1509_v0, %v1508_v12  ;;  %v1513_v29 = vrot.slane %v1508_v12, 4  ;;  %v1541_v16 = vrot.slane %v1539_v13, 7  ;;  %v1392_v32 = vpop.f32.mrb[11].mxu0  ;;  %2132 = vst [vmem:[#allocation2 + $0x10] sm:$0x11] (!%p6523_p11), %v8477_v42 }
 0x109   : > { %1520 = vst [vmem:[#allocation2 + $0x18] sm:$0xf] %v1519_v27  ;;  %v1552_v33 = vsel %vm8679_vm14, %v1536_v15, %v1551_v11  ;;  %v7074_v35 = vpack.c.bf16 %v1387_v22, %v1387_v22  ;;  %v1389_v36 = vadd.f32 %v1388_v14, %v8903_v50  ;;  %v1391_v24 = vadd.f32 %v1390_v26, %v8905_v51 }
 0x10a   : > { %1553 = vst [vmem:[#allocation2 + $0x30] sm:$0xf] %v1552_v33  ;;  %v1512_v38 = vsel %vm8689_vm0, %v1504_v10, %v1511_v28  ;;  %v1523_v39 = vsel %vm8632_vm4, %v1513_v29, %v1522_v18  ;;  %v1544_v40 = vor.u32 %v1542_v20, %v1541_v16  ;;  %v1546_v41 = vrot.slane %v1541_v16, 4  ;;  %v1621_v29 = vld [vmem:[#allocation2 + $0x70] sm:$0x1] }
 0x10b   : > { %1521 = vst [vmem:[#allocation2 + $0x20] sm:$0xf] %v1512_v38  ;;  %1524 = vst [vmem:[#allocation2 + $0x28] sm:$0x1] %v1523_v39  ;;  %v1564_v43 = vshrl.u32 %v7074_v35, 16  ;;  %v1567_v44 = vshll.u32 %v7074_v35, 16  ;;  %v7076_v45 = vpack.c.bf16 %v1389_v36, %v1389_v36  ;;  %v7075_v46 = vpack.c.bf16 %v1391_v24, %v1391_v24 }
 0x10c   : > { %v1545_v47 = vsel %vm8689_vm0, %v1537_v17, %v1544_v40  ;;  %v1556_v48 = vsel %vm8632_vm4, %v1546_v41, %v1555_v34  ;;  %v1393_v49 = vadd.f32 %v1392_v32, %v8903_v50  ;;  %v2048_v52 = vsel %vm8689_vm0, %v2040_v30, %v2047_v7  ;;  %v1588_v17 = vld [vmem:[#allocation2 + $0x58] sm:$0x1] }
 0x10d   : > { %1554 = vst [vmem:[#allocation2 + $0x38] sm:$0xf] %v1545_v47  ;;  %1557 = vst [vmem:[#allocation2 + $0x40] sm:$0x1] %v1556_v48  ;;  %v1566_v53 = vrot.slane %v1564_v43, 7  ;;  %v1597_v55 = vshrl.u32 %v7076_v45, 16 }
 0x10e   : > { %v1600_v56 = vshll.u32 %v7076_v45, 16  ;;  %v1572_v57 = vshrl.u32 %v7075_v46, 16  ;;  %v1396_v58 = vpop.f32.mrb[12].mxu0  ;;  %2057 = vst [vmem:[#allocation2 + $0x170] sm:$0xf] %v2048_v52  ;;  %v1575_v60 = vshll.u32 %v7075_v46, 16  ;;  %v7077_v61 = vpack.c.bf16 %v1393_v49, %v1393_v49 }
 0x10f   : > { %v1397_v62 = vadd.f32 %v1396_v58, %v8905_v51  ;;  %v1398_v63 = vpop.f32.mrb[13].mxu0  ;;  %v2049_v0 = vrot.slane %v8928_v31, 4  ;;  %v1569_v21 = vor.u32 %v1567_v44, %v1566_v53  ;;  %v1570_v1 = vrot.slane %v1566_v53, 4  ;;  %v1650_v24 = vld [vmem:[#allocation2 + $0x78] sm:$0xf] }
 0x110   : > { %v1599_v2 = vrot.slane %v1597_v55, 7  ;;  %v1574_v30 = vrot.slane %v1572_v57, 7  ;;  %v1400_v3 = vpop.f32.mrb[14].mxu0  ;;  %v1605_v6 = vshrl.u32 %v7077_v61, 16  ;;  %v1608_v7 = vshll.u32 %v7077_v61, 16 }
 0x111   : > { %v7078_v9 = vpack.c.bf16 %v1397_v62, %v1397_v62  ;;  %v1399_v10 = vadd.f32 %v1398_v63, %v8903_v50  ;;  %v1402_v11 = vpop.f32.mrb[15].mxu0  ;;  %v1585_v12 = vsel %vm8679_vm14, %v1569_v21, %v1584_v59  ;;  %v1401_v32 = vadd.f32 %v1400_v3, %v8905_v51  ;;  %v1683_v58 = vld [vmem:[#allocation2 + $0x90] sm:$0xf] }
 0x112   : > { %v1602_v13 = vor.u32 %v1600_v56, %v1599_v2  ;;  %v1603_v14 = vrot.slane %v1599_v2, 4  ;;  %v1577_v15 = vor.u32 %v1575_v60, %v1574_v30  ;;  %1586 = vst [vmem:[#allocation2 + $0x48] sm:$0xf] %v1585_v12  ;;  %v1579_v18 = vrot.slane %v1574_v30, 4  ;;  %v1654_v30 = vld [vmem:[#allocation2 + $0x88] sm:$0x1] }
 0x113   : > { %v1607_v20 = vrot.slane %v1605_v6, 7  ;;  %v1630_v22 = vshrl.u32 %v7078_v9, 16  ;;  %v1633_v26 = vshll.u32 %v7078_v9, 16  ;;  %v7080_v16 = vpack.c.bf16 %v1399_v10, %v1399_v10 }
 0x114   : > { %v1618_v27 = vsel %vm8679_vm14, %v1602_v13, %v1617_v4  ;;  %v1578_v28 = vsel %vm8689_vm0, %v1570_v1, %v1577_v15  ;;  %v1589_v33 = vsel %vm8632_vm4, %v1579_v18, %v1588_v17  ;;  %v7079_v40 = vpack.c.bf16 %v1401_v32, %v1401_v32  ;;  %v1687_v13 = vld [vmem:[#allocation2 + $0xa0] sm:$0x1] }
 0x115   : > { %1619 = vst [vmem:[#allocation2 + $0x60] sm:$0xf] %v1618_v27  ;;  %1587 = vst [vmem:[#allocation2 + $0x50] sm:$0xf] %v1578_v28  ;;  %v1610_v34 = vor.u32 %v1608_v7, %v1607_v20  ;;  %v1612_v35 = vrot.slane %v1607_v20, 4  ;;  %v1632_v36 = vrot.slane %v1630_v22, 7  ;;  %v1403_v41 = vadd.f32 %v1402_v11, %v8903_v50 }
 0x116   : > { %1590 = vst [vmem:[#allocation2 + $0x58] sm:$0x1] %v1589_v33  ;;  %v1663_v38 = vshrl.u32 %v7080_v16, 16  ;;  %v1666_v39 = vshll.u32 %v7080_v16, 16  ;;  %v1406_v43 = vpop.f32.mrb[16].mxu0  ;;  %v1638_v52 = vshrl.u32 %v7079_v40, 16 }
 0x117   : > { %v1611_v44 = vsel %vm8689_vm0, %v1603_v14, %v1610_v34  ;;  %v1622_v45 = vsel %vm8632_vm4, %v1612_v35, %v1621_v29  ;;  %v1635_v46 = vor.u32 %v1633_v26, %v1632_v36  ;;  %v1636_v47 = vrot.slane %v1632_v36, 4  ;;  %v1408_v48 = vpop.f32.mrb[17].mxu0 }
 0x118   : > { %1620 = vst [vmem:[#allocation2 + $0x68] sm:$0xf] %v1611_v44  ;;  %1623 = vst [vmem:[#allocation2 + $0x70] sm:$0x1] %v1622_v45  ;;  %v1665_v49 = vrot.slane %v1663_v38, 7  ;;  %v1641_v53 = vshll.u32 %v7079_v40, 16  ;;  %v7081_v55 = vpack.c.bf16 %v1403_v41, %v1403_v41  ;;  %v1407_v59 = vadd.f32 %v1406_v43, %v8905_v51 }
 0x119   : > { %v1410_v56 = vpop.f32.mrb[18].mxu0  ;;  %v1651_v57 = vsel %vm8679_vm14, %v1635_v46, %v1650_v24  ;;  %v1409_v60 = vadd.f32 %v1408_v48, %v8903_v50  ;;  %v1640_v1 = vrot.slane %v1638_v52, 7  ;;  %v1716_v24 = vld [vmem:[#allocation2 + $0xa8] sm:$0xf]  ;;  %v1749_v38 = vld [vmem:[#allocation2 + $0xc0] sm:$0xf] }
 0x11a   : > { %v1411_v61 = vadd.f32 %v1410_v56, %v8905_v51  ;;  %v1412_v62 = vpop.f32.mrb[19].mxu0  ;;  %1652 = vst [vmem:[#allocation2 + $0x78] sm:$0xf] %v1651_v57  ;;  %v1668_v63 = vor.u32 %v1666_v39, %v1665_v49  ;;  %v1669_v21 = vrot.slane %v1665_v49, 4  ;;  %v1671_v2 = vshrl.u32 %v7081_v55, 16 }
 0x11b   : > { %v1674_v3 = vshll.u32 %v7081_v55, 16  ;;  %v7082_v4 = vpack.c.bf16 %v1407_v59, %v1407_v59  ;;  %v7084_v6 = vpack.c.bf16 %v1409_v60, %v1409_v60  ;;  %v1643_v10 = vor.u32 %v1641_v53, %v1640_v1  ;;  %v1720_v57 = vld [vmem:[#allocation2 + $0xb8] sm:$0x1] }
 0x11c   : > { %v7083_v7 = vpack.c.bf16 %v1411_v61, %v1411_v61  ;;  %v1684_v9 = vsel %vm8679_vm14, %v1668_v63, %v1683_v58  ;;  %v1645_v11 = vrot.slane %v1640_v1, 4  ;;  %v1673_v12 = vrot.slane %v1671_v2, 7 }
 0x11d   : > { %1685 = vst [vmem:[#allocation2 + $0x90] sm:$0xf] %v1684_v9  ;;  %v1696_v14 = vshrl.u32 %v7082_v4, 16  ;;  %v1699_v15 = vshll.u32 %v7082_v4, 16  ;;  %v1729_v17 = vshrl.u32 %v7084_v6, 16  ;;  %v1732_v18 = vshll.u32 %v7084_v6, 16 }
 0x11e   : > { %v1644_v20 = vsel %vm8689_vm0, %v1636_v47, %v1643_v10  ;;  %v1655_v22 = vsel %vm8632_vm4, %v1645_v11, %v1654_v30  ;;  %v1676_v26 = vor.u32 %v1674_v3, %v1673_v12  ;;  %v1678_v27 = vrot.slane %v1673_v12, 4  ;;  %v1416_v28 = vpop.f32.mrb[20].mxu0 }
 0x11f   : > { %1653 = vst [vmem:[#allocation2 + $0x80] sm:$0xf] %v1644_v20  ;;  %1656 = vst [vmem:[#allocation2 + $0x88] sm:$0x1] %v1655_v22  ;;  %v1698_v29 = vrot.slane %v1696_v14, 7  ;;  %v8996_v16 = vrot.slane %v1729_v17, 7  ;;  %v1413_v39 = vadd.f32 %v1412_v62, %v8903_v50  ;;  %v1417_v40 = vadd.f32 %v1416_v28, %v8905_v51 }
 0x120   : > { %v1704_v32 = vshrl.u32 %v7083_v7, 16  ;;  %v1707_v33 = vshll.u32 %v7083_v7, 16  ;;  %v1418_v34 = vpop.f32.mrb[21].mxu0  ;;  %v1677_v35 = vsel %vm8689_vm0, %v1669_v21, %v1676_v26  ;;  %v1688_v36 = vsel %vm8632_vm4, %v1678_v27, %v1687_v13  ;;  %v1753_v7 = vld [vmem:[#allocation2 + $0xd0] sm:$0x1] }
 0x121   : > { %v1420_v41 = vpop.f32.mrb[22].mxu0  ;;  %1686 = vst [vmem:[#allocation2 + $0x98] sm:$0xf] %v1677_v35  ;;  %1689 = vst [vmem:[#allocation2 + $0xa0] sm:$0x1] %v1688_v36  ;;  %v1701_v43 = vor.u32 %v1699_v15, %v1698_v29  ;;  %v1702_v44 = vrot.slane %v1698_v29, 4  ;;  %v1734_v45 = vor.u32 %v1732_v18, %v8996_v16  ;;  %v7085_v49 = vpack.c.bf16 %v1413_v39, %v1413_v39 }
 0x122   : > { %v1735_v46 = vrot.slane %v8996_v16, 4  ;;  %v1422_v47 = vpop.f32.mrb[23].mxu0  ;;  %v1706_v48 = vrot.slane %v1704_v32, 7  ;;  %v7086_v52 = vpack.c.bf16 %v1417_v40, %v1417_v40  ;;  %v1419_v53 = vadd.f32 %v1418_v34, %v8903_v50  ;;  %v1782_v20 = vld [vmem:[#allocation2 + $0xd8] sm:$0xf] }
 0x123   : > { %v1717_v55 = vsel %vm8679_vm14, %v1701_v43, %v1716_v24  ;;  %v1750_v56 = vsel %vm8679_vm14, %v1734_v45, %v1749_v38  ;;  %v1421_v58 = vadd.f32 %v1420_v41, %v8905_v51  ;;  %v1423_v59 = vadd.f32 %v1422_v47, %v8903_v50  ;;  %v1815_v24 = vld [vmem:[#allocation2 + $0xf0] sm:$0xf]  ;;  %v1786_v45 = vld [vmem:[#allocation2 + $0xe8] sm:$0x1]  ;;  %v1819_v47 = vld [vmem:[#allocation2 + $0x100] sm:$0x1] }
 0x124   : > { %1718 = vst [vmem:[#allocation2 + $0xa8] sm:$0xf] %v1717_v55  ;;  %1751 = vst [vmem:[#allocation2 + $0xc0] sm:$0xf] %v1750_v56  ;;  %v1709_v60 = vor.u32 %v1707_v33, %v1706_v48  ;;  %v1711_v61 = vrot.slane %v1706_v48, 4  ;;  %v1737_v62 = vshrl.u32 %v7085_v49, 16  ;;  %v7088_v2 = vpack.c.bf16 %v1419_v53, %v1419_v53 }
 0x125   : > { %v1740_v63 = vshll.u32 %v7085_v49, 16  ;;  %v1762_v21 = vshrl.u32 %v7086_v52, 16  ;;  %v1765_v1 = vshll.u32 %v7086_v52, 16  ;;  %v7087_v30 = vpack.c.bf16 %v1421_v58, %v1421_v58  ;;  %v1426_v10 = vpop.f32.mrb[24].mxu0  ;;  %v2058_v33 = vld [vmem:[#allocation2 + $0x178] sm:$0x1] }
 0x126   : > { %v1710_v3 = vsel %vm8689_vm0, %v1702_v44, %v1709_v60  ;;  %v1721_v4 = vsel %vm8632_vm4, %v1711_v61, %v1720_v57  ;;  %v1739_v6 = vrot.slane %v1737_v62, 7  ;;  %v7089_v9 = vpack.c.bf16 %v1423_v59, %v1423_v59  ;;  %v1428_v15 = vpop.f32.mrb[25].mxu0 }
 0x127   : > { %1719 = vst [vmem:[#allocation2 + $0xb0] sm:$0xf] %v1710_v3  ;;  %1722 = vst [vmem:[#allocation2 + $0xb8] sm:$0x1] %v1721_v4  ;;  %v1764_v11 = vrot.slane %v1762_v21, 7  ;;  %v1795_v12 = vshrl.u32 %v7088_v2, 16  ;;  %v2059_v52 = vsel %vm8632_vm4, %v2049_v0, %v2058_v33  ;;  %v7101_v56 = vpack.c.bf16 %v8915_v8, %v8915_v8 }
 0x128   : > { %v1798_v13 = vshll.u32 %v7088_v2, 16  ;;  %v1770_v14 = vshrl.u32 %v7087_v30, 16  ;;  %v1742_v17 = vor.u32 %v1740_v63, %v1739_v6  ;;  %v1744_v18 = vrot.slane %v1739_v6, 4  ;;  %v1430_v27 = vpop.f32.mrb[26].mxu0  ;;  %2060 = vst [vmem:[#allocation2 + $0x178] sm:$0x1] %v2059_v52 }
 0x129   : > { %v1773_v22 = vshll.u32 %v7087_v30, 16  ;;  %v1803_v26 = vshrl.u32 %v7089_v9, 16  ;;  %v1767_v28 = vor.u32 %v1765_v1, %v1764_v11  ;;  %v1768_v29 = vrot.slane %v1764_v11, 4  ;;  %v1432_v34 = vpop.f32.mrb[27].mxu0 }
 0x12a   : > { %v1797_v16 = vrot.slane %v1795_v12, 7  ;;  %v1772_v32 = vrot.slane %v1770_v14, 7  ;;  %v1743_v35 = vsel %vm8689_vm0, %v1735_v46, %v1742_v17  ;;  %v1754_v36 = vsel %vm8632_vm4, %v1744_v18, %v1753_v7  ;;  %v2090_v12 = vld [vmem:[#allocation2 + $0x190] sm:$0x1] }
 0x12b   : > { %v1805_v38 = vrot.slane %v1803_v26, 7  ;;  %v1806_v39 = vshll.u32 %v7089_v9, 16  ;;  %1752 = vst [vmem:[#allocation2 + $0xc8] sm:$0xf] %v1743_v35  ;;  %1755 = vst [vmem:[#allocation2 + $0xd0] sm:$0x1] %v1754_v36  ;;  %v1783_v40 = vsel %vm8679_vm14, %v1767_v28, %v1782_v20  ;;  %v1427_v57 = vadd.f32 %v1426_v10, %v8905_v51 }
 0x12c   : > { %v1800_v41 = vor.u32 %v1798_v13, %v1797_v16  ;;  %v1801_v43 = vrot.slane %v1797_v16, 4  ;;  %v1775_v44 = vor.u32 %v1773_v22, %v1772_v32  ;;  %1784 = vst [vmem:[#allocation2 + $0xd8] sm:$0xf] %v1783_v40  ;;  %v1777_v48 = vrot.slane %v1772_v32, 4  ;;  %v1881_v35 = vld [vmem:[#allocation2 + $0x120] sm:$0xf] }
 0x12d   : > { %v1808_v49 = vor.u32 %v1806_v39, %v1805_v38  ;;  %v1810_v46 = vrot.slane %v1805_v38, 4  ;;  %v1429_v59 = vadd.f32 %v1428_v15, %v8903_v50  ;;  %v9041_v60 = vpop.f32.mrb[28].mxu0  ;;  %v2075_v8 = vshrl.u32 %v7101_v56, 16 }
 0x12e   : > { %v1816_v53 = vsel %vm8679_vm14, %v1800_v41, %v1815_v24  ;;  %v1776_v55 = vsel %vm8689_vm0, %v1768_v29, %v1775_v44  ;;  %v1787_v31 = vsel %vm8632_vm4, %v1777_v48, %v1786_v45  ;;  %v2078_v61 = vshll.u32 %v7101_v56, 16  ;;  %v9044_v21 = vpop.f32.mrb[29].mxu0  ;;  %v1852_v41 = vld [vmem:[#allocation2 + $0x118] sm:$0x1] }
 0x12f   : > { %1817 = vst [vmem:[#allocation2 + $0xf0] sm:$0xf] %v1816_v53  ;;  %1785 = vst [vmem:[#allocation2 + $0xe0] sm:$0xf] %v1776_v55  ;;  %v1809_v0 = vsel %vm8689_vm0, %v1801_v43, %v1808_v49  ;;  %v1820_v58 = vsel %vm8632_vm4, %v1810_v46, %v1819_v47  ;;  %v7090_v62 = vpack.c.bf16 %v1427_v57, %v1427_v57  ;;  %v9051_v4 = vpop.f32.mrb[30].mxu0  ;;  %v2077_v6 = vrot.slane %v2075_v8, 7 }
 0x130   : > { %1788 = vst [vmem:[#allocation2 + $0xe8] sm:$0x1] %v1787_v31  ;;  %1818 = vst [vmem:[#allocation2 + $0xf8] sm:$0xf] %v1809_v0  ;;  %v1431_v63 = vadd.f32 %v1430_v27, %v8905_v51  ;;  %v7092_v1 = vpack.c.bf16 %v1429_v59, %v1429_v59  ;;  %v1433_v2 = vadd.f32 %v1432_v34, %v8903_v50  ;;  %v1442_v11 = vpop.f32.mrb[31].mxu0 }
 0x131   : > { %1821 = vst [vmem:[#allocation2 + $0x100] sm:$0x1] %v1820_v58  ;;  %v2019_v30 = vadd.f32 %v8923_v25, %v8905_v51  ;;  %v2022_v3 = vadd.f32 %v8931_v37, %v8905_v51  ;;  %v1828_v7 = vshrl.u32 %v7090_v62, 16  ;;  %v1831_v9 = vshll.u32 %v7090_v62, 16  ;;  %v1848_v25 = vld [vmem:[#allocation2 + $0x108] sm:$0xf] }
 0x132   : > { %v7091_v10 = vpack.c.bf16 %v1431_v63, %v1431_v63  ;;  %v1861_v13 = vshrl.u32 %v7092_v1, 16  ;;  %v1864_v14 = vshll.u32 %v7092_v1, 16  ;;  %v7093_v15 = vpack.c.bf16 %v1433_v2, %v1433_v2  ;;  %v1885_v49 = vld [vmem:[#allocation2 + $0x130] sm:$0x1]  ;;  %v2119_v0 = vld [vmem:[#allocation2 + $0x198] sm:$0xf] }
 0x133   : > { %v7102_v17 = vpack.c.bf16 %v2019_v30, %v2019_v30  ;;  %v2080_v18 = vor.u32 %v2078_v61, %v2077_v6  ;;  %v2082_v20 = vrot.slane %v2077_v6, 4  ;;  %v1830_v22 = vrot.slane %v1828_v7, 7  ;;  %v2123_v63 = vld [vmem:[#allocation2 + $0x1a8] sm:$0x1] }
 0x134   : > { %v1836_v26 = vshrl.u32 %v7091_v10, 16  ;;  %v1863_v27 = vrot.slane %v1861_v13, 7  ;;  %v1839_v28 = vshll.u32 %v7091_v10, 16  ;;  %v1869_v37 = vshrl.u32 %v7093_v15, 16 }
 0x135   : > { %v1872_v29 = vshll.u32 %v7093_v15, 16  ;;  %v2081_v16 = vsel %vm8689_vm0, %v2073_v5, %v2080_v18  ;;  %v2091_v32 = vsel %vm8632_vm4, %v2082_v20, %v2090_v12  ;;  %v1833_v33 = vor.u32 %v1831_v9, %v1830_v22  ;;  %v1914_v15 = vld [vmem:[#allocation2 + $0x138] sm:$0xf] }
 0x136   : > { %v1834_v34 = vrot.slane %v1830_v22, 4  ;;  %2089 = vst [vmem:[#allocation2 + $0x188] sm:$0xf] %v2081_v16  ;;  %2092 = vst [vmem:[#allocation2 + $0x190] sm:$0x1] %v2091_v32  ;;  %v1866_v36 = vor.u32 %v1864_v14, %v1863_v27  ;;  %v1867_v24 = vrot.slane %v1863_v27, 4  ;;  %v7103_v44 = vpack.c.bf16 %v2022_v3, %v2022_v3 }
 0x137   : > { %v1838_v38 = vrot.slane %v1836_v26, 7  ;;  %v1871_v39 = vrot.slane %v1869_v37, 7  ;;  %v1849_v40 = vsel %vm8679_vm14, %v1833_v33, %v1848_v25  ;;  %v2099_v23 = vshrl.u32 %v7102_v17, 16  ;;  %v1947_v27 = vld [vmem:[#allocation2 + $0x150] sm:$0xf] }
 0x138   : > { %v2102_v43 = vshll.u32 %v7102_v17, 16  ;;  %1850 = vst [vmem:[#allocation2 + $0x108] sm:$0xf] %v1849_v40  ;;  %v1882_v5 = vsel %vm8679_vm14, %v1866_v36, %v1881_v35  ;;  %v2107_v53 = vshrl.u32 %v7103_v44, 16  ;;  %v2110_v55 = vshll.u32 %v7103_v44, 16 }
 0x139   : > { %v1841_v45 = vor.u32 %v1839_v28, %v1838_v38  ;;  %v1843_v47 = vrot.slane %v1838_v38, 4  ;;  %v1874_v48 = vor.u32 %v1872_v29, %v1871_v39  ;;  %1883 = vst [vmem:[#allocation2 + $0x120] sm:$0xf] %v1882_v5  ;;  %v1876_v46 = vrot.slane %v1871_v39, 4  ;;  %v1951_v35 = vld [vmem:[#allocation2 + $0x160] sm:$0x1] }
 0x13a   : > { %v2101_v52 = vrot.slane %v2099_v23, 7  ;;  %v1437_v58 = vadd.f32 %v9041_v60, %v8905_v51  ;;  %v2109_v62 = vrot.slane %v2107_v53, 7  ;;  %v1439_v2 = vadd.f32 %v9044_v21, %v8903_v50 }
 0x13b   : > { %v1842_v56 = vsel %vm8689_vm0, %v1834_v34, %v1841_v45  ;;  %v1853_v57 = vsel %vm8632_vm4, %v1843_v47, %v1852_v41  ;;  %v1875_v31 = vsel %vm8689_vm0, %v1867_v24, %v1874_v48  ;;  %v1886_v59 = vsel %vm8632_vm4, %v1876_v46, %v1885_v49  ;;  %v1918_v34 = vld [vmem:[#allocation2 + $0x148] sm:$0x1] }
 0x13c   : > { %1851 = vst [vmem:[#allocation2 + $0x110] sm:$0xf] %v1842_v56  ;;  %1854 = vst [vmem:[#allocation2 + $0x118] sm:$0x1] %v1853_v57  ;;  %v2104_v8 = vor.u32 %v2102_v43, %v2101_v52  ;;  %v2105_v61 = vrot.slane %v2101_v52, 4  ;;  %v7094_v1 = vpack.c.bf16 %v1437_v58, %v1437_v58  ;;  %v1441_v30 = vadd.f32 %v9051_v4, %v8905_v51 }
 0x13d   : > { %1884 = vst [vmem:[#allocation2 + $0x128] sm:$0xf] %v1875_v31  ;;  %1887 = vst [vmem:[#allocation2 + $0x130] sm:$0x1] %v1886_v59  ;;  %v1443_v60 = vadd.f32 %v1442_v11, %v8903_v50  ;;  %v2112_v6 = vor.u32 %v2110_v55, %v2109_v62  ;;  %v2114_v7 = vrot.slane %v2109_v62, 4  ;;  %v7096_v10 = vpack.c.bf16 %v1439_v2, %v1439_v2 }
 0x13e   : > { %v2120_v3 = vsel %vm8679_vm14, %v2104_v8, %v2119_v0  ;;  %v1894_v9 = vshrl.u32 %v7094_v1, 16  ;;  %v7095_v12 = vpack.c.bf16 %v1441_v30, %v1441_v30  ;;  %v1897_v50 = vshll.u32 %v7094_v1, 16 }
 0x13f   : > { %2121 = vst [vmem:[#allocation2 + $0x198] sm:$0xf] %v2120_v3  ;;  %v2113_v13 = vsel %vm8689_vm0, %v2105_v61, %v2112_v6  ;;  %v2124_v21 = vsel %vm8632_vm4, %v2114_v7, %v2123_v63  ;;  %v7097_v14 = vpack.c.bf16 %v1443_v60, %v1443_v60  ;;  %v1927_v4 = vshrl.u32 %v7096_v10, 16 }
 0x140   : > { %2122 = vst [vmem:[#allocation2 + $0x1a0] sm:$0xf] %v2113_v13  ;;  %2125 = vst [vmem:[#allocation2 + $0x1a8] sm:$0x1] %v2124_v21  ;;  %v1896_v51 = vrot.slane %v1894_v9, 7  ;;  %v1902_v11 = vshrl.u32 %v7095_v12, 16 }
 0x141   : > { %v1930_v17 = vshll.u32 %v7096_v10, 16  ;;  %v1935_v18 = vshrl.u32 %v7097_v14, 16  ;;  %v1929_v22 = vrot.slane %v1927_v4, 7  ;;  %v1905_v25 = vshll.u32 %v7095_v12, 16 }
 0x142   : > { %v1899_v20 = vor.u32 %v1897_v50, %v1896_v51  ;;  %v1904_v26 = vrot.slane %v1902_v11, 7  ;;  %v1938_v37 = vshll.u32 %v7097_v14, 16  ;;  %v1900_v29 = vrot.slane %v1896_v51, 4  ;;  %2129 = sbr.rel (%p6523_p11) target bundleno = 329 (0x149), region = 56 }
 0x143   : > { %v1937_v28 = vrot.slane %v1935_v18, 7  ;;  %v1932_v32 = vor.u32 %v1930_v17, %v1929_v22  ;;  %v1933_v36 = vrot.slane %v1929_v22, 4 }
 0x144   : > { %v1915_v16 = vsel %vm8679_vm14, %v1899_v20, %v1914_v15  ;;  %v1907_v33 = vor.u32 %v1905_v25, %v1904_v26  ;;  %v1909_v24 = vrot.slane %v1904_v26, 4 }
 0x145   : > { %1916 = vst [vmem:[#allocation2 + $0x138] sm:$0xf] %v1915_v16  ;;  %v1940_v38 = vor.u32 %v1938_v37, %v1937_v28  ;;  %v1942_v39 = vrot.slane %v1937_v28, 4  ;;  %v1948_v40 = vsel %vm8679_vm14, %v1932_v32, %v1947_v27 }
 0x146   : > { %v1908_v41 = vsel %vm8689_vm0, %v1900_v29, %v1907_v33  ;;  %1949 = vst [vmem:[#allocation2 + $0x150] sm:$0xf] %v1948_v40  ;;  %v1919_v23 = vsel %vm8632_vm4, %v1909_v24, %v1918_v34 }
 0x147   : > { %1917 = vst [vmem:[#allocation2 + $0x140] sm:$0xf] %v1908_v41  ;;  %v1941_v43 = vsel %vm8689_vm0, %v1933_v36, %v1940_v38  ;;  %v1952_v44 = vsel %vm8632_vm4, %v1942_v39, %v1951_v35  ;;  %1920 = vst [vmem:[#allocation2 + $0x148] sm:$0x1] %v1919_v23 }
 0x148   : > { %1950 = vst [vmem:[#allocation2 + $0x158] sm:$0xf] %v1941_v43  ;;  %1953 = vst [vmem:[#allocation2 + $0x160] sm:$0x1] %v1952_v44 }
 0x149 PF: > { %p6524_p12 = scmp.ne.s32.totalorder %s8458_s27, 1 }
 0x14a   : > { %v8478_v5 = vmov (!%p6524_p12), 0  }
 0x14b   : > { %2136 = sbr.rel (%p6524_p12) target bundleno = 338 (0x152), region = 60  ;;  %2137 = vst [vmem:[#allocation2 + $0x198] sm:$0xff] (!%p6524_p12), %v8478_v5  ;;  %2138 = vst [vmem:[#allocation2 + $0x1a0] sm:$0xff] (!%p6524_p12), %v8478_v5 }
 0x14c   : > { %2139 = vst [vmem:[#allocation2 + $0x1a8] sm:$0x11] (!%p6524_p12), %v8478_v5 }
 0x152 PF: > { %v8199_v19 = vld [vmem:[%s11070_s6 + $0x1c0] sm:$0xff]   ;;  %v8201_v45 = vld [vmem:[%s11070_s6 + $0x1c8] sm:$0xff]   ;;  %v8203_v48 = vld [vmem:[%s11070_s6 + $0x1d0] sm:$0xff]   ;;  %vm3311_vm1 = vsmask.f32 3328  ;;  %vm4928_vm4 = vcmask 1042432  }
 0x153   : > { %v8200_v54 = vld [vmem:[%s11070_s6 + $0x180] sm:$0xff]   ;;  %7108 = vmatprep.subr.bf16.mxu0 %v8199_v19  ;;  %8116 = vmatprep.subr.bf16.mxu1 %v8199_v19  ;;  %v8202_v47 = vld [vmem:[%s11070_s6 + $0x188] sm:$0xff]   ;;  %v8204_v49 = vld [vmem:[%s11070_s6 + $0x190] sm:$0xff]   ;;  %vm3312_vm2 = vsmask.f32 7440  ;;  %vm4929_vm5 = vcmask 1046532  }
 0x154   : > { %7109 = vmatpush3.bf16.msra.mxu0 %v8200_v54  ;;  %8124 = vmatpush3.bf16.msra.mxu1 %v8200_v54  ;;  %v8205_v46 = vld [vmem:[%s11070_s6 + $0x1d8] sm:$0xff]   ;;  %v8207_v53 = vld [vmem:[%s11070_s6 + $0x1e0] sm:$0xff]   ;;  %v8209_v56 = vld [vmem:[%s11070_s6 + $0x1e8] sm:$0xff]  }
 0x155   : > { %7110 = vmatprep.subr.bf16.mxu0 %v8201_v45  ;;  %8117 = vmatprep.subr.bf16.mxu1 %v8201_v45  ;;  %v8206_v52 = vld [vmem:[%s11070_s6 + $0x198] sm:$0xff]   ;;  %v8208_v55 = vld [vmem:[%s11070_s6 + $0x1a0] sm:$0xff]   ;;  %v9133_v58 = vld [vmem:[#allocation2 + $0xac] ss:$8 sps:$4 sm:$0xff]  }
 0x156   : > { %v2142_v57 = vld [vmem:[#allocation2 + $0x18] sm:$0xff]  ;;  %v2143_v31 = vld [vmem:[#allocation2 + $0x20] sm:$0xff]  ;;  %v8210_v59 = vld [vmem:[%s11070_s6 + $0x1a8] sm:$0xff]   ;;  %2577 = vmatprep.mubr.bf16.mxu1 %v9133_v58 }
 0x157   : > { %v9131_v0 = vcombine.high %v2142_v57, %v2143_v31  ;;  %v8211_v8 = vld [vmem:[%s11070_s6 + $0x1f0] sm:$0xff]   ;;  %v8213_v62 = vld [vmem:[%s11070_s6 + $0x1f8] sm:$0xff]   ;;  %v8220_v1 = vld [vmem:[%s11070_s6 + $0x340] sm:$0xff]   ;;  %v9158_v3 = vcombine.low %v2142_v57, %v2143_v31 }
 0x158   : > { %7111 = vmatpush3.bf16.msra.mxu0 %v8202_v47  ;;  %8125 = vmatpush3.bf16.msra.mxu1 %v8202_v47  ;;  %v8212_v61 = vld [vmem:[%s11070_s6 + $0x1b0] sm:$0xff]   ;;  %v8214_v63 = vld [vmem:[%s11070_s6 + $0x1b8] sm:$0xff]   ;;  %v8234_v60 = vld [vmem:[%s11070_s6 + $0x40] sm:$0xff]  }
 0x159   : > { %7112 = vmatprep.subr.bf16.mxu0 %v8203_v48  ;;  %8118 = vmatprep.subr.bf16.mxu1 %v8203_v48  ;;  %v2144_v2 = vld [vmem:[#allocation2 + $0x30] sm:$0xff]  ;;  %v2145_v30 = vld [vmem:[#allocation2 + $0x38] sm:$0xff]  ;;  %v8221_v7 = vld [vmem:[%s11070_s6 + $0x300] sm:$0xff]  }
 0x15a   : > { %2529 = vmatprep.mubr.bf16.mxu0 %v9131_v0  ;;  %v9160_v6 = vld [vmem:[#allocation2 + $0xa8] ss:$8 sps:$4 sm:$0xff]   ;;  %v9165_v9 = vcombine.high %v2144_v2, %v2145_v30  ;;  %v9167_v10 = vld [vmem:[#allocation2 + $0xc4] ss:$8 sps:$4 sm:$0xff]   ;;  %v9191_v15 = vcombine.low %v2144_v2, %v2145_v30  ;;  %v8249_v27 = vld [vmem:[%s11070_s6 + $0x358] sm:$0xff]  }
 0x15b   : > { %v8227_v12 = vld [vmem:[%s11070_s6 + $0x348] sm:$0xff]   ;;  %v8235_v21 = vld [vmem:[%s11070_s6] sm:$0xff]   ;;  %v2147_v50 = vld [vmem:[#allocation2 + $0x50] sm:$0xff] }
 0x15c   : > { %7113 = vmatpush3.bf16.msra.mxu0 %v8204_v49  ;;  %8126 = vmatpush3.bf16.msra.mxu1 %v8204_v49  ;;  %v8228_v13 = vld [vmem:[%s11070_s6 + $0x308] sm:$0xff]   ;;  %v8237_v4 = vld [vmem:[%s11070_s6 + $0x350] sm:$0xff]   ;;  %v9197_v20 = vld [vmem:[#allocation2 + $0xdc] ss:$8 sps:$4 sm:$0xff]  }
 0x15d   : > { %7114 = vmatprep.subr.bf16.mxu0 %v8205_v46  ;;  %8119 = vmatprep.subr.bf16.mxu1 %v8205_v46  ;;  %v2146_v14 = vld [vmem:[#allocation2 + $0x48] sm:$0xff]  ;;  %v8239_v22 = vld [vmem:[%s11070_s6 + $0x310] sm:$0xff]   ;;  %v2148_v28 = vld [vmem:[#allocation2 + $0x60] sm:$0xff] }
 0x15e   : > { %v8236_v51 = vld [vmem:[%s11070_s6 + $0x48] sm:$0xff]   ;;  %v9195_v18 = vcombine.high %v2146_v14, %v2147_v50  ;;  %v8245_v26 = vld [vmem:[%s11070_s6 + $0x50] sm:$0xff]   ;;  %v8247_v37 = vld [vmem:[%s11070_s6 + $0x58] sm:$0xff]   ;;  %v9224_v33 = vcombine.low %v2146_v14, %v2147_v50 }
 0x15f   : > { %v8238_v11 = vld [vmem:[%s11070_s6 + $0x8] sm:$0xff]   ;;  %v8246_v25 = vld [vmem:[%s11070_s6 + $0x10] sm:$0xff]   ;;  %v8253_v16 = vld [vmem:[%s11070_s6 + $0x318] sm:$0xff]  }
 0x160   : > { %7115 = vmatpush3.bf16.msra.mxu0 %v8206_v52  ;;  %8127 = vmatpush3.bf16.msra.mxu1 %v8206_v52  ;;  %v9193_v17 = vld [vmem:[#allocation2 + $0xc0] ss:$8 sps:$4 sm:$0xff]   ;;  %v8248_v32 = vld [vmem:[%s11070_s6 + $0x18] sm:$0xff]   ;;  %v9260_v54 = vld [vmem:[#allocation2 + $0x10c] ss:$8 sps:$4 sm:$0xff]  }
 0x161   : > { %7116 = vmatprep.subr.bf16.mxu0 %v8207_v53  ;;  %8120 = vmatprep.subr.bf16.mxu1 %v8207_v53  ;;  %v2149_v29 = vld [vmem:[#allocation2 + $0x68] sm:$0xff]  ;;  %v9226_v34 = vld [vmem:[#allocation2 + $0xd8] ss:$8 sps:$4 sm:$0xff]   ;;  %v9230_v36 = vld [vmem:[#allocation2 + $0xf4] ss:$8 sps:$4 sm:$0xff]  }
 0x162   : > { %v9228_v35 = vcombine.high %v2148_v28, %v2149_v29  ;;  %v8256_v24 = vld [vmem:[%s11070_s6 + $0x60] sm:$0xff]   ;;  %v2150_v40 = vld [vmem:[#allocation2 + $0x78] sm:$0xff]  ;;  %v8258_v41 = vld [vmem:[%s11070_s6 + $0x68] sm:$0xff]   ;;  %v9254_v42 = vcombine.low %v2148_v28, %v2149_v29 }
 0x163   : > { %v8257_v38 = vld [vmem:[%s11070_s6 + $0x20] sm:$0xff]   ;;  %v8259_v44 = vld [vmem:[%s11070_s6 + $0x28] sm:$0xff]   ;;  %v9256_v5 = vld [vmem:[#allocation2 + $0xf0] ss:$8 sps:$4 sm:$0xff]  }
 0x164   : > { %7117 = vmatpush3.bf16.msra.mxu0 %v8208_v55  ;;  %8128 = vmatpush3.bf16.msra.mxu1 %v8208_v55  ;;  %v8266_v39 = vld [vmem:[%s11070_s6 + $0x360] sm:$0xff]   ;;  %v8265_v45 = vld [vmem:[%s11070_s6 + $0x70] sm:$0xff]   ;;  %v8276_v48 = vld [vmem:[%s11070_s6 + $0x368] sm:$0xff]  }
 0x165   : > { %7118 = vmatprep.subr.bf16.mxu0 %v8209_v56  ;;  %8121 = vmatprep.subr.bf16.mxu1 %v8209_v56  ;;  %v8268_v23 = vld [vmem:[%s11070_s6 + $0x320] sm:$0xff]   ;;  %v8267_v47 = vld [vmem:[%s11070_s6 + $0x30] sm:$0xff]   ;;  %v8277_v49 = vld [vmem:[%s11070_s6 + $0x328] sm:$0xff]  }
 0x166   : > { %v2151_v43 = vld [vmem:[#allocation2 + $0x80] sm:$0xff]  ;;  %v9276_v46 = vld [vmem:[#allocation2 + $0x90] sm:$0xff]  ;;  %v2153_v52 = vld [vmem:[#allocation2 + $0x98] sm:$0xff] }
 0x167   : > { %v9258_v19 = vcombine.high %v2150_v40, %v2151_v43  ;;  %v8269_v53 = vld [vmem:[%s11070_s6 + $0x78] sm:$0xff]   ;;  %v8281_v56 = vld [vmem:[%s11070_s6 + $0x370] sm:$0xff]   ;;  %v9292_v31 = vcombine.low %v2150_v40, %v2151_v43  ;;  %v8291_v2 = vld [vmem:[%s11070_s6 + $0xc0] sm:$0xff]  }
 0x168   : > { %7119 = vmatpush3.bf16.msra.mxu0 %v8210_v59  ;;  %8129 = vmatpush3.bf16.msra.mxu1 %v8210_v59  ;;  %v8270_v55 = vld [vmem:[%s11070_s6 + $0x38] sm:$0xff]   ;;  %v8282_v57 = vld [vmem:[%s11070_s6 + $0x330] sm:$0xff]   ;;  %v9316_v30 = vld [vmem:[#allocation2 + $0x8] sm:$0xff] }
 0x169   : > { %7120 = vmatprep.subr.bf16.mxu0 %v8211_v8  ;;  %8122 = vmatprep.subr.bf16.mxu1 %v8211_v8  ;;  %v9294_v59 = vld [vmem:[#allocation2 + $0x108] ss:$8 sps:$4 sm:$0xff]   ;;  %v9297_v8 = vcombine.high %v9276_v46, %v2153_v52  ;;  %v9337_v50 = vld [vmem:[#allocation2 + $0x154] ss:$8 sps:$4 sm:$0xff]   ;;  %v8307_v29 = vld [vmem:[%s11070_s6 + $0xe0] sm:$0xff]  }
 0x16a   : > { %v8300_v28 = vld [vmem:[%s11070_s6 + $0x90] sm:$0xff]   ;;  %v9394_v40 = vld [vmem:[#allocation2 + $0x180] ss:$8 sps:$4 sm:$0xff]   ;;  %v8318_v43 = vld [vmem:[%s11070_s6 + $0xb8] sm:$0xff]  }
 0x16b   : > { %vm9504_vm3 = vmor %vm3311_vm1, %vm3312_vm2 }
 0x16c   : > { %7121 = vmatpush3.bf16.msra.mxu0 %v8212_v61  ;;  %8130 = vmatpush3.bf16.msra.mxu1 %v8212_v61  ;;  %v9299_v61 = vld [vmem:[#allocation2 + $0x124] ss:$8 sps:$4 sm:$0xff]   ;;  %vm10002_vm6 = vmor %vm4928_vm4, %vm4929_vm5 }
 0x16d   : > { %7122 = vmatprep.subr.bf16.mxu0 %v8213_v62  ;;  %8123 = vmatprep.subr.bf16.mxu1 %v8213_v62  ;;  %v8286_v62 = vld [vmem:[%s11070_s6 + $0x378] sm:$0xff]  }
 0x170   : > { %7123 = vmatpush3.bf16.msra.mxu0 %v8214_v63  ;;  %8131 = vmatpush3.bf16.msra.mxu1 %v8214_v63  ;;  %v8289_v63 = vld [vmem:[%s11070_s6 + $0x338] sm:$0xff]  }
 0x171   : > { %7332 = vmatprep.subr.bf16.mxu1 %v8220_v1  ;;  %7220 = vmatprep.subr.bf16.mxu0 %v8234_v60  ;;  %v9309_v1 = vld [vmem:[#allocation2] sm:$0xff] }
 0x172   : > { %v8293_v60 = vld [vmem:[%s11070_s6 + $0x240] sm:$0xff]   ;;  %v6605_v14 = vcombine.low %v9309_v1, %v9316_v30 }
 0x173   : > { %2530 = vmatmul.mubr.bf16.vlgmr.msra.gmra.mrb[32].mxu0 %v9158_v3  ;;  %2578 = vmatmul.mubr.bf16.vlgmr.msra.gmra.mrb[8].mxu1 %v9160_v6 }
 0x174   : > { %7333 = vmatpush3.bf16.msra.mxu1 %v8221_v7  ;;  %2537 = vmatprep.mubr.bf16.mxu0 %v9165_v9  ;;  %v9322_v7 = vcombine.low %v9276_v46, %v2153_v52  ;;  %v8309_v52 = vld [vmem:[%s11070_s6 + $0x260] sm:$0xff]  }
 0x175   : > { %2585 = vmatprep.mubr.bf16.mxu1 %v9167_v10  ;;  %7334 = vmatprep.subr.bf16.mxu1 %v8227_v12  ;;  %v9324_v12 = vld [vmem:[#allocation2 + $0x120] ss:$8 sps:$4 sm:$0xff]  }
 0x176   : > { %7221 = vmatpush3.bf16.msra.mxu0 %v8235_v21  ;;  %v6606_v21 = vcombine.high %v9309_v1, %v9316_v30 }
 0x177   : > { %7222 = vmatprep.subr.bf16.mxu0 %v8236_v51  ;;  %v9335_v51 = vld [vmem:[#allocation2 + $0x138] ss:$8 sps:$4 sm:$0xff]  }
 0x178   : > { %7335 = vmatpush3.bf16.msra.mxu1 %v8228_v13  ;;  %v9326_v13 = vld [vmem:[#allocation2 + $0x13c] ss:$8 sps:$4 sm:$0xff]  }
 0x179   : > { %7336 = vmatprep.subr.bf16.mxu1 %v8237_v4  ;;  %v8292_v4 = vld [vmem:[%s11070_s6 + $0x80] sm:$0xff]  }
 0x17a   : > { %7223 = vmatpush3.bf16.msra.mxu0 %v8238_v11  ;;  %v8295_v11 = vld [vmem:[%s11070_s6 + $0xc8] sm:$0xff]  }
 0x17b   : > { %2538 = vmatmul.mubr.bf16.gmra.mrb[36].mxu0 %v9191_v15  ;;  %2586 = vmatmul.mubr.bf16.gmra.mrb[12].mxu1 %v9193_v17 }
 0x17c   : > { %2545 = vmatprep.mubr.bf16.mxu0 %v9195_v18  ;;  %2593 = vmatprep.mubr.bf16.mxu1 %v9197_v20 }
 0x17d   : > { %7337 = vmatpush3.bf16.msra.mxu1 %v8239_v22  ;;  %7224 = vmatprep.subr.bf16.mxu0 %v8245_v26  ;;  %v8296_v22 = vld [vmem:[%s11070_s6 + $0x88] sm:$0xff]   ;;  %v8299_v26 = vld [vmem:[%s11070_s6 + $0xd0] sm:$0xff]  }
 0x17e   : > { %7225 = vmatpush3.bf16.msra.mxu0 %v8246_v25  ;;  %7338 = vmatprep.subr.bf16.mxu1 %v8249_v27  ;;  %v9354_v25 = vld [vmem:[#allocation2 + $0x150] ss:$8 sps:$4 sm:$0xff]   ;;  %v9356_v27 = vld [vmem:[#allocation2 + $0x16c] ss:$8 sps:$4 sm:$0xff]  }
 0x17f   : > { %7226 = vmatprep.subr.bf16.mxu0 %v8247_v37  ;;  %v8304_v37 = vld [vmem:[%s11070_s6 + $0x98] sm:$0xff]  }
 0x181   : > { %7339 = vmatpush3.bf16.msra.mxu1 %v8253_v16  ;;  %v9374_v16 = vld [vmem:[#allocation2 + $0x168] ss:$8 sps:$4 sm:$0xff]  }
 0x182   : > { %7227 = vmatpush3.bf16.msra.mxu0 %v8248_v32  ;;  %7340 = vmatprep.subr.bf16.mxu1 %v8266_v39  ;;  %v9376_v32 = vld [vmem:[#allocation2 + $0x184] ss:$8 sps:$4 sm:$0xff]   ;;  %v8315_v39 = vld [vmem:[%s11070_s6 + $0xf0] sm:$0xff]  }
 0x183   : > { %2546 = vmatmul.mubr.bf16.gmra.mrb[40].mxu0 %v9224_v33  ;;  %2594 = vmatmul.mubr.bf16.gmra.mrb[16].mxu1 %v9226_v34 }
 0x184   : > { %2553 = vmatprep.mubr.bf16.mxu0 %v9228_v35  ;;  %2601 = vmatprep.mubr.bf16.mxu1 %v9230_v36 }
 0x185   : > { %7228 = vmatprep.subr.bf16.mxu0 %v8256_v24  ;;  %7341 = vmatpush3.bf16.msra.mxu1 %v8268_v23  ;;  %v8311_v24 = vld [vmem:[%s11070_s6 + $0xe8] sm:$0xff]   ;;  %v8317_v23 = vld [vmem:[%s11070_s6 + $0xf8] sm:$0xff]  }
 0x186   : > { %7229 = vmatpush3.bf16.msra.mxu0 %v8257_v38  ;;  %7342 = vmatprep.subr.bf16.mxu1 %v8276_v48  ;;  %v8312_v38 = vld [vmem:[%s11070_s6 + $0xa8] sm:$0xff]   ;;  %v8301_v48 = vld [vmem:[%s11070_s6 + $0x250] sm:$0xff]  }
 0x187   : > { %7230 = vmatprep.subr.bf16.mxu0 %v8258_v41  ;;  %v8316_v41 = vld [vmem:[%s11070_s6 + $0xb0] sm:$0xff]  }
 0x189   : > { %7343 = vmatpush3.bf16.msra.mxu1 %v8277_v49  ;;  %v8305_v49 = vld [vmem:[%s11070_s6 + $0x258] sm:$0xff]  }
 0x18a   : > { %7231 = vmatpush3.bf16.msra.mxu0 %v8259_v44  ;;  %7344 = vmatprep.subr.bf16.mxu1 %v8281_v56  ;;  %v8326_v44 = vld [vmem:[%s11070_s6 + $0x3c0] sm:$0xff]   ;;  %v8320_v56 = vld [vmem:[%s11070_s6 + $0x230] sm:$0xff]  }
 0x18b   : > { %2554 = vmatmul.mubr.bf16.gmra.mrb[44].mxu0 %v9254_v42  ;;  %2602 = vmatmul.mubr.bf16.gmra.mrb[20].mxu1 %v9256_v5 }
 0x18c   : > { %2561 = vmatprep.mubr.bf16.mxu0 %v9258_v19  ;;  %2609 = vmatprep.mubr.bf16.mxu1 %v9260_v54 }
 0x18d   : > { %7232 = vmatprep.subr.bf16.mxu0 %v8265_v45  ;;  %7345 = vmatpush3.bf16.msra.mxu1 %v8282_v57  ;;  %v8294_v45 = vld [vmem:[%s11070_s6 + $0x200] sm:$0xff]  }
 0x18e   : > { %7233 = vmatpush3.bf16.msra.mxu0 %v8267_v47  ;;  %7346 = vmatprep.subr.bf16.mxu1 %v8286_v62  ;;  %v8297_v47 = vld [vmem:[%s11070_s6 + $0x248] sm:$0xff]   ;;  %v8328_v57 = vld [vmem:[%s11070_s6 + $0x140] sm:$0xff]   ;;  %v8390_v62 = vld [vmem:[#allocation2 + $0x18] sm:$0xff] }
 0x18f   : > { %7234 = vmatprep.subr.bf16.mxu0 %v8269_v53  ;;  %v8310_v53 = vld [vmem:[%s11070_s6 + $0x220] sm:$0xff]  }
 0x191   : > { %7347 = vmatpush3.bf16.msra.mxu1 %v8289_v63  ;;  %v3339_v63 = vshrl.u32 %v8390_v62, 16 }
 0x192   : > { %7235 = vmatpush3.bf16.msra.mxu0 %v8270_v55  ;;  %7556 = vmatprep.subr.bf16.mxu1 %v8293_v60  ;;  %v8319_v55 = vld [vmem:[%s11070_s6 + $0x270] sm:$0xff]  }
 0x193   : > { %2562 = vmatmul.mubr.bf16.gmra.mrb[48].mxu0 %v9292_v31  ;;  %2610 = vmatmul.mubr.bf16.gmra.mrb[24].mxu1 %v9294_v59 }
 0x194   : > { %2569 = vmatprep.mubr.bf16.mxu0 %v9297_v8  ;;  %2617 = vmatprep.mubr.bf16.mxu1 %v9299_v61 }
 0x195   : > { %7444 = vmatprep.subr.bf16.mxu0 %v8291_v2 }
 0x19b   : > { %2570 = vmatmul.mubr.bf16.gmra.mrb[52].mxu0 %v9322_v7  ;;  %2618 = vmatmul.mubr.bf16.gmra.mrb[28].mxu1 %v9324_v12 }
 0x19c   : > { %2625 = vmatprep.mubr.bf16.mxu1 %v9326_v13  ;;  %2796 = vmatprep.mubr.bf16.mxu0 %v6606_v21  ;;  %v3341_v21 = vrot.slane %v3339_v63, 4  ;;  %v8327_v63 = vld [vmem:[%s11070_s6 + $0x380] sm:$0xff]  }
 0x1a3   : > { %2626 = vmatmul.mubr.bf16.gmra.mrb[32].mxu1 %v9335_v51  ;;  %2797 = vmatmul.mubr.bf16.vlgmr.msra.gmra.mrb[56].mxu0 %v6605_v14 }
 0x1a4   : > { %2633 = vmatprep.mubr.bf16.mxu1 %v9337_v50  ;;  %2804 = vmatprep.mubr.bf16.mxu0 %v9131_v0  ;;  %v8303_v0 = vld [vmem:[%s11070_s6 + $0xd8] sm:$0xff]  }
 0x1a5   : > { %7445 = vmatpush3.bf16.msra.mxu0 %v8292_v4 }
 0x1a6   : > { %7446 = vmatprep.subr.bf16.mxu0 %v8295_v11 }
 0x1a9   : > { %7447 = vmatpush3.bf16.msra.mxu0 %v8296_v22 }
 0x1aa   : > { %7448 = vmatprep.subr.bf16.mxu0 %v8299_v26 }
 0x1ab   : > { %2634 = vmatmul.mubr.bf16.gmra.mrb[36].mxu1 %v9354_v25  ;;  %2805 = vmatmul.mubr.bf16.gmra.mrb[60].mxu0 %v9158_v3  ;;  %v8308_v3 = vld [vmem:[%s11070_s6 + $0xa0] sm:$0xff]  }
 0x1ac   : > { %2641 = vmatprep.mubr.bf16.mxu1 %v9356_v27  ;;  %2812 = vmatprep.mubr.bf16.mxu0 %v9165_v9 }
 0x1ad   : > { %7449 = vmatpush3.bf16.msra.mxu0 %v8300_v28 }
 0x1ae   : > { %7450 = vmatprep.subr.bf16.mxu0 %v8303_v0 }
 0x1b1   : > { %7451 = vmatpush3.bf16.msra.mxu0 %v8304_v37 }
 0x1b2   : > { %7452 = vmatprep.subr.bf16.mxu0 %v8307_v29  ;;  %v8392_v29 = vld [vmem:[#allocation2 + $0x30] sm:$0xff] }
 0x1b3   : > { %2642 = vmatmul.mubr.bf16.gmra.mrb[40].mxu1 %v9374_v16  ;;  %2813 = vmatmul.mubr.bf16.gmra.mrb[64].mxu0 %v9191_v15 }
 0x1b4   : > { %2649 = vmatprep.mubr.bf16.mxu1 %v9376_v32  ;;  %2820 = vmatprep.mubr.bf16.mxu0 %v9195_v18 }
 0x1b5   : > { %7453 = vmatpush3.bf16.msra.mxu0 %v8308_v3  ;;  %v3363_v3 = vshrl.u32 %v8392_v29, 16 }
 0x1b6   : > { %7454 = vmatprep.subr.bf16.mxu0 %v8311_v24  ;;  %v3366_v24 = vshll.u32 %v8392_v29, 16  ;;  %v3271_v29 = vld [vmem:[#allocation2 + $0x70] sm:$0x11] }
 0x1b9   : > { %7455 = vmatpush3.bf16.msra.mxu0 %v8312_v38 }
 0x1ba   : > { %7456 = vmatprep.subr.bf16.mxu0 %v8315_v39  ;;  %v8393_v39 = vld [vmem:[#allocation2 + $0x38] sm:$0xff] }
 0x1bb   : > { %2650 = vmatmul.mubr.bf16.gmra.mrb[44].mxu1 %v9394_v40  ;;  %2821 = vmatmul.mubr.bf16.gmra.mrb[68].mxu0 %v9224_v33 }
 0x1bc   : > { %2828 = vmatprep.mubr.bf16.mxu0 %v9228_v35  ;;  %3096 = vmatprep.mubr.bf16.mxu1 %v9165_v9  ;;  %v8298_v9 = vld [vmem:[%s11070_s6 + $0x208] sm:$0xff]  }
 0x1bd   : > { %7457 = vmatpush3.bf16.msra.mxu0 %v8316_v41  ;;  %v3372_v41 = vshll.u32 %v8393_v39, 16 }
 0x1be   : > { %7458 = vmatprep.subr.bf16.mxu0 %v8317_v23  ;;  %v3376_v23 = vshrl.u32 %v8393_v39, 16 }
 0x1c1   : > { %7459 = vmatpush3.bf16.msra.mxu0 %v8318_v43 }
 0x1c2   : > { %7668 = vmatprep.subr.bf16.mxu0 %v8326_v44 }
 0x1c3   : > { %2829 = vmatmul.mubr.bf16.gmra.mrb[72].mxu0 %v9254_v42  ;;  %3097 = vmatmul.mubr.bf16.vlgmr.msra.gmra.mrb[48].mxu1 %v9191_v15  ;;  %v8302_v15 = vld [vmem:[%s11070_s6 + $0x210] sm:$0xff]  }
 0x1c4   : > { %7557 = vmatpush3.bf16.msra.mxu1 %v8294_v45  ;;  %2836 = vmatprep.mubr.bf16.mxu0 %v9258_v19 }
 0x1c5   : > { %3104 = vmatprep.mubr.bf16.mxu1 %v9195_v18  ;;  %7558 = vmatprep.subr.bf16.mxu1 %v8297_v47  ;;  %v8306_v18 = vld [vmem:[%s11070_s6 + $0x218] sm:$0xff]   ;;  %v3365_v47 = vrot.slane %v3363_v3, 4 }
 0x1c8   : > { %7559 = vmatpush3.bf16.msra.mxu1 %v8298_v9  ;;  %v3368_v9 = vrot.slane %v3366_v24, 5 }
 0x1c9   : > { %7560 = vmatprep.subr.bf16.mxu1 %v8301_v48 }
 0x1cb   : > { %2837 = vmatmul.mubr.bf16.gmra.mrb[76].mxu0 %v9292_v31  ;;  %3105 = vmatmul.mubr.bf16.gmra.mrb[52].mxu1 %v9224_v33  ;;  %v8313_v33 = vld [vmem:[%s11070_s6 + $0x268] sm:$0xff]  }
 0x1cc   : > { %2844 = vmatprep.mubr.bf16.mxu0 %v9297_v8  ;;  %3112 = vmatprep.mubr.bf16.mxu1 %v9228_v35  ;;  %v8314_v35 = vld [vmem:[%s11070_s6 + $0x228] sm:$0xff]  }
 0x1cd   : > { %7561 = vmatpush3.bf16.msra.mxu1 %v8302_v15 }
 0x1ce   : > { %7562 = vmatprep.subr.bf16.mxu1 %v8305_v49  ;;  %v3374_v49 = vrot.slane %v3372_v41, 5  ;;  %v8335_v41 = vld [vmem:[%s11070_s6 + $0x390] sm:$0xff]  }
 0x1d1   : > { %7563 = vmatpush3.bf16.msra.mxu1 %v8306_v18  ;;  %v3378_v18 = vrot.slane %v3376_v23, 4  ;;  %v8338_v23 = vld [vmem:[%s11070_s6 + $0x3d8] sm:$0xff]  }
 0x1d2   : > { %7564 = vmatprep.subr.bf16.mxu1 %v8309_v52  ;;  %v3265_v52 = vld [vmem:[#allocation2 + $0x40] sm:$0x11] }
 0x1d3   : > { %2845 = vmatmul.mubr.bf16.gmra.mrb[80].mxu0 %v9322_v7  ;;  %3113 = vmatmul.mubr.bf16.gmra.mrb[56].mxu1 %v9254_v42  ;;  %v8321_v42 = vld [vmem:[%s11070_s6 + $0x278] sm:$0xff]  }
 0x1d4   : > { %2852 = vmatprep.mubr.bf16.mxu0 %v9133_v58  ;;  %3120 = vmatprep.mubr.bf16.mxu1 %v9258_v19  ;;  %v8322_v19 = vld [vmem:[%s11070_s6 + $0x238] sm:$0xff]  }
 0x1d5   : > { %7565 = vmatpush3.bf16.msra.mxu1 %v8310_v53 }
 0x1d6   : > { %7566 = vmatprep.subr.bf16.mxu1 %v8313_v33 }
 0x1d9   : > { %7567 = vmatpush3.bf16.msra.mxu1 %v8314_v35  ;;  %v3379_v35 = vor.u32 %v3378_v18, %v3374_v49 }
 0x1da   : > { %7568 = vmatprep.subr.bf16.mxu1 %v8319_v55  ;;  %v3382_v55 = vshll.u32 %v3265_v52, 16  ;;  %v8342_v52 = vld [vmem:[%s11070_s6 + $0x3e0] sm:$0xff]  }
 0x1db   : > { %2853 = vmatmul.mubr.bf16.gmra.mrb[84].mxu0 %v9160_v6  ;;  %3121 = vmatmul.mubr.bf16.gmra.mrb[60].mxu1 %v9292_v31 }
 0x1dc   : > { %2860 = vmatprep.mubr.bf16.mxu0 %v9167_v10  ;;  %3128 = vmatprep.mubr.bf16.mxu1 %v9297_v8  ;;  %v3259_v8 = vld [vmem:[#allocation2 + $0x10] sm:$0x11] }
 0x1dd   : > { %7569 = vmatpush3.bf16.msra.mxu1 %v8320_v56  ;;  %v8394_v56 = vld [vmem:[#allocation2 + $0x48] sm:$0xff] }
 0x1de   : > { %7570 = vmatprep.subr.bf16.mxu1 %v8321_v42  ;;  %v3387_v42 = vshrl.u32 %v8394_v56, 16 }
 0x1e1   : > { %7571 = vmatpush3.bf16.msra.mxu1 %v8322_v19  ;;  %v3390_v19 = vshll.u32 %v8394_v56, 16  ;;  %v3274_v56 = vld [vmem:[#allocation2 + $0x88] sm:$0x11] }
 0x1e2   : > { %7780 = vmatprep.subr.bf16.mxu1 %v8328_v57  ;;  %v8395_v57 = vld [vmem:[#allocation2 + $0x50] sm:$0xff] }
 0x1e3   : > { %2861 = vmatmul.mubr.bf16.gmra.mrb[88].mxu0 %v9193_v17  ;;  %3129 = vmatmul.mubr.bf16.gmra.mrb[64].mxu1 %v9322_v7  ;;  %v3334_v7 = vshll.u32 %v3259_v8, 16 }
 0x1e4   : > { %2868 = vmatprep.mubr.bf16.mxu0 %v9197_v20  ;;  %3136 = vmatprep.mubr.bf16.mxu1 %v9133_v58  ;;  %v3315_v58 = vshrl.u32 %v9309_v1, 16 }
 0x1e5   : > { %v3336_v28 = vrot.slane %v3334_v7, 5 }
 0x1eb   : > { %2869 = vmatmul.mubr.bf16.gmra.mrb[92].mxu0 %v9226_v34  ;;  %3137 = vmatmul.mubr.bf16.gmra.mrb[68].mxu1 %v9160_v6  ;;  %v3318_v6 = vshll.u32 %v9309_v1, 16 }
 0x1ec   : > { %2876 = vmatprep.mubr.bf16.mxu0 %v9230_v36  ;;  %3144 = vmatprep.mubr.bf16.mxu1 %v9167_v10  ;;  %v3324_v10 = vshll.u32 %v9316_v30, 16 }
 0x1ee   : > { %v3326_v31 = vrot.slane %v3324_v10, 5 }
 0x1f3   : > { %2877 = vmatmul.mubr.bf16.gmra.mrb[96].mxu0 %v9256_v5  ;;  %3145 = vmatmul.mubr.bf16.gmra.mrb[72].mxu1 %v9193_v17  ;;  %v3328_v17 = vshrl.u32 %v9316_v30, 16 }
 0x1f4   : > { %2884 = vmatprep.mubr.bf16.mxu0 %v9260_v54  ;;  %3152 = vmatprep.mubr.bf16.mxu1 %v9197_v20  ;;  %v3317_v20 = vrot.slane %v3315_v58, 4  ;;  %v3396_v58 = vshll.u32 %v8395_v57, 16 }
 0x1f6   : > { %v3398_v8 = vrot.slane %v3396_v58, 5 }
 0x1fb   : > { %2885 = vmatmul.mubr.bf16.gmra.mrb[100].mxu0 %v9294_v59  ;;  %3153 = vmatmul.mubr.bf16.gmra.mrb[76].mxu1 %v9226_v34  ;;  %v3320_v34 = vrot.slane %v3318_v6, 5  ;;  %v3400_v6 = vshrl.u32 %v8395_v57, 16 }
 0x1fc   : > { %2892 = vmatprep.mubr.bf16.mxu0 %v9299_v61  ;;  %3160 = vmatprep.mubr.bf16.mxu1 %v9230_v36  ;;  %v3330_v36 = vrot.slane %v3328_v17, 4 }
 0x1fd   : > { %v3321_v1 = vor.u32 %v3320_v34, %v3317_v20  ;;  %v3384_v20 = vrot.slane %v3382_v55, 5  ;;  %v3268_v34 = vld [vmem:[#allocation2 + $0x58] sm:$0x11] }
 0x1fe   : > { %v3331_v30 = vor.u32 %v3330_v36, %v3326_v31  ;;  %v3392_v36 = vrot.slane %v3390_v19, 5  ;;  %v3406_v7 = vshll.u32 %v3268_v34, 16  ;;  %v8401_v34 = vld [vmem:[#allocation2 + $0x98] sm:$0xff] }
 0x1ff   : > { %v3322_v22 = vrot.slane %v3321_v1, 4 }
 0x200   : > { %v3332_v26 = vrot.slane %v3331_v30, 4 }
 0x201   : > { %v3327_v43 = vsel %vm9504_vm3, %v3322_v22, %v3326_v31  ;;  %v3389_v31 = vrot.slane %v3387_v42, 4  ;;  %v8331_v22 = vld [vmem:[%s11070_s6 + $0x388] sm:$0xff]  }
 0x202   : > { %v3337_v44 = vsel %vm9504_vm3, %v3332_v26, %v3336_v28 }
 0x203   : > { %2893 = vmatmul.mubr.bf16.gmra.mrb[104].mxu0 %v9324_v12  ;;  %3161 = vmatmul.mubr.bf16.gmra.mrb[80].mxu1 %v9256_v5  ;;  %v3342_v5 = vshll.u32 %v8390_v62, 16  ;;  %v6706_v48 = vcombine.high %v3327_v43, %v3337_v44  ;;  %v6705_v10 = vcombine.low %v3327_v43, %v3337_v44  ;;  %v3402_v62 = vrot.slane %v3400_v6, 4 }
 0x204   : > { %2900 = vmatprep.mubr.bf16.mxu0 %v9326_v13  ;;  %3168 = vmatprep.mubr.bf16.mxu1 %v9260_v54  ;;  %v8391_v54 = vld [vmem:[#allocation2 + $0x20] sm:$0xff]  ;;  %v3430_v44 = vshll.u32 %v3271_v29, 16  ;;  %v8351_v29 = vld [vmem:[%s11070_s6 + $0x3b0] sm:$0xff]  }
 0x205   : > { %v3348_v2 = vshll.u32 %v8391_v54, 16  ;;  %v3352_v60 = vshrl.u32 %v8391_v54, 16  ;;  %v3344_v14 = vrot.slane %v3342_v5, 5  ;;  %v8330_v5 = vld [vmem:[%s11070_s6 + $0x3c8] sm:$0xff]   ;;  %v8396_v54 = vld [vmem:[#allocation2 + $0x60] sm:$0xff] }
 0x207   : > { %v3350_v4 = vrot.slane %v3348_v2, 5  ;;  %v3354_v11 = vrot.slane %v3352_v60, 4  ;;  %v3411_v2 = vshrl.u32 %v8396_v54, 16  ;;  %v3414_v60 = vshll.u32 %v8396_v54, 16 }
 0x209   : > { %v3355_v37 = vor.u32 %v3354_v11, %v3350_v4  ;;  %v3413_v28 = vrot.slane %v3411_v2, 4 }
 0x20b   : > { %2901 = vmatmul.mubr.bf16.gmra.mrb[108].mxu0 %v9335_v51  ;;  %3169 = vmatmul.mubr.bf16.gmra.mrb[84].mxu1 %v9294_v59  ;;  %v3262_v59 = vld [vmem:[#allocation2 + $0x28] sm:$0x11]  ;;  %v3356_v45 = vrot.slane %v3355_v37, 4  ;;  %v3408_v37 = vrot.slane %v3406_v7, 5  ;;  %v8350_v7 = vld [vmem:[%s11070_s6 + $0x3f0] sm:$0xff]  }
 0x20c   : > { %2908 = vmatprep.mubr.bf16.mxu0 %v9337_v50  ;;  %3176 = vmatprep.mubr.bf16.mxu1 %v9299_v61  ;;  %v3345_v61 = vor.u32 %v3344_v14, %v3341_v21  ;;  %v3358_v38 = vshll.u32 %v3262_v59, 16  ;;  %v3393_v21 = vor.u32 %v3392_v36, %v3389_v31  ;;  %v3403_v14 = vor.u32 %v3402_v62, %v3398_v8 }
 0x20d   : > { %v3416_v59 = vrot.slane %v3414_v60, 5  ;;  %v3468_v31 = vshll.u32 %v8401_v34, 16  ;;  %v3472_v36 = vshrl.u32 %v8401_v34, 16 }
 0x20e   : > { %v3360_v15 = vrot.slane %v3358_v38, 5  ;;  %v3394_v3 = vrot.slane %v3393_v21, 4  ;;  %v3404_v24 = vrot.slane %v3403_v14, 4  ;;  %v8325_v21 = vld [vmem:[#allocation2 + $0x198] ss:$8 sps:$4 sm:$0xff]  }
 0x20f   : > { %v3417_v43 = vor.u32 %v3416_v59, %v3413_v28 }
 0x210   : > { %v3361_v33 = vsel %vm9504_vm3, %v3356_v45, %v3360_v15  ;;  %v3399_v15 = vsel %vm9504_vm3, %v3394_v3, %v3398_v8  ;;  %v8346_v8 = vld [vmem:[%s11070_s6 + $0x3e8] sm:$0xff]  }
 0x213   : > { %2909 = vmatmul.mubr.bf16.gmra.mrb[112].mxu0 %v9354_v25  ;;  %3177 = vmatmul.mubr.bf16.gmra.mrb[88].mxu1 %v9324_v12  ;;  %v3346_v12 = vrot.slane %v3345_v61, 4 }
 0x214   : > { %2916 = vmatprep.mubr.bf16.mxu0 %v9356_v27  ;;  %3184 = vmatprep.mubr.bf16.mxu1 %v9326_v13  ;;  %v3369_v13 = vor.u32 %v3368_v9, %v3365_v47  ;;  %v8399_v9 = vld [vmem:[#allocation2 + $0x80] sm:$0xff] }
 0x215   : > { %v3351_v53 = vsel %vm9504_vm3, %v3346_v12, %v3350_v4  ;;  %v8397_v4 = vld [vmem:[#allocation2 + $0x68] sm:$0xff]  ;;  %v8398_v12 = vld [vmem:[#allocation2 + $0x78] sm:$0xff]  ;;  %v3448_v18 = vshrl.u32 %v8399_v9, 16 }
 0x216   : > { %v3370_v17 = vrot.slane %v3369_v13, 4  ;;  %v3420_v11 = vshll.u32 %v8397_v4, 16  ;;  %v9544_v26 = vcombine.low %v3351_v53, %v3361_v33  ;;  %v3435_v45 = vshrl.u32 %v8398_v12, 16 }
 0x217   : > { %v3438_v47 = vshll.u32 %v8398_v12, 16  ;;  %v3450_v6 = vrot.slane %v3448_v18, 4 }
 0x218   : > { %v3375_v1 = vsel %vm9504_vm3, %v3370_v17, %v3374_v49  ;;  %v3422_v38 = vrot.slane %v3420_v11, 5  ;;  %v3409_v49 = vsel %vm9504_vm3, %v3404_v24, %v3408_v37  ;;  %v3437_v42 = vrot.slane %v3435_v45, 4  ;;  %v8400_v17 = vld [vmem:[#allocation2 + $0x90] sm:$0xff]  ;;  %v3278_v11 = vld [vmem:[#allocation2 + $0xa8] sm:$0xff] }
 0x219   : > { %v9570_v55 = vcombine.high %v3399_v15, %v3409_v49  ;;  %v3440_v19 = vrot.slane %v3438_v47, 5  ;;  %v9592_v14 = vcombine.low %v3399_v15, %v3409_v49  ;;  %v8353_v47 = vld [vmem:[%s11070_s6 + $0x3b8] sm:$0xff]  }
 0x21b   : > { %2917 = vmatmul.mubr.bf16.gmra.mrb[116].mxu0 %v9374_v16  ;;  %3185 = vmatmul.mubr.bf16.gmra.mrb[92].mxu1 %v9335_v51  ;;  %v9523_v51 = vcombine.high %v3351_v53, %v3361_v33  ;;  %v8323_v53 = vld [vmem:[#allocation2 + $0x19c] ss:$8 sps:$4 sm:$0xff]   ;;  %v3418_v33 = vrot.slane %v3417_v43, 4  ;;  %v3441_v62 = vor.u32 %v3440_v19, %v3437_v42 }
 0x21c   : > { %3192 = vmatprep.mubr.bf16.mxu1 %v9337_v50  ;;  %4035 = vmatprep.mubr.bf16.mxu0 %v6706_v48  ;;  %v3380_v50 = vrot.slane %v3379_v35, 4  ;;  %v3444_v48 = vshll.u32 %v8399_v9, 16  ;;  %v3432_v35 = vrot.slane %v3430_v44, 5 }
 0x21e   : > { %v3385_v30 = vsel %vm9504_vm3, %v3380_v50, %v3384_v20  ;;  %v3446_v57 = vrot.slane %v3444_v48, 5  ;;  %v3462_v50 = vshll.u32 %v8400_v17, 16  ;;  %v8343_v20 = vld [vmem:[%s11070_s6 + $0x3a0] sm:$0xff]  }
 0x21f   : > { %v9546_v61 = vcombine.high %v3375_v1, %v3385_v30  ;;  %v9568_v13 = vcombine.low %v3375_v1, %v3385_v30  ;;  %v3470_v1 = vrot.slane %v3468_v31, 5  ;;  %v3474_v30 = vrot.slane %v3472_v36, 4  ;;  %v8358_v31 = vld [vmem:[%s11070_s6 + $0x2c0] sm:$0xff]   ;;  %v3284_v36 = vld [vmem:[#allocation2 + $0xd8] sm:$0xff] }
 0x220   : > { %v3451_v54 = vor.u32 %v3450_v6, %v3446_v57  ;;  %v3464_v60 = vrot.slane %v3462_v50, 5 }
 0x221   : > { %v3475_v3 = vor.u32 %v3474_v30, %v3470_v1 }
 0x222   : > { %v3452_v28 = vrot.slane %v3451_v54, 4 }
 0x223   : > { %3193 = vmatmul.mubr.bf16.gmra.mrb[96].mxu1 %v9354_v25  ;;  %4036 = vmatmul.mubr.bf16.vlgmr.msra.gmra.mrb[120].mxu0 %v6705_v10  ;;  %v3424_v25 = vshrl.u32 %v8397_v4, 16  ;;  %v3459_v10 = vshrl.u32 %v9276_v46, 16  ;;  %v3423_v46 = vsel %vm9504_vm3, %v3418_v33, %v3422_v38  ;;  %v3277_v4 = vld [vmem:[#allocation2 + $0xa0] sm:$0x11]  ;;  %v3476_v9 = vrot.slane %v3475_v3, 4 }
 0x224   : > { %3200 = vmatprep.mubr.bf16.mxu1 %v9356_v27  ;;  %4043 = vmatprep.mubr.bf16.mxu0 %v9523_v51  ;;  %v8334_v27 = vld [vmem:[%s11070_s6 + $0x3d0] sm:$0xff]   ;;  %v3478_v24 = vshll.u32 %v3277_v4, 16  ;;  %v3281_v33 = vld [vmem:[#allocation2 + $0xc0] sm:$0xff] }
 0x225   : > { %7669 = vmatpush3.bf16.msra.mxu0 %v8327_v63  ;;  %v3426_v39 = vrot.slane %v3424_v25, 4  ;;  %v3454_v63 = vshll.u32 %v3274_v56, 16  ;;  %v3461_v2 = vrot.slane %v3459_v10, 4  ;;  %v8332_v56 = vld [vmem:[%s11070_s6 + $0x148] sm:$0xff]   ;;  %v3507_v10 = vshrl.u32 %v3281_v33, 16 }
 0x226   : > { %7670 = vmatprep.subr.bf16.mxu0 %v8330_v5  ;;  %v3480_v48 = vrot.slane %v3478_v24, 5  ;;  %v3510_v17 = vshll.u32 %v3281_v33, 16  ;;  %v8337_v24 = vld [vmem:[%s11070_s6 + $0x110] sm:$0xff]  }
 0x227   : > { %v3456_v59 = vrot.slane %v3454_v63, 5  ;;  %v3465_v37 = vor.u32 %v3464_v60, %v3461_v2  ;;  %v3285_v2 = vld [vmem:[#allocation2 + $0xe0] sm:$0xff]  ;;  %v3509_v30 = vrot.slane %v3507_v10, 4 }
 0x228   : > { %v9628_v19 = vsel %vm9504_vm3, %v3476_v9, %v3480_v48 }
 0x229   : > { %7671 = vmatpush3.bf16.msra.mxu0 %v8331_v22  ;;  %v3279_v22 = vld [vmem:[#allocation2 + $0xb0] sm:$0xff]  ;;  %v3457_v12 = vsel %vm9504_vm3, %v3452_v28, %v3456_v59  ;;  %v3466_v45 = vrot.slane %v3465_v37, 4  ;;  %v3531_v37 = vshrl.u32 %v3284_v36, 16 }
 0x22a   : > { %7672 = vmatprep.subr.bf16.mxu0 %v8334_v27  ;;  %v3442_v27 = vrot.slane %v3441_v62, 4  ;;  %v3496_v43 = vshrl.u32 %v3279_v22, 16  ;;  %v3283_v28 = vld [vmem:[#allocation2 + $0xd0] sm:$0x11] }
 0x22b   : > { %3201 = vmatmul.mubr.bf16.gmra.mrb[100].mxu1 %v9374_v16  ;;  %4044 = vmatmul.mubr.bf16.gmra.mrb[124].mxu0 %v9544_v26  ;;  %v3427_v16 = vor.u32 %v3426_v39, %v3422_v38  ;;  %v3483_v38 = vshrl.u32 %v3278_v11, 16  ;;  %v3486_v39 = vshll.u32 %v3278_v11, 16  ;;  %v9624_v42 = vsel %vm9504_vm3, %v3466_v45, %v3470_v1 }
 0x22c   : > { %3208 = vmatprep.mubr.bf16.mxu1 %v9376_v32  ;;  %4051 = vmatprep.mubr.bf16.mxu0 %v9546_v61  ;;  %v8339_v32 = vld [vmem:[%s11070_s6 + $0x398] sm:$0xff]   ;;  %v3447_v44 = vsel %vm9504_vm3, %v3442_v27, %v3446_v57  ;;  %v9647_v62 = vcombine.high %v9624_v42, %v9628_v19  ;;  %v3526_v48 = vshll.u32 %v3283_v28, 16 }
 0x22d   : > { %7673 = vmatpush3.bf16.msra.mxu0 %v8335_v41  ;;  %v3428_v58 = vrot.slane %v3427_v16, 4  ;;  %v8352_v41 = vld [vmem:[%s11070_s6 + $0x3f8] sm:$0xff]   ;;  %v3485_v15 = vrot.slane %v3483_v38, 4  ;;  %v3488_v49 = vrot.slane %v3486_v39, 5  ;;  %v3534_v38 = vshll.u32 %v3284_v36, 16 }
 0x22e   : > { %7674 = vmatprep.subr.bf16.mxu0 %v8338_v23  ;;  %v3492_v23 = vshll.u32 %v3279_v22, 16  ;;  %11111 = vst [vmem:[#allocation3_spill] sm:$0xff] %v9647_v62  ;;  %v3540_v39 = vshll.u32 %v3285_v2, 16 }
 0x22f   : > { %v3433_v5 = vsel %vm9504_vm3, %v3428_v58, %v3432_v35  ;;  %v3282_v35 = vld [vmem:[#allocation2 + $0xc8] sm:$0xff]  ;;  %v3489_v57 = vor.u32 %v3488_v49, %v3485_v15  ;;  %v3533_v15 = vrot.slane %v3531_v37, 4  ;;  %v3536_v49 = vrot.slane %v3534_v38, 5 }
 0x230   : > { %v9594_v25 = vcombine.high %v3423_v46, %v3433_v5  ;;  %v9612_v16 = vcombine.low %v3423_v46, %v3433_v5  ;;  %v3494_v18 = vrot.slane %v3492_v23, 5  ;;  %v3516_v50 = vshll.u32 %v3282_v35, 16 }
 0x231   : > { %7675 = vmatpush3.bf16.msra.mxu0 %v8339_v32  ;;  %v3498_v32 = vrot.slane %v3496_v43, 4  ;;  %v3520_v34 = vshrl.u32 %v3282_v35, 16  ;;  %v9643_v46 = vcombine.low %v3447_v44, %v3457_v12  ;;  %v3490_v63 = vrot.slane %v3489_v57, 4  ;;  %v3286_v35 = vld [vmem:[#allocation2 + $0xe8] sm:$0x11] }
 0x232   : > { %7676 = vmatprep.subr.bf16.mxu0 %v8342_v52  ;;  %v8329_v52 = vld [vmem:[%s11070_s6 + $0x100] sm:$0xff]  }
 0x233   : > { %3209 = vmatmul.mubr.bf16.gmra.mrb[104].mxu1 %v9394_v40  ;;  %4052 = vmatmul.mubr.bf16.gmra.mrb[128].mxu0 %v9568_v13  ;;  %v8347_v40 = vld [vmem:[%s11070_s6 + $0x3a8] sm:$0xff]   ;;  %v3499_v6 = vor.u32 %v3498_v32, %v3494_v18  ;;  %v3522_v59 = vrot.slane %v3520_v34, 4 }
 0x234   : > { %3216 = vmatprep.mubr.bf16.mxu1 %v8323_v53  ;;  %4059 = vmatprep.mubr.bf16.mxu0 %v9570_v55  ;;  %v9617_v53 = vcombine.high %v3447_v44, %v3457_v12  ;;  %v8340_v44 = vld [vmem:[%s11070_s6 + $0x158] sm:$0xff]   ;;  %v9669_v12 = vsel %vm9504_vm3, %v3490_v63, %v3494_v18 }
 0x235   : > { %7677 = vmatpush3.bf16.msra.mxu0 %v8343_v20  ;;  %v8333_v20 = vld [vmem:[%s11070_s6 + $0x108] sm:$0xff]   ;;  %v8341_v18 = vld [vmem:[%s11070_s6 + $0x118] sm:$0xff]  }
 0x236   : > { %7678 = vmatprep.subr.bf16.mxu0 %v8346_v8 }
 0x239   : > { %7679 = vmatpush3.bf16.msra.mxu0 %v8347_v40  ;;  %v3500_v40 = vrot.slane %v3499_v6, 4 }
 0x23a   : > { %7680 = vmatprep.subr.bf16.mxu0 %v8350_v7  ;;  %v3512_v7 = vrot.slane %v3510_v17, 5  ;;  %v3287_v17 = vld [vmem:[#allocation2 + $0xf0] sm:$0xff] }
 0x23b   : > { %3217 = vmatmul.mubr.bf16.gmra.mrb[108].mxu1 %v8325_v21  ;;  %4060 = vmatmul.mubr.bf16.gmra.mrb[132].mxu0 %v9592_v14  ;;  %v9649_v21 = vrot.slane %v3516_v50, 5 }
 0x23c   : > { %4067 = vmatprep.mubr.bf16.mxu0 %v9594_v25  ;;  %4365 = vmatprep.mubr.bf16.mxu1 %v9523_v51  ;;  %v3280_v51 = vld [vmem:[#allocation2 + $0xb8] sm:$0x11] }
 0x23d   : > { %7681 = vmatpush3.bf16.msra.mxu0 %v8351_v29  ;;  %v3502_v58 = vshll.u32 %v3280_v51, 16  ;;  %v3523_v9 = vor.u32 %v3522_v59, %v9649_v21  ;;  %v9676_v51 = vrot.slane %v3540_v39, 5 }
 0x23e   : > { %7682 = vmatprep.subr.bf16.mxu0 %v8352_v41  ;;  %v3544_v41 = vshrl.u32 %v3285_v2, 16  ;;  %v3537_v2 = vor.u32 %v3536_v49, %v3533_v15 }
 0x23f   : > { %v3504_v5 = vrot.slane %v3502_v58, 5  ;;  %v9686_v58 = vcombine.low %v9624_v42, %v9628_v19  ;;  %v3550_v19 = vshll.u32 %v3286_v35, 16 }
 0x240   : > { %v3546_v32 = vrot.slane %v3544_v41, 4 }
 0x241   : > { %7683 = vmatpush3.bf16.msra.mxu0 %v8353_v47  ;;  %v3505_v45 = vsel %vm9504_vm3, %v3500_v40, %v3504_v5  ;;  %v3513_v47 = vor.u32 %v3512_v7, %v3509_v30  ;;  %11112 = vst [vmem:[#allocation4_spill] sm:$0xff] %v9686_v58  ;;  %v3524_v5 = vrot.slane %v3523_v9, 4  ;;  %v3555_v30 = vshrl.u32 %v3287_v17, 16 }
 0x242   : > { %7892 = vmatprep.subr.bf16.mxu0 %v8358_v31  ;;  %v9689_v6 = vcombine.high %v9669_v12, %v3505_v45  ;;  %v3528_v31 = vrot.slane %v3526_v48, 5  ;;  %v3547_v42 = vor.u32 %v3546_v32, %v9676_v51  ;;  %v3558_v7 = vshll.u32 %v3287_v17, 16 }
 0x243   : > { %4068 = vmatmul.mubr.bf16.gmra.mrb[136].mxu0 %v9612_v16  ;;  %4366 = vmatmul.mubr.bf16.vlgmr.msra.gmra.mrb[112].mxu1 %v9544_v26  ;;  %v8336_v26 = vld [vmem:[%s11070_s6 + $0x150] sm:$0xff]   ;;  %v3514_v34 = vrot.slane %v3513_v47, 4  ;;  %v9722_v48 = vcombine.low %v9669_v12, %v3505_v45 }
 0x244   : > { %7781 = vmatpush3.bf16.msra.mxu1 %v8329_v52  ;;  %4075 = vmatprep.mubr.bf16.mxu0 %v9617_v53  ;;  %11113 = vst [vmem:[#allocation5_spill] sm:$0xff] %v9689_v6  ;;  %v3529_v37 = vsel %vm9504_vm3, %v3524_v5, %v3528_v31  ;;  %v3548_v41 = vrot.slane %v3547_v42, 4  ;;  %v3560_v47 = vrot.slane %v3558_v7, 5  ;;  %v3291_v45 = vld [vmem:[#allocation2 + $0x110] sm:$0xff] }
 0x245   : > { %4373 = vmatprep.mubr.bf16.mxu1 %v9546_v61  ;;  %7782 = vmatprep.subr.bf16.mxu1 %v8332_v56  ;;  %v8344_v56 = vld [vmem:[%s11070_s6 + $0x160] sm:$0xff]   ;;  %v3519_v59 = vsel %vm9504_vm3, %v3514_v34, %v9649_v21  ;;  %v8354_v21 = vld [vmem:[%s11070_s6 + $0x170] sm:$0xff]   ;;  %11114 = vst [vmem:[#allocation6_spill] sm:$0xff] %v9722_v48 }
 0x246   : > { %v7160_v8 = vpop.f32.mrb[8].mxu1  ;;  %v7124_v54 = vpop.f32.mrb[32].mxu0  ;;  %v8355_v34 = vld [vmem:[%s11070_s6 + $0x130] sm:$0xff]  }
 0x247   : > { %v7161_v60 = vpop.f32.mrb[9].mxu1  ;;  %v7125_v1 = vpop.f32.mrb[33].mxu0 }
 0x248   : > { %v9651_v4 = vadd.f32 %v7161_v60, %v7160_v8  ;;  %v7163_v11 = vpop.f32.mrb[10].mxu1  ;;  %7783 = vmatpush3.bf16.msra.mxu1 %v8333_v20  ;;  %v9653_v22 = vadd.f32 %v7125_v1, %v7124_v54  ;;  %v7127_v27 = vpop.f32.mrb[34].mxu0  ;;  %v3288_v8 = vld [vmem:[#allocation2 + $0xf8] sm:$0xff]  ;;  %v8345_v60 = vld [vmem:[%s11070_s6 + $0x120] sm:$0xff]  }
 0x249   : > { %v7164_v29 = vpop.f32.mrb[11].mxu1  ;;  %v7128_v3 = vpop.f32.mrb[35].mxu0  ;;  %7784 = vmatprep.subr.bf16.mxu1 %v8336_v26  ;;  %v3568_v28 = vshrl.u32 %v3288_v8, 16 }
 0x24a   : > { %v9658_v23 = vadd.f32 %v7164_v29, %v7163_v11  ;;  %v9660_v43 = vadd.f32 %v7128_v3, %v7127_v27  ;;  %v8348_v11 = vld [vmem:[%s11070_s6 + $0x168] sm:$0xff]   ;;  %v3564_v27 = vshll.u32 %v3288_v8, 16  ;;  %v3538_v29 = vrot.slane %v3537_v2, 4 }
 0x24b   : > { %4076 = vmatmul.mubr.bf16.gmra.mrb[140].mxu0 %v9643_v46  ;;  %4374 = vmatmul.mubr.bf16.gmra.mrb[116].mxu1 %v9568_v13  ;;  %v3552_v3 = vrot.slane %v3550_v19, 5  ;;  %v3570_v32 = vrot.slane %v3568_v28, 4  ;;  %v3588_v19 = vshll.u32 %v3291_v45, 16 }
 0x24c   : > { %4083 = vmatprep.mubr.bf16.mxu0 %v9647_v62  ;;  %4381 = vmatprep.mubr.bf16.mxu1 %v9570_v55  ;;  %v9724_v49 = vrot.slane %v3564_v27, 5  ;;  %v9735_v12 = vsel %vm9504_vm3, %v3538_v29, %v9676_v51  ;;  %v8356_v51 = vld [vmem:[%s11070_s6 + $0x178] sm:$0xff]  }
 0x24d   : > { %7785 = vmatpush3.bf16.msra.mxu1 %v8337_v24  ;;  %v8349_v24 = vld [vmem:[%s11070_s6 + $0x128] sm:$0xff]   ;;  %v9746_v8 = vsel %vm9504_vm3, %v3548_v41, %v3552_v3  ;;  %v3293_v3 = vld [vmem:[#allocation2 + $0x120] sm:$0xff] }
 0x24e   : > { %v7166_v52 = vpop.f32.mrb[12].mxu1  ;;  %v7130_v33 = vpop.f32.mrb[36].mxu0  ;;  %7786 = vmatprep.subr.bf16.mxu1 %v8340_v44  ;;  %v3557_v44 = vrot.slane %v3555_v30, 4  ;;  %v3571_v5 = vor.u32 %v3570_v32, %v9724_v49  ;;  %v8357_v30 = vld [vmem:[%s11070_s6 + $0x138] sm:$0xff]   ;;  %v9763_v28 = vcombine.high %v9735_v12, %v9746_v8 }
 0x24f   : > { %v7167_v57 = vpop.f32.mrb[13].mxu1  ;;  %v7131_v10 = vpop.f32.mrb[37].mxu0 }
 0x250   : > { %v9691_v50 = vadd.f32 %v7167_v57, %v7166_v52  ;;  %v7169_v20 = vpop.f32.mrb[14].mxu1  ;;  %v9693_v26 = vadd.f32 %v7131_v10, %v7130_v33  ;;  %v7133_v36 = vpop.f32.mrb[38].mxu0  ;;  %v9728_v33 = vcombine.high %v3519_v59, %v3529_v37  ;;  %v3289_v57 = vld [vmem:[#allocation2 + $0x100] sm:$0x11]  ;;  %v3290_v10 = vld [vmem:[#allocation2 + $0x108] sm:$0xff]  ;;  %11118 = vst [vmem:[#allocation10_spill] sm:$0xff] %v9763_v28 }
 0x251   : > { %v7170_v63 = vpop.f32.mrb[15].mxu1  ;;  %v7134_v54 = vpop.f32.mrb[39].mxu0  ;;  %7787 = vmatpush3.bf16.msra.mxu1 %v8341_v18  ;;  %v3579_v2 = vshrl.u32 %v3290_v10, 16  ;;  %v3582_v42 = vshll.u32 %v3290_v10, 16 }
 0x252   : > { %v9699_v40 = vadd.f32 %v7170_v63, %v7169_v20  ;;  %v9701_v1 = vadd.f32 %v7134_v54, %v7133_v36  ;;  %7788 = vmatprep.subr.bf16.mxu1 %v8344_v56  ;;  %11115 = vst [vmem:[#allocation7_spill] sm:$0xff] %v9728_v33  ;;  %v3561_v63 = vor.u32 %v3560_v47, %v3557_v44  ;;  %v3574_v54 = vshll.u32 %v3289_v57, 16 }
 0x253   : > { %4084 = vmatmul.mubr.bf16.gmra.mrb[144].mxu0 %v9686_v58  ;;  %4382 = vmatmul.mubr.bf16.gmra.mrb[120].mxu1 %v9592_v14  ;;  %v3572_v44 = vrot.slane %v3571_v5, 4 }
 0x254   : > { %4091 = vmatprep.mubr.bf16.mxu0 %v9689_v6  ;;  %4389 = vmatprep.mubr.bf16.mxu1 %v9594_v25  ;;  %v3562_v29 = vrot.slane %v3561_v63, 4  ;;  %v3576_v47 = vrot.slane %v3574_v54, 5 }
 0x255   : > { %7789 = vmatpush3.bf16.msra.mxu1 %v8345_v60  ;;  %v3592_v60 = vshrl.u32 %v3291_v45, 16  ;;  %v3606_v45 = vshll.u32 %v3293_v3, 16 }
 0x256   : > { %v7172_v38 = vpop.f32.mrb[16].mxu1  ;;  %v7136_v39 = vpop.f32.mrb[40].mxu0  ;;  %7790 = vmatprep.subr.bf16.mxu1 %v8348_v11  ;;  %v9759_v11 = vcombine.low %v3519_v59, %v3529_v37  ;;  %v3584_v59 = vrot.slane %v3582_v42, 5  ;;  %v3567_v54 = vsel %vm9504_vm3, %v3562_v29, %v9724_v49  ;;  %v9787_v49 = vcombine.low %v9735_v12, %v9746_v8 }
 0x257   : > { %v7173_v9 = vpop.f32.mrb[17].mxu1  ;;  %v7137_v15 = vpop.f32.mrb[41].mxu0  ;;  %v3594_v57 = vrot.slane %v3592_v60, 4 }
 0x258   : > { %v9726_v18 = vadd.f32 %v7173_v9, %v7172_v38  ;;  %v7175_v52 = vpop.f32.mrb[18].mxu1  ;;  %v9730_v35 = vadd.f32 %v7137_v15, %v7136_v39  ;;  %v7139_v56 = vpop.f32.mrb[42].mxu0  ;;  %11117 = vst [vmem:[#allocation9_spill] sm:$0xff] %v9759_v11  ;;  %v8360_v38 = vld [vmem:[%s11070_s6 + $0x440] sm:$0xff]  }
 0x259   : > { %v7176_v17 = vpop.f32.mrb[19].mxu1  ;;  %v7140_v20 = vpop.f32.mrb[43].mxu0  ;;  %7791 = vmatpush3.bf16.msra.mxu1 %v8349_v24  ;;  %v3294_v24 = vld [vmem:[#allocation2 + $0x128] sm:$0xff] }
 0x25a   : > { %v9740_v31 = vadd.f32 %v7176_v17, %v7175_v52  ;;  %v9742_v36 = vadd.f32 %v7140_v20, %v7139_v56  ;;  %7792 = vmatprep.subr.bf16.mxu1 %v8354_v21  ;;  %v3581_v21 = vrot.slane %v3579_v2, 4  ;;  %v3292_v52 = vld [vmem:[#allocation2 + $0x118] sm:$0x11]  ;;  %v3590_v56 = vrot.slane %v3588_v19, 5 }
 0x25b   : > { %4092 = vmatmul.mubr.bf16.gmra.mrb[148].mxu0 %v9722_v48  ;;  %4390 = vmatmul.mubr.bf16.gmra.mrb[124].mxu1 %v9612_v16  ;;  %v3603_v20 = vshrl.u32 %v3293_v3, 16  ;;  %v3616_v63 = vshrl.u32 %v3294_v24, 16  ;;  %v3577_v2 = vsel %vm9504_vm3, %v3572_v44, %v3576_v47  ;;  %v3598_v60 = vshll.u32 %v3292_v52, 16 }
 0x25c   : > { %11116 = vst [vmem:[#allocation8_spill] sm:$0xff] %v9740_v31  ;;  %4099 = vmatprep.mubr.bf16.mxu0 %v9728_v33  ;;  %4397 = vmatprep.mubr.bf16.mxu1 %v9617_v53  ;;  %v3585_v42 = vor.u32 %v3584_v59, %v3581_v21  ;;  %v3595_v19 = vor.u32 %v3594_v57, %v3590_v56 }
 0x25d   : > { %7793 = vmatpush3.bf16.msra.mxu1 %v8355_v34  ;;  %v3612_v34 = vshll.u32 %v3294_v24, 16  ;;  %v3618_v3 = vrot.slane %v3616_v63, 4  ;;  %v3600_v57 = vrot.slane %v3598_v60, 5 }
 0x25e   : > { %v7178_v7 = vpop.f32.mrb[20].mxu1  ;;  %v7142_v27 = vpop.f32.mrb[44].mxu0  ;;  %7794 = vmatprep.subr.bf16.mxu1 %v8356_v51  ;;  %v3586_v52 = vrot.slane %v3585_v42, 4 }
 0x25f   : > { %v7179_v39 = vpop.f32.mrb[21].mxu1  ;;  %v7143_v41 = vpop.f32.mrb[45].mxu0 }
 0x260   : > { %v9768_v37 = vadd.f32 %v7179_v39, %v7178_v7  ;;  %v7181_v9 = vpop.f32.mrb[22].mxu1  ;;  %v9770_v15 = vadd.f32 %v7143_v41, %v7142_v27  ;;  %v7145_v32 = vpop.f32.mrb[46].mxu0  ;;  %v3608_v7 = vrot.slane %v3606_v45, 5  ;;  %v3614_v27 = vrot.slane %v3612_v34, 5  ;;  %v3295_v39 = vld [vmem:[#allocation2 + $0x130] sm:$0x11] }
 0x261   : > { %v7182_v10 = vpop.f32.mrb[23].mxu1  ;;  %v7146_v17 = vpop.f32.mrb[47].mxu0  ;;  %7795 = vmatpush3.bf16.msra.mxu1 %v8357_v30  ;;  %v3605_v30 = vrot.slane %v3603_v20, 4  ;;  %v3596_v45 = vrot.slane %v3595_v19, 4  ;;  %v3622_v12 = vshll.u32 %v3295_v39, 16  ;;  %v3591_v19 = vsel %vm9504_vm3, %v3586_v52, %v3590_v56 }
 0x262   : > { %11119 = vst [vmem:[#allocation11_spill] sm:$0xff] %v9768_v37  ;;  %v9772_v51 = vadd.f32 %v7182_v10, %v7181_v9  ;;  %v9774_v5 = vadd.f32 %v7146_v17, %v7145_v32  ;;  %8004 = vmatprep.subr.bf16.mxu1 %v8360_v38  ;;  %v9789_v9 = vcombine.high %v3567_v54, %v3577_v2  ;;  %v3296_v32 = vld [vmem:[#allocation2 + $0x138] sm:$0xff]  ;;  %v3297_v10 = vld [vmem:[#allocation2 + $0x140] sm:$0xff] }
 0x263   : > { %4100 = vmatmul.mubr.bf16.gmra.mrb[152].mxu0 %v9759_v11  ;;  %4398 = vmatmul.mubr.bf16.gmra.mrb[128].mxu1 %v9643_v46  ;;  %v3609_v34 = vor.u32 %v3608_v7, %v3605_v30  ;;  %v3619_v63 = vor.u32 %v3618_v3, %v3614_v27  ;;  %v3627_v37 = vshrl.u32 %v3296_v32, 16  ;;  %v3640_v42 = vshrl.u32 %v3297_v10, 16 }
 0x264   : > { %11120 = vst [vmem:[#allocation12_spill] sm:$0xff] %v9772_v51  ;;  %4107 = vmatprep.mubr.bf16.mxu0 %v9763_v28  ;;  %4405 = vmatprep.mubr.bf16.mxu1 %v9647_v62  ;;  %v3601_v60 = vsel %vm9504_vm3, %v3596_v45, %v3600_v57  ;;  %v3298_v45 = vld [vmem:[#allocation2 + $0x148] sm:$0x11] }
 0x265   : > { %v3610_v30 = vrot.slane %v3609_v34, 4  ;;  %v3620_v39 = vrot.slane %v3619_v63, 4  ;;  %v9813_v57 = vcombine.high %v3591_v19, %v3601_v60  ;;  %v3299_v34 = vld [vmem:[#allocation2 + $0x150] sm:$0xff] }
 0x266   : > { %v7184_v24 = vpop.f32.mrb[24].mxu1  ;;  %v7148_v38 = vpop.f32.mrb[48].mxu0 }
 0x267   : > { %v7185_v41 = vpop.f32.mrb[25].mxu1  ;;  %v7149_v29 = vpop.f32.mrb[49].mxu0 }
 0x268   : > { %v9791_v44 = vadd.f32 %v7185_v41, %v7184_v24  ;;  %v7187_v47 = vpop.f32.mrb[26].mxu1  ;;  %v9793_v21 = vadd.f32 %v7149_v29, %v7148_v38  ;;  %v7151_v59 = vpop.f32.mrb[50].mxu0  ;;  %v3630_v24 = vshll.u32 %v3296_v32, 16  ;;  %v3636_v38 = vshll.u32 %v3297_v10, 16 }
 0x269   : > { %v7188_v17 = vpop.f32.mrb[27].mxu1  ;;  %v7152_v20 = vpop.f32.mrb[51].mxu0  ;;  %v3624_v41 = vrot.slane %v3622_v12, 5  ;;  %v3629_v29 = vrot.slane %v3627_v37, 4  ;;  %v9807_v10 = vcombine.low %v3567_v54, %v3577_v2  ;;  %v3615_v37 = vsel %vm9504_vm3, %v3610_v30, %v3614_v27 }
 0x26a   : > { %11121 = vst [vmem:[#allocation13_spill] sm:$0xff] %v9791_v44  ;;  %v9795_v8 = vadd.f32 %v7188_v17, %v7187_v47  ;;  %v9797_v51 = vadd.f32 %v7152_v20, %v7151_v59  ;;  %v3632_v32 = vrot.slane %v3630_v24, 5  ;;  %v3638_v17 = vrot.slane %v3636_v38, 5  ;;  %v3300_v24 = vld [vmem:[#allocation2 + $0x158] sm:$0xff] }
 0x26b   : > { %4108 = vmatmul.mubr.bf16.gmra.mrb[156].mxu0 %v9787_v49  ;;  %4406 = vmatmul.mubr.bf16.gmra.mrb[132].mxu1 %v9686_v58  ;;  %v3642_v20 = vrot.slane %v3640_v42, 4  ;;  %v3625_v38 = vsel %vm9504_vm3, %v3620_v39, %v3624_v41  ;;  %v3660_v27 = vshll.u32 %v3300_v24, 16 }
 0x26c   : > { %11122 = vst [vmem:[#allocation14_spill] sm:$0xff] %v9795_v8  ;;  %4115 = vmatprep.mubr.bf16.mxu0 %v9789_v9  ;;  %4413 = vmatprep.mubr.bf16.mxu1 %v9689_v6  ;;  %v3633_v42 = vor.u32 %v3632_v32, %v3629_v29  ;;  %v9829_v39 = vcombine.high %v3615_v37, %v3625_v38 }
 0x26d   : > { %v3662_v6 = vrot.slane %v3660_v27, 5 }
 0x26e   : > { %v7190_v7 = vpop.f32.mrb[28].mxu1  ;;  %v7154_v3 = vpop.f32.mrb[52].mxu0  ;;  %v3634_v41 = vrot.slane %v3633_v42, 4 }
 0x26f   : > { %v7191_v47 = vpop.f32.mrb[29].mxu1  ;;  %v7155_v59 = vpop.f32.mrb[53].mxu0 }
 0x270   : > { %v9809_v8 = vadd.f32 %v7191_v47, %v7190_v7  ;;  %v7193_v44 = vpop.f32.mrb[30].mxu1  ;;  %v9811_v56 = vadd.f32 %v7155_v59, %v7154_v3  ;;  %v7157_v52 = vpop.f32.mrb[54].mxu0  ;;  %v3643_v7 = vor.u32 %v3642_v20, %v3638_v17  ;;  %v3646_v3 = vshll.u32 %v3298_v45, 16 }
 0x271   : > { %v7194_v63 = vpop.f32.mrb[31].mxu1  ;;  %v7158_v12 = vpop.f32.mrb[55].mxu0  ;;  %v3651_v47 = vshrl.u32 %v3299_v34, 16  ;;  %v3654_v59 = vshll.u32 %v3299_v34, 16 }
 0x272   : > { %11123 = vst [vmem:[#allocation15_spill] sm:$0xff] %v9809_v8  ;;  %v9817_v54 = vadd.f32 %v7194_v63, %v7193_v44  ;;  %v9819_v2 = vadd.f32 %v7158_v12, %v7157_v52  ;;  %v3664_v44 = vshrl.u32 %v3300_v24, 16  ;;  %v9827_v63 = vcombine.low %v3591_v19, %v3601_v60  ;;  %v3301_v19 = vld [vmem:[#allocation2 + $0x160] sm:$0x11] }
 0x273   : > { %4116 = vmatmul.mubr.bf16.gmra.mrb[160].mxu0 %v9807_v10  ;;  %4414 = vmatmul.mubr.bf16.gmra.mrb[136].mxu1 %v9722_v48  ;;  %v3644_v12 = vrot.slane %v3643_v7, 4  ;;  %v3648_v20 = vrot.slane %v3646_v3, 5  ;;  %v3653_v45 = vrot.slane %v3651_v47, 4  ;;  %v3302_v7 = vld [vmem:[#allocation2 + $0x168] sm:$0xff]  ;;  %v3303_v3 = vld [vmem:[#allocation2 + $0x170] sm:$0xff]  ;;  %v3639_v47 = vsel %vm9504_vm3, %v3634_v41, %v3638_v17 }
 0x274   : > { %11124 = vst [vmem:[#allocation16_spill] sm:$0xff] %v9817_v54  ;;  %4123 = vmatprep.mubr.bf16.mxu0 %v9813_v57  ;;  %4421 = vmatprep.mubr.bf16.mxu1 %v9728_v33  ;;  %v3656_v54 = vrot.slane %v3654_v59, 5  ;;  %v3666_v24 = vrot.slane %v3664_v44, 4  ;;  %v3688_v44 = vshrl.u32 %v3303_v3, 16  ;;  %v9849_v41 = vcombine.low %v3615_v37, %v3625_v38 }
 0x276   : > { %v7196_v30 = vpop.f32.mrb[32].mxu1  ;;  %v7236_v52 = vpop.f32.mrb[56].mxu0  ;;  %v3657_v59 = vor.u32 %v3656_v54, %v3653_v45 }
 0x277   : > { %v7197_v29 = vpop.f32.mrb[33].mxu1  ;;  %v7237_v32 = vpop.f32.mrb[57].mxu0 }
 0x278   : > { %v9831_v34 = vadd.f32 %v7197_v29, %v7196_v30  ;;  %v7238_v8 = vadd.f32 %v7237_v32, %v7236_v52  ;;  %v7199_v48 = vpop.f32.mrb[34].mxu1  ;;  %v7239_v33 = vpop.f32.mrb[58].mxu0 }
 0x279   : > { %v7200_v58 = vpop.f32.mrb[35].mxu1  ;;  %v7240_v62 = vpop.f32.mrb[59].mxu0 }
 0x27a   : > { %11125 = vst [vmem:[#allocation17_spill] sm:$0xff] %v9831_v34  ;;  %v9834_v60 = vadd.f32 %v7238_v8, %v9653_v22  ;;  %v9836_v42 = vadd.f32 %v7200_v58, %v7199_v48  ;;  %v7241_v31 = vadd.f32 %v7240_v62, %v7239_v33  ;;  %v3649_v62 = vsel %vm9504_vm3, %v3644_v12, %v3648_v20 }
 0x27b   : > { %4124 = vmatmul.mubr.bf16.gmra.mrb[164].mxu0 %v9827_v63  ;;  %4422 = vmatmul.mubr.bf16.gmra.mrb[140].mxu1 %v9759_v11  ;;  %v3667_v22 = vor.u32 %v3666_v24, %v3662_v6  ;;  %v3670_v58 = vshll.u32 %v3301_v19, 16  ;;  %v3675_v48 = vshrl.u32 %v3302_v7, 16  ;;  %v3678_v33 = vshll.u32 %v3302_v7, 16 }
 0x27c   : > { %11126 = vst [vmem:[#allocation18_spill] sm:$0xff] %v9836_v42  ;;  %v9843_v27 = vadd.f32 %v7241_v31, %v9660_v43  ;;  %4131 = vmatprep.mubr.bf16.mxu0 %v9829_v39  ;;  %4429 = vmatprep.mubr.bf16.mxu1 %v9763_v28  ;;  %v3684_v8 = vshll.u32 %v3303_v3, 16  ;;  %v9851_v43 = vcombine.high %v3639_v47, %v3649_v62  ;;  %v3658_v31 = vrot.slane %v3657_v59, 4  ;;  %v3304_v59 = vld [vmem:[#allocation2 + $0x178] sm:$0x11] }
 0x27d   : > { %v3668_v20 = vrot.slane %v3667_v22, 4  ;;  %v3672_v24 = vrot.slane %v3670_v58, 5  ;;  %v3677_v42 = vrot.slane %v3675_v48, 4  ;;  %v3680_v3 = vrot.slane %v3678_v33, 5 }
 0x27e   : > { %v7202_v30 = vpop.f32.mrb[36].mxu1  ;;  %v7242_v52 = vpop.f32.mrb[60].mxu0  ;;  %v3686_v34 = vrot.slane %v3684_v8, 5  ;;  %v3690_v28 = vrot.slane %v3688_v44, 4  ;;  %v3663_v58 = vsel %vm9504_vm3, %v3658_v31, %v3662_v6  ;;  %v3694_v8 = vshll.u32 %v3304_v59, 16 }
 0x27f   : > { %v7203_v17 = vpop.f32.mrb[37].mxu1  ;;  %v7243_v54 = vpop.f32.mrb[61].mxu0  ;;  %v3681_v48 = vor.u32 %v3680_v3, %v3677_v42 }
 0x280   : > { %v9853_v29 = vadd.f32 %v7203_v17, %v7202_v30  ;;  %v7244_v32 = vadd.f32 %v7243_v54, %v7242_v52  ;;  %v7205_v45 = vpop.f32.mrb[38].mxu1  ;;  %v7245_v12 = vpop.f32.mrb[62].mxu0  ;;  %v3691_v33 = vor.u32 %v3690_v28, %v3686_v34  ;;  %v9871_v54 = vcombine.low %v3639_v47, %v3649_v62 }
 0x281   : > { %v7206_v19 = vpop.f32.mrb[39].mxu1  ;;  %v7246_v7 = vpop.f32.mrb[63].mxu0  ;;  %v3696_v42 = vrot.slane %v3694_v8, 5 }
 0x282   : > { %v9856_v11 = vadd.f32 %v7244_v32, %v9693_v26  ;;  %v9858_v37 = vadd.f32 %v7206_v19, %v7205_v45  ;;  %v7247_v38 = vadd.f32 %v7246_v7, %v7245_v12  ;;  %v3673_v26 = vsel %vm9504_vm3, %v3668_v20, %v3672_v24 }
 0x283   : > { %4132 = vmatmul.mubr.bf16.gmra.mrb[168].mxu0 %v9849_v41  ;;  %4430 = vmatmul.mubr.bf16.gmra.mrb[144].mxu1 %v9787_v49  ;;  %v9875_v19 = vcombine.high %v3663_v58, %v3673_v26  ;;  %v3682_v7 = vrot.slane %v3681_v48, 4  ;;  %v3692_v20 = vrot.slane %v3691_v33, 4  ;;  %v9893_v8 = vcombine.low %v3663_v58, %v3673_v26 }
 0x284   : > { %v9863_v22 = vadd.f32 %v7247_v38, %v9701_v1  ;;  %4139 = vmatprep.mubr.bf16.mxu0 %v9851_v43  ;;  %4437 = vmatprep.mubr.bf16.mxu1 %v9789_v9 }
 0x285   : > { %v3687_v62 = vsel %vm9504_vm3, %v3682_v7, %v3686_v34 }
 0x286   : > { %v7208_v44 = vpop.f32.mrb[40].mxu1  ;;  %v7248_v30 = vpop.f32.mrb[64].mxu0 }
 0x287   : > { %v7209_v52 = vpop.f32.mrb[41].mxu1  ;;  %v7249_v17 = vpop.f32.mrb[65].mxu0 }
 0x288   : > { %v9873_v1 = vadd.f32 %v7209_v52, %v7208_v44  ;;  %v7250_v32 = vadd.f32 %v7249_v17, %v7248_v30  ;;  %v7211_v45 = vpop.f32.mrb[42].mxu1  ;;  %v7251_v12 = vpop.f32.mrb[66].mxu0 }
 0x289   : > { %v7212_v6 = vpop.f32.mrb[43].mxu1  ;;  %v7252_v31 = vpop.f32.mrb[67].mxu0 }
 0x28a   : > { %v9878_v28 = vadd.f32 %v7250_v32, %v9730_v35  ;;  %v9880_v24 = vadd.f32 %v7212_v6, %v7211_v45  ;;  %v7253_v3 = vadd.f32 %v7252_v31, %v7251_v12  ;;  %v3697_v35 = vsel %vm9504_vm3, %v3692_v20, %v3696_v42 }
 0x28b   : > { %4140 = vmatmul.mubr.bf16.gmra.mrb[172].mxu0 %v9871_v54  ;;  %4438 = vmatmul.mubr.bf16.gmra.mrb[148].mxu1 %v9807_v10  ;;  %v9897_v17 = vcombine.high %v3687_v62, %v3697_v35 }
 0x28c   : > { %v9885_v47 = vadd.f32 %v7253_v3, %v9742_v36  ;;  %4147 = vmatprep.mubr.bf16.mxu0 %v9875_v19  ;;  %4445 = vmatprep.mubr.bf16.mxu1 %v9813_v57 }
 0x28e   : > { %v7214_v38 = vpop.f32.mrb[44].mxu1  ;;  %v7254_v59 = vpop.f32.mrb[68].mxu0 }
 0x28f   : > { %v7215_v48 = vpop.f32.mrb[45].mxu1  ;;  %v7255_v33 = vpop.f32.mrb[69].mxu0 }
 0x290   : > { %v9895_v44 = vadd.f32 %v7215_v48, %v7214_v38  ;;  %v7256_v36 = vadd.f32 %v7255_v33, %v7254_v59  ;;  %v7217_v30 = vpop.f32.mrb[46].mxu1  ;;  %v7257_v52 = vpop.f32.mrb[70].mxu0 }
 0x291   : > { %v7218_v32 = vpop.f32.mrb[47].mxu1  ;;  %v7258_v45 = vpop.f32.mrb[71].mxu0 }
 0x292   : > { %v9900_v34 = vadd.f32 %v7256_v36, %v9770_v15  ;;  %v9902_v12 = vadd.f32 %v7218_v32, %v7217_v30  ;;  %v7259_v6 = vadd.f32 %v7258_v45, %v7257_v52  ;;  %v9911_v15 = vcombine.low %v3687_v62, %v3697_v35  ;;  %v3305_v36 = vld [vmem:[#allocation2 + $0x180] sm:$0xff]  ;;  %v3306_v45 = vld [vmem:[#allocation2 + $0x188] sm:$0xff] }
 0x293   : > { %4148 = vmatmul.mubr.bf16.gmra.mrb[176].mxu0 %v9893_v8  ;;  %4446 = vmatmul.mubr.bf16.gmra.mrb[152].mxu1 %v9827_v63 }
 0x294   : > { %v9907_v58 = vadd.f32 %v7259_v6, %v9774_v5  ;;  %4155 = vmatprep.mubr.bf16.mxu0 %v9897_v17  ;;  %4453 = vmatprep.mubr.bf16.mxu1 %v9829_v39  ;;  %v3708_v6 = vshll.u32 %v3306_v45, 16 }
 0x296   : > { %v7260_v26 = vpop.f32.mrb[72].mxu0  ;;  %v7348_v31 = vpop.f32.mrb[48].mxu1 }
 0x297   : > { %v7261_v7 = vpop.f32.mrb[73].mxu0  ;;  %v7349_v20 = vpop.f32.mrb[49].mxu1 }
 0x298   : > { %v7262_v42 = vadd.f32 %v7261_v7, %v7260_v26  ;;  %v7350_v3 = vadd.f32 %v7349_v20, %v7348_v31  ;;  %v7263_v38 = vpop.f32.mrb[74].mxu0  ;;  %v7351_v59 = vpop.f32.mrb[50].mxu1  ;;  %v3712_v26 = vshrl.u32 %v3306_v45, 16 }
 0x299   : > { %v7264_v48 = vpop.f32.mrb[75].mxu0  ;;  %v7352_v33 = vpop.f32.mrb[51].mxu1 }
 0x29a   : > { %v9914_v5 = vadd.f32 %v7262_v42, %v9793_v21  ;;  %v9917_v30 = vadd.f32 %v7350_v3, %v9834_v60  ;;  %v7265_v52 = vadd.f32 %v7264_v48, %v7263_v38  ;;  %v7353_v32 = vadd.f32 %v7352_v33, %v7351_v59 }
 0x29b   : > { %4156 = vmatmul.mubr.bf16.gmra.mrb[180].mxu0 %v9911_v15  ;;  %4454 = vmatmul.mubr.bf16.gmra.mrb[156].mxu1 %v9849_v41  ;;  %v3699_v21 = vshrl.u32 %v3305_v36, 16  ;;  %v3702_v60 = vshll.u32 %v3305_v36, 16 }
 0x29c   : > { %v9922_v62 = vadd.f32 %v7265_v52, %v9797_v51  ;;  %v9925_v35 = vadd.f32 %v7353_v32, %v9843_v27  ;;  %4461 = vmatprep.mubr.bf16.mxu1 %v9851_v43  ;;  %4695 = vmatprep.mubr.bf16.mxu0 %v9546_v61  ;;  %v3710_v32 = vrot.slane %v3708_v6, 5  ;;  %v8359_v61 = vld [vmem:[%s11070_s6 + $0x280] sm:$0xff]  }
 0x29d   : > { %v3701_v48 = vrot.slane %v3699_v21, 4  ;;  %v3704_v52 = vrot.slane %v3702_v60, 5  ;;  %v8362_v21 = vld [vmem:[%s11070_s6 + $0x2c8] sm:$0xff]  }
 0x29e   : > { %11127 = vst [vmem:[#allocation19_spill] sm:$0xff] %v9925_v35  ;;  %v7266_v31 = vpop.f32.mrb[76].mxu0  ;;  %v7354_v7 = vpop.f32.mrb[52].mxu1  ;;  %v3714_v35 = vrot.slane %v3712_v26, 4 }
 0x29f   : > { %v7267_v20 = vpop.f32.mrb[77].mxu0  ;;  %v7355_v42 = vpop.f32.mrb[53].mxu1 }
 0x2a0   : > { %v7268_v3 = vadd.f32 %v7267_v20, %v7266_v31  ;;  %v7356_v38 = vadd.f32 %v7355_v42, %v7354_v7  ;;  %v7269_v59 = vpop.f32.mrb[78].mxu0  ;;  %v7357_v51 = vpop.f32.mrb[54].mxu1  ;;  %v3307_v20 = vld [vmem:[#allocation2 + $0x190] sm:$0x11]  ;;  %v3715_v6 = vor.u32 %v3714_v35, %v3710_v32  ;;  %v8363_v42 = vld [vmem:[%s11070_s6 + $0x288] sm:$0xff]  }
 0x2a1   : > { %v7270_v33 = vpop.f32.mrb[79].mxu0  ;;  %v7358_v27 = vpop.f32.mrb[55].mxu1  ;;  %v3718_v26 = vshll.u32 %v3307_v20, 16 }
 0x2a2   : > { %v9933_v36 = vadd.f32 %v7268_v3, %v9811_v56  ;;  %v9936_v45 = vadd.f32 %v7356_v38, %v9856_v11  ;;  %v7271_v31 = vadd.f32 %v7270_v33, %v7269_v59  ;;  %v7359_v7 = vadd.f32 %v7358_v27, %v7357_v51 }
 0x2a3   : > { %4462 = vmatmul.mubr.bf16.gmra.mrb[160].mxu1 %v9871_v54  ;;  %4696 = vmatmul.mubr.bf16.vlgmr.msra.gmra.mrb[184].mxu0 %v9568_v13  ;;  %v3705_v11 = vor.u32 %v3704_v52, %v3701_v48  ;;  %v3716_v52 = vrot.slane %v3715_v6, 4 }
 0x2a4   : > { %v9944_v60 = vadd.f32 %v7271_v31, %v9819_v2  ;;  %v9947_v56 = vadd.f32 %v7359_v7, %v9863_v22  ;;  %4469 = vmatprep.mubr.bf16.mxu1 %v9875_v19  ;;  %4703 = vmatprep.mubr.bf16.mxu0 %v9570_v55  ;;  %v8366_v2 = vld [vmem:[%s11070_s6 + $0x2d0] sm:$0xff]  }
 0x2a5   : > { %7893 = vmatpush3.bf16.msra.mxu0 %v8359_v61  ;;  %v3706_v27 = vrot.slane %v3705_v11, 4  ;;  %v3720_v61 = vrot.slane %v3718_v26, 5  ;;  %v8367_v31 = vld [vmem:[%s11070_s6 + $0x290] sm:$0xff]   ;;  %v8370_v11 = vld [vmem:[%s11070_s6 + $0x2d8] sm:$0xff]  }
 0x2a6   : > { %v7272_v3 = vpop.f32.mrb[80].mxu0  ;;  %v7360_v13 = vpop.f32.mrb[56].mxu1  ;;  %7894 = vmatprep.subr.bf16.mxu0 %v8362_v21 }
 0x2a7   : > { %v7273_v22 = vpop.f32.mrb[81].mxu0  ;;  %v7361_v38 = vpop.f32.mrb[57].mxu1  ;;  %v3721_v26 = vsel %vm9504_vm3, %v3716_v52, %v3720_v61  ;;  %v8403_v61 = vld [vmem:[#allocation2 + $0x10] sm:$0x11] }
 0x2a8   : > { %v7274_v59 = vadd.f32 %v7273_v22, %v7272_v3  ;;  %v7362_v51 = vadd.f32 %v7361_v38, %v7360_v13  ;;  %v7275_v55 = vpop.f32.mrb[82].mxu0  ;;  %v7363_v48 = vpop.f32.mrb[58].mxu1 }
 0x2a9   : > { %v7276_v35 = vpop.f32.mrb[83].mxu0  ;;  %v7364_v33 = vpop.f32.mrb[59].mxu1  ;;  %7895 = vmatpush3.bf16.msra.mxu0 %v8363_v42  ;;  %v8402_v42 = vld [vmem:[#allocation2 + $0x8] sm:$0xff] }
 0x2aa   : > { %v9961_v7 = vadd.f32 %v7274_v59, %v9651_v4  ;;  %v9964_v20 = vadd.f32 %v7362_v51, %v9878_v28  ;;  %v7277_v21 = vadd.f32 %v7276_v35, %v7275_v55  ;;  %v7365_v3 = vadd.f32 %v7364_v33, %v7363_v48  ;;  %7896 = vmatprep.subr.bf16.mxu0 %v8366_v2  ;;  %v4856_v2 = vld [vmem:[#allocation2] sm:$0xee] }
 0x2ab   : > { %4470 = vmatmul.mubr.bf16.gmra.mrb[164].mxu1 %v9893_v8  ;;  %4704 = vmatmul.mubr.bf16.gmra.mrb[188].mxu0 %v9592_v14  ;;  %v3711_v28 = vsel %vm9504_vm3, %v3706_v27, %v3710_v32  ;;  %v4933_v13 = vrot.slane %v8402_v42, 5  ;;  %v8371_v14 = vld [vmem:[%s11070_s6 + $0x298] sm:$0xff]   ;;  %v6853_v27 = vrot.slane %v4856_v2, 9 }
 0x2ac   : > { %v9972_v6 = vadd.f32 %v7277_v21, %v9658_v23  ;;  %v9975_v4 = vadd.f32 %v7365_v3, %v9885_v47  ;;  %4477 = vmatprep.mubr.bf16.mxu1 %v9897_v17  ;;  %4711 = vmatprep.mubr.bf16.mxu0 %v9594_v25  ;;  %v8374_v25 = vld [vmem:[%s11070_s6 + $0x2e0] sm:$0xff]   ;;  %v9989_v48 = vcombine.high %v3711_v28, %v3721_v26 }
 0x2ad   : > { %7897 = vmatpush3.bf16.msra.mxu0 %v8367_v31  ;;  %v4935_v52 = vrot.slane %v4933_v13, 4  ;;  %v4936_v31 = vrot.slane %v8403_v61, 5  ;;  %v8375_v21 = vld [vmem:[%s11070_s6 + $0x2a0] sm:$0xff]   ;;  %v10021_v2 = vsel %vm10002_vm6, %v6853_v27, %v4933_v13 }
 0x2ae   : > { %v7278_v23 = vpop.f32.mrb[84].mxu0  ;;  %v7366_v47 = vpop.f32.mrb[60].mxu1  ;;  %7898 = vmatprep.subr.bf16.mxu0 %v8370_v11 }
 0x2af   : > { %v7279_v22 = vpop.f32.mrb[85].mxu0  ;;  %v7367_v32 = vpop.f32.mrb[61].mxu1 }
 0x2b0   : > { %v7280_v38 = vadd.f32 %v7279_v22, %v7278_v23  ;;  %v7368_v59 = vadd.f32 %v7367_v32, %v7366_v47  ;;  %v7281_v51 = vpop.f32.mrb[86].mxu0  ;;  %v7369_v55 = vpop.f32.mrb[62].mxu1  ;;  %v8404_v22 = vld [vmem:[#allocation2 + $0x20] sm:$0xff] }
 0x2b1   : > { %v7282_v35 = vpop.f32.mrb[87].mxu0  ;;  %v7370_v33 = vpop.f32.mrb[63].mxu1  ;;  %7899 = vmatpush3.bf16.msra.mxu0 %v8371_v14  ;;  %v8378_v14 = vld [vmem:[%s11070_s6 + $0x2e8] sm:$0xff]  }
 0x2b2   : > { %v9995_v3 = vadd.f32 %v7280_v38, %v9691_v50  ;;  %v9998_v11 = vadd.f32 %v7368_v59, %v9900_v34  ;;  %v7283_v42 = vadd.f32 %v7282_v35, %v7281_v51  ;;  %v7371_v23 = vadd.f32 %v7370_v33, %v7369_v55  ;;  %7900 = vmatprep.subr.bf16.mxu0 %v8374_v25  ;;  %v4857_v38 = vld [vmem:[#allocation2 + $0x18] sm:$0xee] }
 0x2b3   : > { %4478 = vmatmul.mubr.bf16.gmra.mrb[168].mxu1 %v9911_v15  ;;  %4712 = vmatmul.mubr.bf16.gmra.mrb[192].mxu0 %v9612_v16  ;;  %v10025_v25 = vsel %vm10002_vm6, %v4935_v52, %v4936_v31  ;;  %v4940_v16 = vrot.slane %v8404_v22, 5  ;;  %v10033_v51 = vcombine.low %v3711_v28, %v3721_v26  ;;  %v8383_v22 = vld [vmem:[%s11070_s6 + $0x2b0] sm:$0xff]  }
 0x2b4   : > { %v10012_v50 = vadd.f32 %v7283_v42, %v9699_v40  ;;  %v10015_v34 = vadd.f32 %v7371_v23, %v9907_v58  ;;  %4485 = vmatprep.mubr.bf16.mxu1 %v9989_v48  ;;  %4719 = vmatprep.mubr.bf16.mxu0 %v9617_v53  ;;  %v8379_v40 = vld [vmem:[%s11070_s6 + $0x2a8] sm:$0xff]   ;;  %v8382_v53 = vld [vmem:[%s11070_s6 + $0x2f0] sm:$0xff]   ;;  %v6904_v52 = vcombine.high %v10021_v2, %v10025_v25 }
 0x2b5   : > { %7901 = vmatpush3.bf16.msra.mxu0 %v8375_v21  ;;  %v6854_v21 = vrot.slane %v4857_v38, 9  ;;  %v4942_v42 = vrot.slane %v4940_v16, 4  ;;  %v8405_v23 = vld [vmem:[#allocation2 + $0x28] sm:$0x11]  ;;  %v8384_v38 = vld [vmem:[%s11070_s6 + $0x2f8] sm:$0xff]  }
 0x2b6   : > { %11130 = vst [vmem:[#allocation20_spill] sm:$0xff] %v10015_v34  ;;  %v7284_v58 = vpop.f32.mrb[88].mxu0  ;;  %v7372_v32 = vpop.f32.mrb[64].mxu1  ;;  %7902 = vmatprep.subr.bf16.mxu0 %v8378_v14  ;;  %v4943_v14 = vrot.slane %v8405_v23, 5  ;;  %v11140_v34 = vld [vmem:[#allocation5_spill] sm:$0xff] }
 0x2b7   : > { %v7285_v13 = vpop.f32.mrb[89].mxu0  ;;  %v7373_v59 = vpop.f32.mrb[65].mxu1 }
 0x2b8   : > { %v7286_v55 = vadd.f32 %v7285_v13, %v7284_v58  ;;  %v7374_v35 = vadd.f32 %v7373_v59, %v7372_v32  ;;  %v7287_v33 = vpop.f32.mrb[90].mxu0  ;;  %v7375_v27 = vpop.f32.mrb[66].mxu1  ;;  %v11134_v59 = vld [vmem:[#allocation3_spill] sm:$0xff] }
 0x2b9   : > { %v7288_v61 = vpop.f32.mrb[91].mxu0  ;;  %v7376_v31 = vpop.f32.mrb[67].mxu1  ;;  %7903 = vmatpush3.bf16.msra.mxu0 %v8379_v40  ;;  %v11132_v40 = vld [vmem:[#allocation8_spill] sm:$0xff] }
 0x2ba   : > { %v10041_v28 = vadd.f32 %v7286_v55, %v9726_v18  ;;  %v10044_v26 = vadd.f32 %v7374_v35, %v9914_v5  ;;  %v7289_v58 = vadd.f32 %v7288_v61, %v7287_v33  ;;  %v7377_v32 = vadd.f32 %v7376_v31, %v7375_v27  ;;  %7904 = vmatprep.subr.bf16.mxu0 %v8382_v53  ;;  %v8406_v5 = vld [vmem:[#allocation2 + $0x38] sm:$0xff] }
 0x2bb   : > { %4486 = vmatmul.mubr.bf16.gmra.mrb[172].mxu1 %v10033_v51  ;;  %4720 = vmatmul.mubr.bf16.gmra.mrb[196].mxu0 %v9643_v46  ;;  %v4947_v55 = vrot.slane %v8406_v5, 5  ;;  %v8385_v53 = vld [vmem:[%s11070_s6 + $0x2b8] sm:$0xff]   ;;  %v4941_v46 = vsel %vm10002_vm6, %v6854_v21, %v4940_v16  ;;  %v4944_v27 = vsel %vm10002_vm6, %v4942_v42, %v4943_v14 }
 0x2bc   : > { %11131 = vst [vmem:[#allocation21_spill] sm:$0xff] %v10044_v26  ;;  %v10052_v13 = vadd.f32 %v7289_v58, %v11132_v40  ;;  %v10055_v18 = vadd.f32 %v7377_v32, %v9922_v62  ;;  %4727 = vmatprep.mubr.bf16.mxu0 %v11134_v59  ;;  %5346 = vmatprep.mubr.bf16.mxu1 %v6904_v52  ;;  %v4858_v62 = vld [vmem:[#allocation2 + $0x30] sm:$0xee]  ;;  %v8361_v40 = vld [vmem:[%s11070_s6 + $0x400] sm:$0xff]  }
 0x2bd   : > { %7905 = vmatpush3.bf16.msra.mxu0 %v8383_v22  ;;  %v6903_v52 = vcombine.low %v10021_v2, %v10025_v25  ;;  %v10070_v21 = vcombine.high %v4941_v46, %v4944_v27  ;;  %v6855_v42 = vrot.slane %v4858_v62, 9  ;;  %v4949_v14 = vrot.slane %v4947_v55, 4  ;;  %v8364_v2 = vld [vmem:[%s11070_s6 + $0x448] sm:$0xff]   ;;  %v11135_v25 = vld [vmem:[#allocation11_spill] sm:$0xff]  ;;  %v11138_v62 = vld [vmem:[#allocation12_spill] sm:$0xff] }
 0x2be   : > { %11133 = vst [vmem:[#allocation8_spill] sm:$0xff] %v10055_v18  ;;  %v7290_v35 = vpop.f32.mrb[92].mxu0  ;;  %v7378_v33 = vpop.f32.mrb[68].mxu1  ;;  %7906 = vmatprep.subr.bf16.mxu0 %v8384_v38  ;;  %v8407_v38 = vld [vmem:[#allocation2 + $0x40] sm:$0x11]  ;;  %v11137_v18 = vld [vmem:[#allocation4_spill] sm:$0xff] }
 0x2bf   : > { %v7291_v61 = vpop.f32.mrb[93].mxu0  ;;  %v7379_v31 = vpop.f32.mrb[69].mxu1  ;;  %v4950_v5 = vrot.slane %v8407_v38, 5 }
 0x2c0   : > { %v7292_v23 = vadd.f32 %v7291_v61, %v7290_v35  ;;  %v7380_v22 = vadd.f32 %v7379_v31, %v7378_v33  ;;  %v7293_v58 = vpop.f32.mrb[94].mxu0  ;;  %v7381_v32 = vpop.f32.mrb[70].mxu1 }
 0x2c1   : > { %v7294_v59 = vpop.f32.mrb[95].mxu0  ;;  %v7382_v16 = vpop.f32.mrb[71].mxu1  ;;  %7907 = vmatpush3.bf16.msra.mxu0 %v8385_v53  ;;  %v8365_v53 = vld [vmem:[%s11070_s6 + $0x408] sm:$0xff]  }
 0x2c2   : > { %v10076_v35 = vadd.f32 %v7292_v23, %v11135_v25  ;;  %v10079_v33 = vadd.f32 %v7380_v22, %v9933_v36  ;;  %v7295_v61 = vadd.f32 %v7294_v59, %v7293_v58  ;;  %v7383_v31 = vadd.f32 %v7382_v16, %v7381_v32  ;;  %v4859_v58 = vld [vmem:[#allocation2 + $0x48] sm:$0xee] }
 0x2c3   : > { %4728 = vmatmul.mubr.bf16.gmra.mrb[200].mxu0 %v11137_v18  ;;  %5347 = vmatmul.mubr.bf16.vlgmr.msra.gmra.mrb[176].mxu1 %v6903_v52  ;;  %v4948_v36 = vsel %vm10002_vm6, %v6855_v42, %v4947_v55  ;;  %v4951_v18 = vsel %vm10002_vm6, %v4949_v14, %v4950_v5  ;;  %v8408_v52 = vld [vmem:[#allocation2 + $0x50] sm:$0xff]  ;;  %v10100_v59 = vcombine.low %v4941_v46, %v4944_v27  ;;  %v11143_v46 = vld [vmem:[#allocation13_spill] sm:$0xff] }
 0x2c4   : > { %11136 = vst [vmem:[#allocation3_spill] sm:$0xff] %v10079_v33  ;;  %v10083_v26 = vadd.f32 %v7295_v61, %v11138_v62  ;;  %v10086_v38 = vadd.f32 %v7383_v31, %v9944_v60  ;;  %8005 = vmatpush3.bf16.msra.mxu1 %v8361_v40  ;;  %4735 = vmatprep.mubr.bf16.mxu0 %v11140_v34  ;;  %v4954_v23 = vrot.slane %v8408_v52, 5  ;;  %v8368_v60 = vld [vmem:[%s11070_s6 + $0x450] sm:$0xff]   ;;  %v8409_v62 = vld [vmem:[#allocation2 + $0x58] sm:$0x11] }
 0x2c5   : > { %5354 = vmatprep.mubr.bf16.mxu1 %v10070_v21  ;;  %8006 = vmatprep.subr.bf16.mxu1 %v8364_v2  ;;  %11141 = vst [vmem:[#allocation4_spill] sm:$0xff] %v10100_v59  ;;  %v10102_v61 = vcombine.high %v4948_v36, %v4951_v18  ;;  %v6856_v2 = vrot.slane %v4859_v58, 9  ;;  %v4957_v52 = vrot.slane %v8409_v62, 5  ;;  %v11145_v58 = vld [vmem:[#allocation6_spill] sm:$0xff]  ;;  %v11151_v33 = vld [vmem:[#allocation15_spill] sm:$0xff] }
 0x2c6   : > { %11139 = vst [vmem:[#allocation11_spill] sm:$0xff] %v10086_v38  ;;  %v7296_v34 = vpop.f32.mrb[96].mxu0  ;;  %v7384_v22 = vpop.f32.mrb[72].mxu1  ;;  %v4956_v31 = vrot.slane %v4954_v23, 4  ;;  %v8369_v38 = vld [vmem:[%s11070_s6 + $0x410] sm:$0xff]  }
 0x2c7   : > { %v7297_v32 = vpop.f32.mrb[97].mxu0  ;;  %v7385_v40 = vpop.f32.mrb[73].mxu1  ;;  %11142 = vst [vmem:[#allocation12_spill] sm:$0xff] %v10102_v61 }
 0x2c8   : > { %v7298_v16 = vadd.f32 %v7297_v32, %v7296_v34  ;;  %v7386_v25 = vadd.f32 %v7385_v40, %v7384_v22  ;;  %v7299_v55 = vpop.f32.mrb[98].mxu0  ;;  %v7387_v42 = vpop.f32.mrb[74].mxu1  ;;  %8007 = vmatpush3.bf16.msra.mxu1 %v8365_v53  ;;  %v8372_v53 = vld [vmem:[%s11070_s6 + $0x458] sm:$0xff]  }
 0x2c9   : > { %v7300_v14 = vpop.f32.mrb[99].mxu0  ;;  %v7388_v5 = vpop.f32.mrb[75].mxu1  ;;  %8008 = vmatprep.subr.bf16.mxu1 %v8368_v60  ;;  %v11146_v60 = vld [vmem:[#allocation14_spill] sm:$0xff] }
 0x2ca   : > { %v10108_v27 = vadd.f32 %v7298_v16, %v11143_v46  ;;  %v10111_v34 = vadd.f32 %v7386_v25, %v9961_v7  ;;  %v7301_v22 = vadd.f32 %v7300_v14, %v7299_v55  ;;  %v7389_v32 = vadd.f32 %v7388_v5, %v7387_v42  ;;  %v11148_v16 = vld [vmem:[#allocation7_spill] sm:$0xff]  ;;  %v8410_v55 = vld [vmem:[#allocation2 + $0x68] sm:$0xff]  ;;  %v8373_v14 = vld [vmem:[%s11070_s6 + $0x418] sm:$0xff]  }
 0x2cb   : > { %4736 = vmatmul.mubr.bf16.gmra.mrb[204].mxu0 %v11145_v58  ;;  %5355 = vmatmul.mubr.bf16.gmra.mrb[180].mxu1 %v10100_v59  ;;  %v4955_v7 = vsel %vm10002_vm6, %v6856_v2, %v4954_v23  ;;  %v4958_v25 = vsel %vm10002_vm6, %v4956_v31, %v4957_v52  ;;  %v4961_v42 = vrot.slane %v8410_v55, 5  ;;  %v4860_v46 = vld [vmem:[#allocation2 + $0x60] sm:$0xee]  ;;  %v10136_v2 = vcombine.low %v4948_v36, %v4951_v18 }
 0x2cc   : > { %11144 = vst [vmem:[#allocation5_spill] sm:$0xff] %v10111_v34  ;;  %v10119_v40 = vadd.f32 %v7301_v22, %v11146_v60  ;;  %v10122_v62 = vadd.f32 %v7389_v32, %v9972_v6  ;;  %4743 = vmatprep.mubr.bf16.mxu0 %v11148_v16  ;;  %5362 = vmatprep.mubr.bf16.mxu1 %v10102_v61  ;;  %v8376_v22 = vld [vmem:[%s11070_s6 + $0x460] sm:$0xff]   ;;  %v8411_v61 = vld [vmem:[#allocation2 + $0x70] sm:$0x11] }
 0x2cd   : > { %8009 = vmatpush3.bf16.msra.mxu1 %v8369_v38  ;;  %11149 = vst [vmem:[#allocation6_spill] sm:$0xff] %v10136_v2  ;;  %v10138_v60 = vcombine.high %v4955_v7, %v4958_v25  ;;  %v4963_v34 = vrot.slane %v4961_v42, 4  ;;  %v8377_v59 = vld [vmem:[%s11070_s6 + $0x420] sm:$0xff]  }
 0x2ce   : > { %11147 = vst [vmem:[#allocation13_spill] sm:$0xff] %v10122_v62  ;;  %v7302_v5 = vpop.f32.mrb[100].mxu0  ;;  %v7390_v6 = vpop.f32.mrb[76].mxu1  ;;  %8010 = vmatprep.subr.bf16.mxu1 %v8372_v53  ;;  %v6857_v62 = vrot.slane %v4860_v46, 9  ;;  %v4964_v53 = vrot.slane %v8411_v61, 5  ;;  %v8380_v46 = vld [vmem:[%s11070_s6 + $0x468] sm:$0xff]  }
 0x2cf   : > { %v7303_v32 = vpop.f32.mrb[101].mxu0  ;;  %v7391_v23 = vpop.f32.mrb[77].mxu1  ;;  %11150 = vst [vmem:[#allocation14_spill] sm:$0xff] %v10138_v60  ;;  %v11154_v61 = vld [vmem:[#allocation16_spill] sm:$0xff] }
 0x2d0   : > { %v7304_v31 = vadd.f32 %v7303_v32, %v7302_v5  ;;  %v7392_v52 = vadd.f32 %v7391_v23, %v7390_v6  ;;  %v7305_v58 = vpop.f32.mrb[102].mxu0  ;;  %v7393_v38 = vpop.f32.mrb[78].mxu1  ;;  %v11153_v32 = vld [vmem:[#allocation9_spill] sm:$0xff]  ;;  %v11156_v23 = vld [vmem:[#allocation10_spill] sm:$0xff] }
 0x2d1   : > { %v7306_v16 = vpop.f32.mrb[103].mxu0  ;;  %v7394_v55 = vpop.f32.mrb[79].mxu1  ;;  %8011 = vmatpush3.bf16.msra.mxu1 %v8373_v14 }
 0x2d2   : > { %v10144_v36 = vadd.f32 %v7304_v31, %v11151_v33  ;;  %v10147_v18 = vadd.f32 %v7392_v52, %v9995_v3  ;;  %v7307_v5 = vadd.f32 %v7306_v16, %v7305_v58  ;;  %v7395_v6 = vadd.f32 %v7394_v55, %v7393_v38  ;;  %8012 = vmatprep.subr.bf16.mxu1 %v8376_v22  ;;  %v8412_v31 = vld [vmem:[#allocation2 + $0x80] sm:$0xff]  ;;  %v8381_v58 = vld [vmem:[%s11070_s6 + $0x428] sm:$0xff]   ;;  %v4861_v16 = vld [vmem:[#allocation2 + $0x78] sm:$0xee] }
 0x2d3   : > { %4744 = vmatmul.mubr.bf16.gmra.mrb[208].mxu0 %v11153_v32  ;;  %5363 = vmatmul.mubr.bf16.gmra.mrb[184].mxu1 %v10136_v2  ;;  %v4962_v3 = vsel %vm10002_vm6, %v6857_v62, %v4961_v42  ;;  %v4965_v22 = vsel %vm10002_vm6, %v4963_v34, %v4964_v53  ;;  %v4968_v52 = vrot.slane %v8412_v31, 5  ;;  %v8386_v55 = vld [vmem:[%s11070_s6 + $0x470] sm:$0xff]   ;;  %v10172_v42 = vcombine.low %v4955_v7, %v4958_v25  ;;  %v11157_v2 = vld [vmem:[#allocation17_spill] sm:$0xff] }
 0x2d4   : > { %11152 = vst [vmem:[#allocation7_spill] sm:$0xff] %v10147_v18  ;;  %v10155_v14 = vadd.f32 %v7307_v5, %v11154_v61  ;;  %v10158_v33 = vadd.f32 %v7395_v6, %v10012_v50  ;;  %4751 = vmatprep.mubr.bf16.mxu0 %v11156_v23  ;;  %5370 = vmatprep.mubr.bf16.mxu1 %v10138_v60  ;;  %v6858_v31 = vrot.slane %v4861_v16, 9  ;;  %v8413_v18 = vld [vmem:[#allocation2 + $0x88] sm:$0x11]  ;;  %v8387_v60 = vld [vmem:[%s11070_s6 + $0x430] sm:$0xff]   ;;  %v8388_v16 = vld [vmem:[%s11070_s6 + $0x478] sm:$0xff]  }
 0x2d5   : > { %8013 = vmatpush3.bf16.msra.mxu1 %v8377_v59  ;;  %v10174_v32 = vcombine.high %v4962_v3, %v4965_v22 }
 0x2d6   : > { %11155 = vst [vmem:[#allocation15_spill] sm:$0xff] %v10158_v33  ;;  %v7308_v38 = vpop.f32.mrb[104].mxu0  ;;  %v7396_v50 = vpop.f32.mrb[80].mxu1  ;;  %8014 = vmatprep.subr.bf16.mxu1 %v8380_v46  ;;  %v4970_v33 = vrot.slane %v4968_v52, 4  ;;  %v4971_v46 = vrot.slane %v8413_v18, 5  ;;  %v11158_v18 = vld [vmem:[#allocation18_spill] sm:$0xff] }
 0x2d7   : > { %v7309_v5 = vpop.f32.mrb[105].mxu0  ;;  %v7397_v62 = vpop.f32.mrb[81].mxu1 }
 0x2d8   : > { %v7310_v34 = vadd.f32 %v7309_v5, %v7308_v38  ;;  %v7398_v53 = vadd.f32 %v7397_v62, %v7396_v50  ;;  %v7311_v6 = vpop.f32.mrb[106].mxu0  ;;  %v7399_v59 = vpop.f32.mrb[82].mxu1  ;;  %v8414_v5 = vld [vmem:[#allocation2 + $0x98] sm:$0xff] }
 0x2d9   : > { %v7312_v61 = vpop.f32.mrb[107].mxu0  ;;  %v7400_v23 = vpop.f32.mrb[83].mxu1  ;;  %8015 = vmatpush3.bf16.msra.mxu1 %v8381_v58  ;;  %v8389_v62 = vld [vmem:[%s11070_s6 + $0x438] sm:$0xff]  }
 0x2da   : > { %v10180_v7 = vadd.f32 %v7310_v34, %v11157_v2  ;;  %v10183_v25 = vadd.f32 %v7398_v53, %v10041_v28  ;;  %v7313_v38 = vadd.f32 %v7312_v61, %v7311_v6  ;;  %v7401_v50 = vadd.f32 %v7400_v23, %v7399_v59  ;;  %8016 = vmatprep.subr.bf16.mxu1 %v8386_v55  ;;  %v4862_v53 = vld [vmem:[#allocation2 + $0x90] sm:$0xee] }
 0x2db   : > { %4752 = vmatmul.mubr.bf16.gmra.mrb[212].mxu0 %v9787_v49  ;;  %5371 = vmatmul.mubr.bf16.gmra.mrb[188].mxu1 %v10172_v42  ;;  %v4969_v28 = vsel %vm10002_vm6, %v6858_v31, %v4968_v52  ;;  %v4972_v55 = vsel %vm10002_vm6, %v4970_v33, %v4971_v46  ;;  %v4975_v49 = vrot.slane %v8414_v5, 5  ;;  %v10205_v59 = vcombine.low %v4962_v3, %v4965_v22 }
 0x2dc   : > { %v10191_v58 = vadd.f32 %v7313_v38, %v11158_v18  ;;  %v10194_v2 = vadd.f32 %v7401_v50, %v10052_v13  ;;  %4759 = vmatprep.mubr.bf16.mxu0 %v9789_v9  ;;  %5378 = vmatprep.mubr.bf16.mxu1 %v10174_v32  ;;  %v10207_v33 = vcombine.high %v4969_v28, %v4972_v55  ;;  %v6859_v38 = vrot.slane %v4862_v53, 9  ;;  %v8415_v18 = vld [vmem:[#allocation2 + $0xa0] sm:$0x11] }
 0x2dd   : > { %8017 = vmatpush3.bf16.msra.mxu1 %v8387_v60  ;;  %v4977_v50 = vrot.slane %v4975_v49, 4  ;;  %v4978_v5 = vrot.slane %v8415_v18, 5 }
 0x2de   : > { %11159 = vst [vmem:[#allocation9_spill] sm:$0xff] %v10194_v2  ;;  %v7314_v34 = vpop.f32.mrb[108].mxu0  ;;  %v7402_v13 = vpop.f32.mrb[84].mxu1  ;;  %8018 = vmatprep.subr.bf16.mxu1 %v8388_v16 }
 0x2df   : > { %v7315_v9 = vpop.f32.mrb[109].mxu0  ;;  %v7403_v6 = vpop.f32.mrb[85].mxu1 }
 0x2e0   : > { %v7316_v61 = vadd.f32 %v7315_v9, %v7314_v34  ;;  %v7404_v52 = vadd.f32 %v7403_v6, %v7402_v13  ;;  %v7317_v23 = vpop.f32.mrb[110].mxu0  ;;  %v7405_v31 = vpop.f32.mrb[86].mxu1  ;;  %v4863_v6 = vld [vmem:[#allocation2 + $0xa8] sm:$0xee] }
 0x2e1   : > { %v7318_v46 = vpop.f32.mrb[111].mxu0  ;;  %v7406_v60 = vpop.f32.mrb[87].mxu1  ;;  %8019 = vmatpush3.bf16.msra.mxu1 %v8389_v62  ;;  %v8416_v62 = vld [vmem:[#allocation2 + $0xb0] sm:$0xff] }
 0x2e2   : > { %v10210_v2 = vadd.f32 %v7316_v61, %v9853_v29  ;;  %v10213_v16 = vadd.f32 %v7404_v52, %v10076_v35  ;;  %v7319_v3 = vadd.f32 %v7318_v46, %v7317_v23  ;;  %v7407_v22 = vadd.f32 %v7406_v60, %v7405_v31 }
 0x2e3   : > { %4760 = vmatmul.mubr.bf16.gmra.mrb[216].mxu0 %v9807_v10  ;;  %5379 = vmatmul.mubr.bf16.gmra.mrb[192].mxu1 %v10205_v59  ;;  %v4976_v29 = vsel %vm10002_vm6, %v6859_v38, %v4975_v49  ;;  %v4979_v35 = vsel %vm10002_vm6, %v4977_v50, %v4978_v5  ;;  %v4982_v10 = vrot.slane %v8416_v62, 5  ;;  %v10229_v52 = vcombine.low %v4969_v28, %v4972_v55  ;;  %v8417_v50 = vld [vmem:[#allocation2 + $0xb8] sm:$0x11] }
 0x2e4   : > { %v10218_v34 = vadd.f32 %v7319_v3, %v9858_v37  ;;  %v10221_v13 = vadd.f32 %v7407_v22, %v10083_v26  ;;  %4767 = vmatprep.mubr.bf16.mxu0 %v9813_v57  ;;  %5386 = vmatprep.mubr.bf16.mxu1 %v10207_v33  ;;  %v10231_v46 = vcombine.high %v4976_v29, %v4979_v35  ;;  %v6860_v38 = vrot.slane %v4863_v6, 9 }
 0x2e5   : > { %v4984_v18 = vrot.slane %v4982_v10, 4  ;;  %v4985_v5 = vrot.slane %v8417_v50, 5 }
 0x2e6   : > { %v7320_v53 = vpop.f32.mrb[112].mxu0  ;;  %v7408_v9 = vpop.f32.mrb[88].mxu1 }
 0x2e7   : > { %v7321_v37 = vpop.f32.mrb[113].mxu0  ;;  %v7409_v61 = vpop.f32.mrb[89].mxu1 }
 0x2e8   : > { %v7322_v26 = vadd.f32 %v7321_v37, %v7320_v53  ;;  %v7410_v23 = vadd.f32 %v7409_v61, %v7408_v9  ;;  %v7323_v57 = vpop.f32.mrb[114].mxu0  ;;  %v7411_v31 = vpop.f32.mrb[90].mxu1  ;;  %v8418_v9 = vld [vmem:[#allocation2 + $0xc8] sm:$0xff]  ;;  %v4864_v61 = vld [vmem:[#allocation2 + $0xc0] sm:$0xee] }
 0x2e9   : > { %v7324_v60 = vpop.f32.mrb[115].mxu0  ;;  %v7412_v49 = vpop.f32.mrb[91].mxu1 }
 0x2ea   : > { %v10234_v3 = vadd.f32 %v7322_v26, %v9873_v1  ;;  %v10237_v22 = vadd.f32 %v7410_v23, %v10108_v27  ;;  %v7325_v28 = vadd.f32 %v7324_v60, %v7323_v57  ;;  %v7413_v55 = vadd.f32 %v7412_v49, %v7411_v31 }
 0x2eb   : > { %4768 = vmatmul.mubr.bf16.gmra.mrb[220].mxu0 %v9827_v63  ;;  %5387 = vmatmul.mubr.bf16.gmra.mrb[196].mxu1 %v10229_v52  ;;  %v4983_v1 = vsel %vm10002_vm6, %v6860_v38, %v4982_v10  ;;  %v4986_v27 = vsel %vm10002_vm6, %v4984_v18, %v4985_v5  ;;  %v4989_v63 = vrot.slane %v8418_v9, 5  ;;  %v10253_v23 = vcombine.low %v4976_v29, %v4979_v35  ;;  %v8419_v18 = vld [vmem:[#allocation2 + $0xd0] sm:$0x11]  ;;  %v8420_v9 = vld [vmem:[#allocation2 + $0xe0] sm:$0xff] }
 0x2ec   : > { %v10242_v62 = vadd.f32 %v7325_v28, %v9880_v24  ;;  %v10245_v53 = vadd.f32 %v7413_v55, %v10119_v40  ;;  %4775 = vmatprep.mubr.bf16.mxu0 %v9829_v39  ;;  %5394 = vmatprep.mubr.bf16.mxu1 %v10231_v46  ;;  %v10255_v60 = vcombine.high %v4983_v1, %v4986_v27  ;;  %v6861_v38 = vrot.slane %v4864_v61, 9 }
 0x2ed   : > { %v4991_v50 = vrot.slane %v4989_v63, 4  ;;  %v4992_v5 = vrot.slane %v8419_v18, 5 }
 0x2ee   : > { %v7326_v6 = vpop.f32.mrb[116].mxu0  ;;  %v7414_v37 = vpop.f32.mrb[92].mxu1  ;;  %11160 = vst [vmem:[#allocation16_spill] sm:$0xff] %v10255_v60 }
 0x2ef   : > { %v7327_v24 = vpop.f32.mrb[117].mxu0  ;;  %v7415_v26 = vpop.f32.mrb[93].mxu1 }
 0x2f0   : > { %v7328_v40 = vadd.f32 %v7327_v24, %v7326_v6  ;;  %v7416_v57 = vadd.f32 %v7415_v26, %v7414_v37  ;;  %v7329_v39 = vpop.f32.mrb[118].mxu0  ;;  %v7417_v31 = vpop.f32.mrb[94].mxu1  ;;  %v4996_v6 = vrot.slane %v8420_v9, 5  ;;  %v3308_v9 = vld [vmem:[#allocation2 + $0x198] sm:$0xff] }
 0x2f1   : > { %v7330_v49 = vpop.f32.mrb[119].mxu0  ;;  %v7418_v10 = vpop.f32.mrb[95].mxu1 }
 0x2f2   : > { %v10258_v28 = vadd.f32 %v7328_v40, %v9895_v44  ;;  %v10261_v55 = vadd.f32 %v7416_v57, %v10144_v36  ;;  %v7331_v29 = vadd.f32 %v7330_v49, %v7329_v39  ;;  %v7419_v35 = vadd.f32 %v7418_v10, %v7417_v31  ;;  %v4865_v44 = vld [vmem:[#allocation2 + $0xd8] sm:$0xee]  ;;  %v8421_v31 = vld [vmem:[#allocation2 + $0xe8] sm:$0x11] }
 0x2f3   : > { %4776 = vmatmul.mubr.bf16.gmra.mrb[224].mxu0 %v9849_v41  ;;  %5395 = vmatmul.mubr.bf16.gmra.mrb[200].mxu1 %v10253_v23  ;;  %v4990_v36 = vsel %vm10002_vm6, %v6861_v38, %v4989_v63  ;;  %v4993_v41 = vsel %vm10002_vm6, %v4991_v50, %v4992_v5  ;;  %v6862_v39 = vrot.slane %v4865_v44, 9  ;;  %v4999_v49 = vrot.slane %v8421_v31, 5  ;;  %v10287_v44 = vld [vmem:[#allocation2 + $0x1a0] sm:$0xff] }
 0x2f4   : > { %11161 = vst [vmem:[#allocation10_spill] sm:$0xff] %v10261_v55  ;;  %v10266_v37 = vadd.f32 %v7331_v29, %v9902_v12  ;;  %v10269_v61 = vadd.f32 %v7419_v35, %v10155_v14  ;;  %4783 = vmatprep.mubr.bf16.mxu0 %v9851_v43  ;;  %5402 = vmatprep.mubr.bf16.mxu1 %v10255_v60  ;;  %v4998_v14 = vrot.slane %v4996_v6, 4  ;;  %11166 = vst [vmem:[#allocation24_spill] sm:$0xff] %v10287_v44 }
 0x2f5   : > { %v10277_v12 = vcombine.low %v4983_v1, %v4986_v27  ;;  %v10279_v35 = vcombine.high %v4990_v36, %v4993_v41 }
 0x2f6   : > { %11162 = vst [vmem:[#allocation17_spill] sm:$0xff] %v10269_v61  ;;  %v7420_v24 = vpop.f32.mrb[96].mxu1  ;;  %v7460_v26 = vpop.f32.mrb[120].mxu0 }
 0x2f7   : > { %v7421_v40 = vpop.f32.mrb[97].mxu1  ;;  %v7461_v57 = vpop.f32.mrb[121].mxu0  ;;  %11163 = vst [vmem:[#allocation18_spill] sm:$0xff] %v10277_v12  ;;  %11164 = vst [vmem:[#allocation22_spill] sm:$0xff] %v10279_v35 }
 0x2f8   : > { %v7422_v43 = vadd.f32 %v7421_v40, %v7420_v24  ;;  %v7462_v10 = vadd.f32 %v7461_v57, %v7460_v26  ;;  %v7423_v18 = vpop.f32.mrb[98].mxu1  ;;  %v7463_v29 = vpop.f32.mrb[122].mxu0  ;;  %v4997_v24 = vsel %vm10002_vm6, %v6862_v39, %v4996_v6  ;;  %v5000_v26 = vsel %vm10002_vm6, %v4998_v14, %v4999_v49  ;;  %v8422_v40 = vld [vmem:[#allocation2 + $0xf8] sm:$0xff] }
 0x2f9   : > { %v7424_v63 = vpop.f32.mrb[99].mxu1  ;;  %v7464_v38 = vpop.f32.mrb[123].mxu0  ;;  %v3732_v6 = vshll.u32 %v10287_v44, 16  ;;  %v3736_v39 = vshrl.u32 %v10287_v44, 16 }
 0x2fa   : > { %v10282_v50 = vadd.f32 %v7422_v43, %v10180_v7  ;;  %v10285_v5 = vadd.f32 %v7462_v10, %v9917_v30  ;;  %v7425_v1 = vadd.f32 %v7424_v63, %v7423_v18  ;;  %v7465_v27 = vadd.f32 %v7464_v38, %v7463_v29  ;;  %v11168_v30 = vld [vmem:[#allocation19_spill] sm:$0xff] }
 0x2fb   : > { %4784 = vmatmul.mubr.bf16.gmra.mrb[228].mxu0 %v9871_v54  ;;  %5403 = vmatmul.mubr.bf16.gmra.mrb[204].mxu1 %v10277_v12  ;;  %v5003_v7 = vrot.slane %v8422_v40, 5  ;;  %v4866_v54 = vld [vmem:[#allocation2 + $0xf0] sm:$0xee]  ;;  %v3723_v43 = vshrl.u32 %v3308_v9, 16  ;;  %v3726_v10 = vshll.u32 %v3308_v9, 16  ;;  %v10305_v18 = vcombine.low %v4990_v36, %v4993_v41 }
 0x2fc   : > { %11165 = vst [vmem:[#allocation23_spill] sm:$0xff] %v10282_v50  ;;  %v10296_v57 = vadd.f32 %v7425_v1, %v10191_v58  ;;  %v10299_v31 = vadd.f32 %v7465_v27, %v11168_v30  ;;  %4791 = vmatprep.mubr.bf16.mxu0 %v9875_v19  ;;  %5410 = vmatprep.mubr.bf16.mxu1 %v10279_v35  ;;  %v6863_v38 = vrot.slane %v4866_v54, 9  ;;  %v8423_v19 = vld [vmem:[#allocation2 + $0x100] sm:$0x11]  ;;  %v10309_v12 = vld [vmem:[#allocation2 + $0x1a8] sm:$0x11] }
 0x2fd   : > { %v10307_v63 = vcombine.high %v4997_v24, %v5000_v26  ;;  %v5005_v1 = vrot.slane %v5003_v7, 4  ;;  %v5006_v27 = vrot.slane %v8423_v19, 5  ;;  %v3725_v50 = vrot.slane %v3723_v43, 4  ;;  %11169 = vst [vmem:[#allocation19_spill] sm:$0xff] %v10309_v12 }
 0x2fe   : > { %11167 = vst [vmem:[#allocation25_spill] sm:$0xff] %v10296_v57  ;;  %v7426_v14 = vpop.f32.mrb[100].mxu1  ;;  %v7466_v49 = vpop.f32.mrb[124].mxu0  ;;  %v3728_v35 = vrot.slane %v3726_v10, 5  ;;  %v3734_v36 = vrot.slane %v3732_v6, 5  ;;  %v3738_v41 = vrot.slane %v3736_v39, 4  ;;  %v5004_v43 = vsel %vm10002_vm6, %v6863_v38, %v5003_v7 }
 0x2ff   : > { %v7427_v58 = vpop.f32.mrb[101].mxu1  ;;  %v7467_v29 = vpop.f32.mrb[125].mxu0  ;;  %v5007_v10 = vsel %vm10002_vm6, %v5005_v1, %v5006_v27 }
 0x300   : > { %v7428_v40 = vadd.f32 %v7427_v58, %v7426_v14  ;;  %v7468_v30 = vadd.f32 %v7467_v29, %v7466_v49  ;;  %v7429_v57 = vpop.f32.mrb[102].mxu1  ;;  %v7469_v9 = vpop.f32.mrb[126].mxu0  ;;  %v4867_v14 = vld [vmem:[#allocation2 + $0x108] sm:$0xee] }
 0x301   : > { %v7430_v61 = vpop.f32.mrb[103].mxu1  ;;  %v7470_v44 = vpop.f32.mrb[127].mxu0 }
 0x302   : > { %v10312_v55 = vadd.f32 %v7428_v40, %v10210_v2  ;;  %v10315_v54 = vadd.f32 %v7468_v30, %v9936_v45  ;;  %v7431_v60 = vadd.f32 %v7430_v61, %v7429_v57  ;;  %v7471_v19 = vadd.f32 %v7470_v44, %v7469_v9  ;;  %v8424_v44 = vld [vmem:[#allocation2 + $0x110] sm:$0xff] }
 0x303   : > { %4792 = vmatmul.mubr.bf16.gmra.mrb[232].mxu0 %v9893_v8  ;;  %5411 = vmatmul.mubr.bf16.gmra.mrb[208].mxu1 %v10305_v18  ;;  %v3729_v45 = vor.u32 %v3728_v35, %v3725_v50  ;;  %v3742_v8 = vshll.u32 %v10309_v12, 16  ;;  %v3739_v61 = vor.u32 %v3738_v41, %v3734_v36  ;;  %v5010_v57 = vrot.slane %v8424_v44, 5  ;;  %v8425_v41 = vld [vmem:[#allocation2 + $0x118] sm:$0x11] }
 0x304   : > { %v10324_v6 = vadd.f32 %v7431_v60, %v10218_v34  ;;  %v10327_v2 = vadd.f32 %v7471_v19, %v9947_v56  ;;  %4799 = vmatprep.mubr.bf16.mxu0 %v9897_v17  ;;  %5418 = vmatprep.mubr.bf16.mxu1 %v10307_v63  ;;  %v10332_v34 = vcombine.low %v4997_v24, %v5000_v26  ;;  %v6864_v30 = vrot.slane %v4867_v14, 9 }
 0x305   : > { %v10334_v60 = vcombine.high %v5004_v43, %v5007_v10  ;;  %v3730_v1 = vrot.slane %v3729_v45, 4  ;;  %v3744_v35 = vrot.slane %v3742_v8, 5  ;;  %v3740_v40 = vrot.slane %v3739_v61, 4  ;;  %v8426_v61 = vld [vmem:[#allocation2 + $0x128] sm:$0xff] }
 0x306   : > { %v7432_v7 = vpop.f32.mrb[104].mxu1  ;;  %v7472_v39 = vpop.f32.mrb[128].mxu0  ;;  %v5012_v9 = vrot.slane %v5010_v57, 4  ;;  %v5013_v19 = vrot.slane %v8425_v41, 5 }
 0x307   : > { %v7433_v49 = vpop.f32.mrb[105].mxu1  ;;  %v7473_v58 = vpop.f32.mrb[129].mxu0 }
 0x308   : > { %v7434_v56 = vadd.f32 %v7433_v49, %v7432_v7  ;;  %v7474_v29 = vadd.f32 %v7473_v58, %v7472_v39  ;;  %v7435_v17 = vpop.f32.mrb[106].mxu1  ;;  %v7475_v38 = vpop.f32.mrb[130].mxu0  ;;  %v5017_v39 = vrot.slane %v8426_v61, 5  ;;  %v4868_v49 = vld [vmem:[#allocation2 + $0x120] sm:$0xee] }
 0x309   : > { %v7436_v50 = vpop.f32.mrb[107].mxu1  ;;  %v7476_v27 = vpop.f32.mrb[131].mxu0  ;;  %v8428_v61 = vld [vmem:[#allocation2 + $0x140] sm:$0xff] }
 0x30a   : > { %v10337_v44 = vadd.f32 %v7434_v56, %v10234_v3  ;;  %v10340_v24 = vadd.f32 %v7474_v29, %v9964_v20  ;;  %v7437_v26 = vadd.f32 %v7436_v50, %v7435_v17  ;;  %v7477_v7 = vadd.f32 %v7476_v27, %v7475_v38 }
 0x30b   : > { %4800 = vmatmul.mubr.bf16.gmra.mrb[236].mxu0 %v9911_v15  ;;  %5419 = vmatmul.mubr.bf16.gmra.mrb[212].mxu1 %v10332_v34  ;;  %v3735_v20 = vsel %vm9504_vm3, %v3730_v1, %v3734_v36  ;;  %v3745_v3 = vsel %vm9504_vm3, %v3740_v40, %v3744_v35  ;;  %v5011_v15 = vsel %vm10002_vm6, %v6864_v30, %v5010_v57  ;;  %v6865_v50 = vrot.slane %v4868_v49, 9  ;;  %v8427_v40 = vld [vmem:[#allocation2 + $0x130] sm:$0x11]  ;;  %v4869_v49 = vld [vmem:[#allocation2 + $0x138] sm:$0xee] }
 0x30c   : > { %v10345_v45 = vadd.f32 %v7437_v26, %v10242_v62  ;;  %v10348_v8 = vadd.f32 %v7477_v7, %v9975_v4  ;;  %4807 = vmatprep.mubr.bf16.mxu0 %v9989_v48  ;;  %5426 = vmatprep.mubr.bf16.mxu1 %v10334_v60  ;;  %v5014_v62 = vsel %vm10002_vm6, %v5012_v9, %v5013_v19  ;;  %v5019_v27 = vrot.slane %v5017_v39, 4  ;;  %v11170_v26 = vld [vmem:[#allocation20_spill] sm:$0xff] }
 0x30d   : > { %v10360_v56 = vcombine.low %v5004_v43, %v5007_v10  ;;  %v6836_v38 = vcombine.high %v3735_v20, %v3745_v3  ;;  %v10362_v1 = vcombine.high %v5011_v15, %v5014_v62  ;;  %v5020_v30 = vrot.slane %v8427_v40, 5  ;;  %v8429_v40 = vld [vmem:[#allocation2 + $0x148] sm:$0x11] }
 0x30e   : > { %v7438_v4 = vpop.f32.mrb[108].mxu1  ;;  %v7478_v14 = vpop.f32.mrb[132].mxu0 }
 0x30f   : > { %v7439_v48 = vpop.f32.mrb[109].mxu1  ;;  %v7479_v58 = vpop.f32.mrb[133].mxu0 }
 0x310   : > { %v7440_v29 = vadd.f32 %v7439_v48, %v7438_v4  ;;  %v7480_v36 = vadd.f32 %v7479_v58, %v7478_v14  ;;  %v7441_v17 = vpop.f32.mrb[110].mxu1  ;;  %v7481_v0 = vpop.f32.mrb[134].mxu0  ;;  %v5024_v4 = vrot.slane %v8428_v61, 5  ;;  %v6835_v58 = vcombine.low %v3735_v20, %v3745_v3 }
 0x311   : > { %v7442_v57 = vpop.f32.mrb[111].mxu1  ;;  %v7482_v35 = vpop.f32.mrb[135].mxu0 }
 0x312   : > { %v10365_v9 = vadd.f32 %v7440_v29, %v10258_v28  ;;  %v10368_v41 = vadd.f32 %v7480_v36, %v9998_v11  ;;  %v7443_v43 = vadd.f32 %v7442_v57, %v7441_v17  ;;  %v7483_v10 = vadd.f32 %v7482_v35, %v7481_v0 }
 0x313   : > { %4808 = vmatmul.mubr.bf16.gmra.mrb[240].mxu0 %v10033_v51  ;;  %5427 = vmatmul.mubr.bf16.gmra.mrb[216].mxu1 %v10360_v56  ;;  %v5018_v28 = vsel %vm10002_vm6, %v6865_v50, %v5017_v39  ;;  %v5021_v11 = vsel %vm10002_vm6, %v5019_v27, %v5020_v30  ;;  %v10383_v29 = vcombine.low %v5011_v15, %v5014_v62  ;;  %v6866_v50 = vrot.slane %v4869_v49, 9  ;;  %v11172_v15 = vld [vmem:[#allocation8_spill] sm:$0xff] }
 0x314   : > { %v10373_v19 = vadd.f32 %v7443_v43, %v10266_v37  ;;  %v10376_v7 = vadd.f32 %v7483_v10, %v11170_v26  ;;  %4815 = vmatprep.mubr.bf16.mxu0 %v6836_v38  ;;  %5434 = vmatprep.mubr.bf16.mxu1 %v10362_v1  ;;  %v10385_v57 = vcombine.high %v5018_v28, %v5021_v11  ;;  %v5026_v27 = vrot.slane %v5024_v4, 4  ;;  %v11171_v43 = vld [vmem:[#allocation21_spill] sm:$0xff] }
 0x315   : > { %v5027_v30 = vrot.slane %v8429_v40, 5 }
 0x316   : > { %v7484_v51 = vpop.f32.mrb[136].mxu0  ;;  %v7572_v14 = vpop.f32.mrb[112].mxu1 }
 0x317   : > { %v7485_v48 = vpop.f32.mrb[137].mxu0  ;;  %v7573_v37 = vpop.f32.mrb[113].mxu1 }
 0x318   : > { %v7486_v36 = vadd.f32 %v7485_v48, %v7484_v51  ;;  %v7574_v17 = vadd.f32 %v7573_v37, %v7572_v14  ;;  %v7487_v0 = vpop.f32.mrb[138].mxu0  ;;  %v7575_v38 = vpop.f32.mrb[114].mxu1  ;;  %v5025_v51 = vsel %vm10002_vm6, %v6866_v50, %v5024_v4  ;;  %v8430_v14 = vld [vmem:[#allocation2 + $0x158] sm:$0xff] }
 0x319   : > { %v7488_v39 = vpop.f32.mrb[139].mxu0  ;;  %v7576_v35 = vpop.f32.mrb[115].mxu1  ;;  %v5031_v49 = vrot.slane %v8430_v14, 5  ;;  %v11176_v14 = vld [vmem:[#allocation4_spill] sm:$0xff] }
 0x31a   : > { %v10388_v10 = vadd.f32 %v7486_v36, %v11171_v43  ;;  %v10391_v26 = vadd.f32 %v7574_v17, %v10285_v5  ;;  %v7489_v20 = vadd.f32 %v7488_v39, %v7487_v0  ;;  %v7577_v3 = vadd.f32 %v7576_v35, %v7575_v38 }
 0x31b   : > { %4816 = vmatmul.mubr.bf16.gmra.mrb[244].mxu0 %v6835_v58  ;;  %5435 = vmatmul.mubr.bf16.gmra.mrb[220].mxu1 %v10383_v29  ;;  %v5028_v5 = vsel %vm10002_vm6, %v5026_v27, %v5027_v30  ;;  %v4870_v58 = vld [vmem:[#allocation2 + $0x150] sm:$0xee]  ;;  %v10406_v0 = vcombine.low %v5018_v28, %v5021_v11  ;;  %v5033_v43 = vrot.slane %v5031_v49, 4  ;;  %v8431_v27 = vld [vmem:[#allocation2 + $0x160] sm:$0x11] }
 0x31c   : > { %v10395_v62 = vadd.f32 %v7489_v20, %v11172_v15  ;;  %v10398_v61 = vadd.f32 %v7577_v3, %v10299_v31  ;;  %5442 = vmatprep.mubr.bf16.mxu1 %v10385_v57  ;;  %5676 = vmatprep.mubr.bf16.mxu0 %v10070_v21  ;;  %v10408_v21 = vcombine.high %v5025_v51, %v5028_v5  ;;  %v6867_v50 = vrot.slane %v4870_v58, 9  ;;  %v11174_v20 = vld [vmem:[#allocation3_spill] sm:$0xff] }
 0x31d   : > { %v5034_v30 = vrot.slane %v8431_v27, 5 }
 0x31e   : > { %v7490_v48 = vpop.f32.mrb[140].mxu0  ;;  %v7578_v37 = vpop.f32.mrb[116].mxu1  ;;  %11173 = vst [vmem:[#allocation20_spill] sm:$0xff] %v10408_v21 }
 0x31f   : > { %v7491_v36 = vpop.f32.mrb[141].mxu0  ;;  %v7579_v17 = vpop.f32.mrb[117].mxu1 }
 0x320   : > { %v7492_v31 = vadd.f32 %v7491_v36, %v7490_v48  ;;  %v7580_v38 = vadd.f32 %v7579_v17, %v7578_v37  ;;  %v7493_v39 = vpop.f32.mrb[142].mxu0  ;;  %v7581_v35 = vpop.f32.mrb[118].mxu1  ;;  %v11177_v48 = vld [vmem:[#allocation11_spill] sm:$0xff]  ;;  %v11179_v36 = vld [vmem:[#allocation12_spill] sm:$0xff]  ;;  %v5035_v17 = vsel %vm10002_vm6, %v5033_v43, %v5034_v30 }
 0x321   : > { %v7494_v40 = vpop.f32.mrb[143].mxu0  ;;  %v7582_v4 = vpop.f32.mrb[119].mxu1  ;;  %v8433_v43 = vld [vmem:[#allocation2 + $0x178] sm:$0x11] }
 0x322   : > { %v10411_v3 = vadd.f32 %v7492_v31, %v11174_v20  ;;  %v10414_v15 = vadd.f32 %v7580_v38, %v10315_v54  ;;  %v7495_v28 = vadd.f32 %v7494_v40, %v7493_v39  ;;  %v7583_v11 = vadd.f32 %v7582_v4, %v7581_v35  ;;  %v8432_v31 = vld [vmem:[#allocation2 + $0x170] sm:$0xff]  ;;  %v4871_v40 = vld [vmem:[#allocation2 + $0x168] sm:$0xee] }
 0x323   : > { %5443 = vmatmul.mubr.bf16.gmra.mrb[224].mxu1 %v10406_v0  ;;  %5677 = vmatmul.mubr.bf16.vlgmr.msra.gmra.mrb[248].mxu0 %v11176_v14  ;;  %v5032_v54 = vsel %vm10002_vm6, %v6867_v50, %v5031_v49  ;;  %v5038_v38 = vrot.slane %v8432_v31, 5  ;;  %v10430_v20 = vcombine.low %v5025_v51, %v5028_v5  ;;  %v6868_v50 = vrot.slane %v4871_v40, 9  ;;  %v11181_v31 = vld [vmem:[#allocation5_spill] sm:$0xff] }
 0x324   : > { %11175 = vst [vmem:[#allocation21_spill] sm:$0xff] %v10414_v15  ;;  %v10419_v37 = vadd.f32 %v7495_v28, %v11177_v48  ;;  %v10422_v58 = vadd.f32 %v7583_v11, %v10327_v2  ;;  %5450 = vmatprep.mubr.bf16.mxu1 %v10408_v21  ;;  %5684 = vmatprep.mubr.bf16.mxu0 %v11179_v36  ;;  %v5041_v30 = vrot.slane %v8433_v43, 5 }
 0x325   : > { %v10432_v48 = vcombine.high %v5032_v54, %v5035_v17 }
 0x326   : > { %11178 = vst [vmem:[#allocation8_spill] sm:$0xff] %v10422_v58  ;;  %v7496_v39 = vpop.f32.mrb[144].mxu0  ;;  %v7584_v35 = vpop.f32.mrb[120].mxu1  ;;  %v5040_v58 = vrot.slane %v5038_v38, 4 }
 0x327   : > { %v7497_v4 = vpop.f32.mrb[145].mxu0  ;;  %v7585_v27 = vpop.f32.mrb[121].mxu1  ;;  %11180 = vst [vmem:[#allocation3_spill] sm:$0xff] %v10432_v48 }
 0x328   : > { %v7498_v2 = vadd.f32 %v7497_v4, %v7496_v39  ;;  %v7586_v28 = vadd.f32 %v7585_v27, %v7584_v35  ;;  %v7499_v11 = vpop.f32.mrb[146].mxu0  ;;  %v7587_v14 = vpop.f32.mrb[122].mxu1  ;;  %v11183_v39 = vld [vmem:[#allocation6_spill] sm:$0xff]  ;;  %v11184_v35 = vld [vmem:[#allocation13_spill] sm:$0xff] }
 0x329   : > { %v7500_v12 = vpop.f32.mrb[147].mxu0  ;;  %v7588_v49 = vpop.f32.mrb[123].mxu1  ;;  %v11186_v27 = vld [vmem:[#allocation14_spill] sm:$0xff] }
 0x32a   : > { %v10435_v15 = vadd.f32 %v7498_v2, %v11181_v31  ;;  %v10438_v21 = vadd.f32 %v7586_v28, %v10340_v24  ;;  %v7501_v51 = vadd.f32 %v7500_v12, %v7499_v11  ;;  %v7589_v5 = vadd.f32 %v7588_v49, %v7587_v14 }
 0x32b   : > { %5451 = vmatmul.mubr.bf16.gmra.mrb[228].mxu1 %v10430_v20  ;;  %5685 = vmatmul.mubr.bf16.gmra.mrb[252].mxu0 %v11183_v39  ;;  %v5039_v24 = vsel %vm10002_vm6, %v6868_v50, %v5038_v38  ;;  %v5042_v12 = vsel %vm10002_vm6, %v5040_v58, %v5041_v30  ;;  %v10454_v49 = vcombine.low %v5032_v54, %v5035_v17  ;;  %v11188_v54 = vld [vmem:[#allocation15_spill] sm:$0xff] }
 0x32c   : > { %11182 = vst [vmem:[#allocation4_spill] sm:$0xff] %v10438_v21  ;;  %v10443_v4 = vadd.f32 %v7501_v51, %v11184_v35  ;;  %v10446_v40 = vadd.f32 %v7589_v5, %v10348_v8  ;;  %5458 = vmatprep.mubr.bf16.mxu1 %v10432_v48  ;;  %5692 = vmatprep.mubr.bf16.mxu0 %v11186_v27  ;;  %v11187_v21 = vld [vmem:[#allocation7_spill] sm:$0xff] }
 0x32d   : > { %v10456_v5 = vcombine.high %v5039_v24, %v5042_v12 }
 0x32e   : > { %11185 = vst [vmem:[#allocation11_spill] sm:$0xff] %v10446_v40  ;;  %v7502_v2 = vpop.f32.mrb[148].mxu0  ;;  %v7590_v28 = vpop.f32.mrb[124].mxu1 }
 0x32f   : > { %v7503_v11 = vpop.f32.mrb[149].mxu0  ;;  %v7591_v14 = vpop.f32.mrb[125].mxu1 }
 0x330   : > { %v7504_v43 = vadd.f32 %v7503_v11, %v7502_v2  ;;  %v7592_v31 = vadd.f32 %v7591_v14, %v7590_v28  ;;  %v7505_v8 = vpop.f32.mrb[150].mxu0  ;;  %v7593_v51 = vpop.f32.mrb[126].mxu1  ;;  %v10474_v11 = vcombine.low %v5039_v24, %v5042_v12  ;;  %v11189_v24 = vld [vmem:[#allocation9_spill] sm:$0xff] }
 0x331   : > { %v7506_v35 = vpop.f32.mrb[151].mxu0  ;;  %v7594_v40 = vpop.f32.mrb[127].mxu1 }
 0x332   : > { %v10459_v48 = vadd.f32 %v7504_v43, %v11187_v21  ;;  %v10462_v38 = vadd.f32 %v7592_v31, %v10368_v41  ;;  %v7507_v58 = vadd.f32 %v7506_v35, %v7505_v8  ;;  %v7595_v50 = vadd.f32 %v7594_v40, %v7593_v51 }
 0x333   : > { %5459 = vmatmul.mubr.bf16.gmra.mrb[232].mxu1 %v10454_v49  ;;  %5693 = vmatmul.mubr.bf16.gmra.mrb[0].mxu0 %v10172_v42 }
 0x334   : > { %v10467_v17 = vadd.f32 %v7507_v58, %v11188_v54  ;;  %v10470_v30 = vadd.f32 %v7595_v50, %v10376_v7  ;;  %5466 = vmatprep.mubr.bf16.mxu1 %v10456_v5  ;;  %5700 = vmatprep.mubr.bf16.mxu0 %v10174_v32 }
 0x336   : > { %v7508_v21 = vpop.f32.mrb[152].mxu0  ;;  %v7596_v2 = vpop.f32.mrb[128].mxu1 }
 0x337   : > { %v7509_v41 = vpop.f32.mrb[153].mxu0  ;;  %v7597_v28 = vpop.f32.mrb[129].mxu1 }
 0x338   : > { %v7510_v40 = vadd.f32 %v7509_v41, %v7508_v21  ;;  %v7598_v14 = vadd.f32 %v7597_v28, %v7596_v2  ;;  %v7511_v43 = vpop.f32.mrb[154].mxu0  ;;  %v7599_v31 = vpop.f32.mrb[130].mxu1 }
 0x339   : > { %v7512_v8 = vpop.f32.mrb[155].mxu0  ;;  %v7600_v51 = vpop.f32.mrb[131].mxu1 }
 0x33a   : > { %v10477_v35 = vadd.f32 %v7510_v40, %v10183_v25  ;;  %v10480_v7 = vadd.f32 %v7598_v14, %v10388_v10  ;;  %v7513_v58 = vadd.f32 %v7512_v8, %v7511_v43  ;;  %v7601_v50 = vadd.f32 %v7600_v51, %v7599_v31 }
 0x33b   : > { %5467 = vmatmul.mubr.bf16.gmra.mrb[236].mxu1 %v10474_v11  ;;  %5701 = vmatmul.mubr.bf16.gmra.mrb[4].mxu0 %v10205_v59 }
 0x33c   : > { %v10485_v12 = vadd.f32 %v7513_v58, %v11189_v24  ;;  %v10488_v54 = vadd.f32 %v7601_v50, %v10395_v62  ;;  %5708 = vmatprep.mubr.bf16.mxu0 %v10207_v33  ;;  %6006 = vmatprep.mubr.bf16.mxu1 %v11179_v36 }
 0x33e   : > { %v7514_v25 = vpop.f32.mrb[156].mxu0  ;;  %v7602_v21 = vpop.f32.mrb[132].mxu1 }
 0x33f   : > { %v7515_v10 = vpop.f32.mrb[157].mxu0  ;;  %v7603_v2 = vpop.f32.mrb[133].mxu1 }
 0x340   : > { %v7516_v41 = vadd.f32 %v7515_v10, %v7514_v25  ;;  %v7604_v28 = vadd.f32 %v7603_v2, %v7602_v21  ;;  %v7517_v40 = vpop.f32.mrb[158].mxu0  ;;  %v7605_v14 = vpop.f32.mrb[134].mxu1 }
 0x341   : > { %v7518_v43 = vpop.f32.mrb[159].mxu0  ;;  %v7606_v31 = vpop.f32.mrb[135].mxu1 }
 0x342   : > { %v10493_v8 = vadd.f32 %v7516_v41, %v10213_v16  ;;  %v10496_v62 = vadd.f32 %v7604_v28, %v10411_v3  ;;  %v7519_v51 = vadd.f32 %v7518_v43, %v7517_v40  ;;  %v7607_v58 = vadd.f32 %v7606_v31, %v7605_v14  ;;  %v11190_v31 = vld [vmem:[#allocation16_spill] sm:$0xff] }
 0x343   : > { %5709 = vmatmul.mubr.bf16.gmra.mrb[8].mxu0 %v10229_v52  ;;  %6007 = vmatmul.mubr.bf16.vlgmr.msra.gmra.mrb[240].mxu1 %v11183_v39 }
 0x344   : > { %v10501_v36 = vadd.f32 %v7519_v51, %v10221_v13  ;;  %v10504_v50 = vadd.f32 %v7607_v58, %v10419_v37  ;;  %5716 = vmatprep.mubr.bf16.mxu0 %v10231_v46  ;;  %6014 = vmatprep.mubr.bf16.mxu1 %v11186_v27 }
 0x346   : > { %v7520_v16 = vpop.f32.mrb[160].mxu0  ;;  %v7608_v24 = vpop.f32.mrb[136].mxu1 }
 0x347   : > { %v7521_v3 = vpop.f32.mrb[161].mxu0  ;;  %v7609_v25 = vpop.f32.mrb[137].mxu1 }
 0x348   : > { %v7522_v21 = vadd.f32 %v7521_v3, %v7520_v16  ;;  %v7610_v10 = vadd.f32 %v7609_v25, %v7608_v24  ;;  %v7523_v2 = vpop.f32.mrb[162].mxu0  ;;  %v7611_v41 = vpop.f32.mrb[138].mxu1 }
 0x349   : > { %v7524_v28 = vpop.f32.mrb[163].mxu0  ;;  %v7612_v39 = vpop.f32.mrb[139].mxu1 }
 0x34a   : > { %v10509_v13 = vadd.f32 %v7522_v21, %v10237_v22  ;;  %v10512_v37 = vadd.f32 %v7610_v10, %v10435_v15  ;;  %v7525_v40 = vadd.f32 %v7524_v28, %v7523_v2  ;;  %v7613_v14 = vadd.f32 %v7612_v39, %v7611_v41  ;;  %v11191_v10 = vld [vmem:[#allocation10_spill] sm:$0xff] }
 0x34b   : > { %5717 = vmatmul.mubr.bf16.gmra.mrb[12].mxu0 %v10253_v23  ;;  %6015 = vmatmul.mubr.bf16.gmra.mrb[244].mxu1 %v10172_v42  ;;  %v11192_v28 = vld [vmem:[#allocation18_spill] sm:$0xff] }
 0x34c   : > { %v10517_v27 = vadd.f32 %v7525_v40, %v10245_v53  ;;  %v10520_v43 = vadd.f32 %v7613_v14, %v10443_v4  ;;  %5724 = vmatprep.mubr.bf16.mxu0 %v11190_v31  ;;  %6022 = vmatprep.mubr.bf16.mxu1 %v10174_v32  ;;  %v11193_v32 = vld [vmem:[#allocation17_spill] sm:$0xff]  ;;  %v11194_v14 = vld [vmem:[#allocation22_spill] sm:$0xff] }
 0x34e   : > { %v7526_v22 = vpop.f32.mrb[164].mxu0  ;;  %v7614_v51 = vpop.f32.mrb[140].mxu1 }
 0x34f   : > { %v7527_v15 = vpop.f32.mrb[165].mxu0  ;;  %v7615_v58 = vpop.f32.mrb[141].mxu1 }
 0x350   : > { %v7528_v16 = vadd.f32 %v7527_v15, %v7526_v22  ;;  %v7616_v24 = vadd.f32 %v7615_v58, %v7614_v51  ;;  %v7529_v3 = vpop.f32.mrb[166].mxu0  ;;  %v7617_v25 = vpop.f32.mrb[142].mxu1 }
 0x351   : > { %v7530_v21 = vpop.f32.mrb[167].mxu0  ;;  %v7618_v42 = vpop.f32.mrb[143].mxu1 }
 0x352   : > { %v10525_v53 = vadd.f32 %v7528_v16, %v11191_v10  ;;  %v10528_v4 = vadd.f32 %v7616_v24, %v10459_v48  ;;  %v7531_v2 = vadd.f32 %v7530_v21, %v7529_v3  ;;  %v7619_v41 = vadd.f32 %v7618_v42, %v7617_v25  ;;  %v11195_v21 = vld [vmem:[#allocation23_spill] sm:$0xff] }
 0x353   : > { %5725 = vmatmul.mubr.bf16.gmra.mrb[16].mxu0 %v11192_v28  ;;  %6023 = vmatmul.mubr.bf16.gmra.mrb[248].mxu1 %v10205_v59 }
 0x354   : > { %v10533_v39 = vadd.f32 %v7531_v2, %v11193_v32  ;;  %v10536_v40 = vadd.f32 %v7619_v41, %v10467_v17  ;;  %5732 = vmatprep.mubr.bf16.mxu0 %v11194_v14  ;;  %6030 = vmatprep.mubr.bf16.mxu1 %v10207_v33  ;;  %v11196_v33 = vld [vmem:[#allocation25_spill] sm:$0xff] }
 0x356   : > { %v7532_v22 = vpop.f32.mrb[168].mxu0  ;;  %v7620_v51 = vpop.f32.mrb[144].mxu1 }
 0x357   : > { %v7533_v48 = vpop.f32.mrb[169].mxu0  ;;  %v7621_v15 = vpop.f32.mrb[145].mxu1 }
 0x358   : > { %v7534_v58 = vadd.f32 %v7533_v48, %v7532_v22  ;;  %v7622_v16 = vadd.f32 %v7621_v15, %v7620_v51  ;;  %v7535_v24 = vpop.f32.mrb[170].mxu0  ;;  %v7623_v3 = vpop.f32.mrb[146].mxu1 }
 0x359   : > { %v7536_v25 = vpop.f32.mrb[171].mxu0  ;;  %v7624_v59 = vpop.f32.mrb[147].mxu1 }
 0x35a   : > { %v10541_v42 = vadd.f32 %v7534_v58, %v11195_v21  ;;  %v10544_v17 = vadd.f32 %v7622_v16, %v10477_v35  ;;  %v7537_v10 = vadd.f32 %v7536_v25, %v7535_v24  ;;  %v7625_v2 = vadd.f32 %v7624_v59, %v7623_v3 }
 0x35b   : > { %5733 = vmatmul.mubr.bf16.gmra.mrb[20].mxu0 %v10305_v18  ;;  %6031 = vmatmul.mubr.bf16.gmra.mrb[252].mxu1 %v10229_v52 }
 0x35c   : > { %v10549_v41 = vadd.f32 %v7537_v10, %v11196_v33  ;;  %v10552_v32 = vadd.f32 %v7625_v2, %v10485_v12  ;;  %5740 = vmatprep.mubr.bf16.mxu0 %v10307_v63  ;;  %6038 = vmatprep.mubr.bf16.mxu1 %v10231_v46 }
 0x35e   : > { %v7538_v22 = vpop.f32.mrb[172].mxu0  ;;  %v7626_v51 = vpop.f32.mrb[148].mxu1 }
 0x35f   : > { %v7539_v35 = vpop.f32.mrb[173].mxu0  ;;  %v7627_v48 = vpop.f32.mrb[149].mxu1 }
 0x360   : > { %v7540_v15 = vadd.f32 %v7539_v35, %v7538_v22  ;;  %v7628_v58 = vadd.f32 %v7627_v48, %v7626_v51  ;;  %v7541_v16 = vpop.f32.mrb[174].mxu0  ;;  %v7629_v24 = vpop.f32.mrb[150].mxu1 }
 0x361   : > { %v7542_v3 = vpop.f32.mrb[175].mxu0  ;;  %v7630_v52 = vpop.f32.mrb[151].mxu1 }
 0x362   : > { %v10557_v25 = vadd.f32 %v7540_v15, %v10312_v55  ;;  %v10560_v12 = vadd.f32 %v7628_v58, %v10493_v8  ;;  %v7543_v59 = vadd.f32 %v7542_v3, %v7541_v16  ;;  %v7631_v21 = vadd.f32 %v7630_v52, %v7629_v24 }
 0x363   : > { %5741 = vmatmul.mubr.bf16.gmra.mrb[24].mxu0 %v10332_v34  ;;  %6039 = vmatmul.mubr.bf16.gmra.mrb[0].mxu1 %v10253_v23 }
 0x364   : > { %v10565_v46 = vadd.f32 %v7543_v59, %v10324_v6  ;;  %v10568_v10 = vadd.f32 %v7631_v21, %v10501_v36  ;;  %5748 = vmatprep.mubr.bf16.mxu0 %v10334_v60  ;;  %6046 = vmatprep.mubr.bf16.mxu1 %v11190_v31 }
 0x366   : > { %v7544_v55 = vpop.f32.mrb[176].mxu0  ;;  %v7632_v2 = vpop.f32.mrb[152].mxu1 }
 0x367   : > { %v7545_v8 = vpop.f32.mrb[177].mxu0  ;;  %v7633_v33 = vpop.f32.mrb[153].mxu1 }
 0x368   : > { %v7546_v22 = vadd.f32 %v7545_v8, %v7544_v55  ;;  %v7634_v51 = vadd.f32 %v7633_v33, %v7632_v2  ;;  %v7547_v35 = vpop.f32.mrb[178].mxu0  ;;  %v7635_v48 = vpop.f32.mrb[154].mxu1 }
 0x369   : > { %v7548_v15 = vpop.f32.mrb[179].mxu0  ;;  %v7636_v23 = vpop.f32.mrb[155].mxu1 }
 0x36a   : > { %v10573_v6 = vadd.f32 %v7546_v22, %v10337_v44  ;;  %v10576_v36 = vadd.f32 %v7634_v51, %v10509_v13  ;;  %v7549_v58 = vadd.f32 %v7548_v15, %v7547_v35  ;;  %v7637_v16 = vadd.f32 %v7636_v23, %v7635_v48 }
 0x36b   : > { %5749 = vmatmul.mubr.bf16.gmra.mrb[28].mxu0 %v10360_v56  ;;  %6047 = vmatmul.mubr.bf16.gmra.mrb[4].mxu1 %v11192_v28 }
 0x36c   : > { %v10581_v31 = vadd.f32 %v7549_v58, %v10345_v45  ;;  %v10584_v24 = vadd.f32 %v7637_v16, %v10517_v27  ;;  %5756 = vmatprep.mubr.bf16.mxu0 %v10362_v1  ;;  %6054 = vmatprep.mubr.bf16.mxu1 %v11194_v14 }
 0x36e   : > { %v7550_v44 = vpop.f32.mrb[180].mxu0  ;;  %v7638_v3 = vpop.f32.mrb[156].mxu1 }
 0x36f   : > { %v7551_v13 = vpop.f32.mrb[181].mxu0  ;;  %v7639_v52 = vpop.f32.mrb[157].mxu1 }
 0x370   : > { %v7552_v59 = vadd.f32 %v7551_v13, %v7550_v44  ;;  %v7640_v21 = vadd.f32 %v7639_v52, %v7638_v3  ;;  %v7553_v55 = vpop.f32.mrb[182].mxu0  ;;  %v7641_v2 = vpop.f32.mrb[158].mxu1 }
 0x371   : > { %v7554_v8 = vpop.f32.mrb[183].mxu0  ;;  %v7642_v28 = vpop.f32.mrb[159].mxu1 }
 0x372   : > { %v10589_v45 = vadd.f32 %v7552_v59, %v10365_v9  ;;  %v10592_v27 = vadd.f32 %v7640_v21, %v10525_v53  ;;  %v7555_v33 = vadd.f32 %v7554_v8, %v7553_v55  ;;  %v7643_v22 = vadd.f32 %v7642_v28, %v7641_v2  ;;  %v11197_v59 = vld [vmem:[#allocation20_spill] sm:$0xff] }
 0x373   : > { %5757 = vmatmul.mubr.bf16.gmra.mrb[32].mxu0 %v10383_v29  ;;  %6055 = vmatmul.mubr.bf16.gmra.mrb[8].mxu1 %v10305_v18 }
 0x374   : > { %v10597_v14 = vadd.f32 %v7555_v33, %v10373_v19  ;;  %v10600_v51 = vadd.f32 %v7643_v22, %v10533_v39  ;;  %5764 = vmatprep.mubr.bf16.mxu0 %v10385_v57  ;;  %6062 = vmatprep.mubr.bf16.mxu1 %v10307_v63 }
 0x376   : > { %v7644_v9 = vpop.f32.mrb[160].mxu1  ;;  %v7684_v35 = vpop.f32.mrb[184].mxu0 }
 0x377   : > { %v7645_v53 = vpop.f32.mrb[161].mxu1  ;;  %v7685_v48 = vpop.f32.mrb[185].mxu0 }
 0x378   : > { %v7646_v15 = vadd.f32 %v7645_v53, %v7644_v9  ;;  %v7686_v23 = vadd.f32 %v7685_v48, %v7684_v35  ;;  %v7647_v58 = vpop.f32.mrb[162].mxu1  ;;  %v7687_v16 = vpop.f32.mrb[186].mxu0  ;;  %v11198_v9 = vld [vmem:[#allocation21_spill] sm:$0xff]  ;;  %v11199_v48 = vld [vmem:[#allocation8_spill] sm:$0xff] }
 0x379   : > { %v7648_v44 = vpop.f32.mrb[163].mxu1  ;;  %v7688_v18 = vpop.f32.mrb[187].mxu0 }
 0x37a   : > { %v10605_v19 = vadd.f32 %v7646_v15, %v10541_v42  ;;  %v10608_v39 = vadd.f32 %v7686_v23, %v10391_v26  ;;  %v7649_v3 = vadd.f32 %v7648_v44, %v7647_v58  ;;  %v7689_v13 = vadd.f32 %v7688_v18, %v7687_v16  ;;  %v11200_v23 = vld [vmem:[#allocation3_spill] sm:$0xff]  ;;  %v4872_v18 = vld [vmem:[#allocation2 + $0x180] sm:$0xee] }
 0x37b   : > { %5765 = vmatmul.mubr.bf16.gmra.mrb[36].mxu0 %v10406_v0  ;;  %6063 = vmatmul.mubr.bf16.gmra.mrb[12].mxu1 %v10332_v34 }
 0x37c   : > { %v10613_v63 = vadd.f32 %v7649_v3, %v10549_v41  ;;  %v10616_v52 = vadd.f32 %v7689_v13, %v10398_v61  ;;  %5772 = vmatprep.mubr.bf16.mxu0 %v11197_v59  ;;  %6070 = vmatprep.mubr.bf16.mxu1 %v10334_v60 }
 0x37e   : > { %v7650_v42 = vpop.f32.mrb[164].mxu1  ;;  %v7690_v21 = vpop.f32.mrb[188].mxu0 }
 0x37f   : > { %v7651_v26 = vpop.f32.mrb[165].mxu1  ;;  %v7691_v55 = vpop.f32.mrb[189].mxu0 }
 0x380   : > { %v7652_v2 = vadd.f32 %v7651_v26, %v7650_v42  ;;  %v7692_v8 = vadd.f32 %v7691_v55, %v7690_v21  ;;  %v7653_v28 = vpop.f32.mrb[166].mxu1  ;;  %v7693_v33 = vpop.f32.mrb[190].mxu0 }
 0x381   : > { %v7654_v22 = vpop.f32.mrb[167].mxu1  ;;  %v7694_v34 = vpop.f32.mrb[191].mxu0 }
 0x382   : > { %v10621_v41 = vadd.f32 %v7652_v2, %v10557_v25  ;;  %v10624_v61 = vadd.f32 %v7692_v8, %v11198_v9  ;;  %v7655_v35 = vadd.f32 %v7654_v22, %v7653_v28  ;;  %v7695_v53 = vadd.f32 %v7694_v34, %v7693_v33  ;;  %v8434_v25 = vld [vmem:[#allocation2 + $0x188] sm:$0xff]  ;;  %v8435_v28 = vld [vmem:[#allocation2 + $0x190] sm:$0x11] }
 0x383   : > { %5773 = vmatmul.mubr.bf16.gmra.mrb[40].mxu0 %v10430_v20  ;;  %6071 = vmatmul.mubr.bf16.gmra.mrb[16].mxu1 %v10360_v56  ;;  %v5045_v58 = vrot.slane %v8434_v25, 5  ;;  %v6869_v2 = vrot.slane %v4872_v18, 9  ;;  %v5048_v33 = vrot.slane %v8435_v28, 5 }
 0x384   : > { %v10629_v60 = vadd.f32 %v7655_v35, %v10565_v46  ;;  %v10632_v15 = vadd.f32 %v7695_v53, %v11199_v48  ;;  %5780 = vmatprep.mubr.bf16.mxu0 %v11200_v23  ;;  %6078 = vmatprep.mubr.bf16.mxu1 %v10362_v1  ;;  %v11201_v1 = vld [vmem:[#allocation4_spill] sm:$0xff]  ;;  %v11202_v48 = vld [vmem:[#allocation11_spill] sm:$0xff] }
 0x385   : > { %v5047_v8 = vrot.slane %v5045_v58, 4 }
 0x386   : > { %v7656_v16 = vpop.f32.mrb[168].mxu1  ;;  %v7696_v44 = vpop.f32.mrb[192].mxu0 }
 0x387   : > { %v7657_v3 = vpop.f32.mrb[169].mxu1  ;;  %v7697_v13 = vpop.f32.mrb[193].mxu0 }
 0x388   : > { %v7658_v42 = vadd.f32 %v7657_v3, %v7656_v16  ;;  %v7698_v21 = vadd.f32 %v7697_v13, %v7696_v44  ;;  %v7659_v56 = vpop.f32.mrb[170].mxu1  ;;  %v7699_v26 = vpop.f32.mrb[194].mxu0  ;;  %v5049_v16 = vsel %vm10002_vm6, %v5047_v8, %v5048_v33 }
 0x389   : > { %v7660_v46 = vpop.f32.mrb[171].mxu1  ;;  %v7700_v55 = vpop.f32.mrb[195].mxu0 }
 0x38a   : > { %v10637_v22 = vadd.f32 %v7658_v42, %v10573_v6  ;;  %v10640_v34 = vadd.f32 %v7698_v21, %v11201_v1  ;;  %v7661_v9 = vadd.f32 %v7660_v46, %v7659_v56  ;;  %v7701_v35 = vadd.f32 %v7700_v55, %v7699_v26 }
 0x38b   : > { %5781 = vmatmul.mubr.bf16.gmra.mrb[44].mxu0 %v10454_v49  ;;  %6079 = vmatmul.mubr.bf16.gmra.mrb[20].mxu1 %v10383_v29  ;;  %v5046_v6 = vsel %vm10002_vm6, %v6869_v2, %v5045_v58 }
 0x38c   : > { %v10645_v53 = vadd.f32 %v7661_v9, %v10581_v31  ;;  %v10648_v25 = vadd.f32 %v7701_v35, %v11202_v48  ;;  %5788 = vmatprep.mubr.bf16.mxu0 %v10456_v5  ;;  %6086 = vmatprep.mubr.bf16.mxu1 %v10385_v57  ;;  %v10656_v56 = vcombine.high %v5046_v6, %v5049_v16 }
 0x38d   : > { %v10674_v9 = vcombine.low %v5046_v6, %v5049_v16 }
 0x38e   : > { %v7662_v44 = vpop.f32.mrb[172].mxu1  ;;  %v7702_v18 = vpop.f32.mrb[196].mxu0 }
 0x38f   : > { %v7663_v3 = vpop.f32.mrb[173].mxu1  ;;  %v7703_v29 = vpop.f32.mrb[197].mxu0 }
 0x390   : > { %v7664_v13 = vadd.f32 %v7663_v3, %v7662_v44  ;;  %v7704_v31 = vadd.f32 %v7703_v29, %v7702_v18  ;;  %v7665_v42 = vpop.f32.mrb[174].mxu1  ;;  %v7705_v21 = vpop.f32.mrb[198].mxu0 }
 0x391   : > { %v7666_v26 = vpop.f32.mrb[175].mxu1  ;;  %v7706_v46 = vpop.f32.mrb[199].mxu0 }
 0x392   : > { %v10659_v57 = vadd.f32 %v7664_v13, %v10589_v45  ;;  %v10662_v58 = vadd.f32 %v7704_v31, %v10462_v38  ;;  %v7667_v55 = vadd.f32 %v7666_v26, %v7665_v42  ;;  %v7707_v2 = vadd.f32 %v7706_v46, %v7705_v21 }
 0x393   : > { %5789 = vmatmul.mubr.bf16.gmra.mrb[48].mxu0 %v10474_v11  ;;  %6087 = vmatmul.mubr.bf16.gmra.mrb[24].mxu1 %v10406_v0 }
 0x394   : > { %v10667_v8 = vadd.f32 %v7667_v55, %v10597_v14  ;;  %v10670_v28 = vadd.f32 %v7707_v2, %v10470_v30  ;;  %5796 = vmatprep.mubr.bf16.mxu0 %v10656_v56  ;;  %6094 = vmatprep.mubr.bf16.mxu1 %v11197_v59 }
 0x396   : > { %v7708_v45 = vpop.f32.mrb[200].mxu0  ;;  %v7796_v33 = vpop.f32.mrb[176].mxu1 }
 0x397   : > { %v7709_v38 = vpop.f32.mrb[201].mxu0  ;;  %v7797_v1 = vpop.f32.mrb[177].mxu1 }
 0x398   : > { %v7710_v35 = vadd.f32 %v7709_v38, %v7708_v45  ;;  %v7798_v48 = vadd.f32 %v7797_v1, %v7796_v33  ;;  %v7711_v44 = vpop.f32.mrb[202].mxu0  ;;  %v7799_v0 = vpop.f32.mrb[178].mxu1  ;;  %v11203_v38 = vld [vmem:[#allocation24_spill] sm:$0xff] }
 0x399   : > { %v7712_v18 = vpop.f32.mrb[203].mxu0  ;;  %v7800_v14 = vpop.f32.mrb[179].mxu1  ;;  %v5052_v1 = vrot.slane %v11203_v38, 5 }
 0x39a   : > { %v10677_v3 = vadd.f32 %v7710_v35, %v10480_v7  ;;  %v10680_v30 = vadd.f32 %v7798_v48, %v10608_v39  ;;  %v7713_v29 = vadd.f32 %v7712_v18, %v7711_v44  ;;  %v7801_v59 = vadd.f32 %v7800_v14, %v7799_v0  ;;  %v4873_v48 = vld [vmem:[#allocation2 + $0x198] sm:$0xee] }
 0x39b   : > { %5797 = vmatmul.mubr.bf16.gmra.mrb[52].mxu0 %v10674_v9  ;;  %6095 = vmatmul.mubr.bf16.gmra.mrb[28].mxu1 %v10430_v20 }
 0x39c   : > { %v10685_v6 = vadd.f32 %v7713_v29, %v10488_v54  ;;  %v10688_v16 = vadd.f32 %v7801_v59, %v10616_v52  ;;  %6102 = vmatprep.mubr.bf16.mxu1 %v11200_v23 }
 0x39e   : > { %v7714_v13 = vpop.f32.mrb[204].mxu0  ;;  %v7802_v7 = vpop.f32.mrb[180].mxu1 }
 0x39f   : > { %v7715_v31 = vpop.f32.mrb[205].mxu0  ;;  %v7803_v42 = vpop.f32.mrb[181].mxu1 }
 0x3a0   : > { %v7716_v39 = vadd.f32 %v7715_v31, %v7714_v13  ;;  %v7804_v21 = vadd.f32 %v7803_v42, %v7802_v7  ;;  %v7717_v26 = vpop.f32.mrb[206].mxu0  ;;  %v7805_v46 = vpop.f32.mrb[182].mxu1  ;;  %v5054_v13 = vrot.slane %v5052_v1, 4  ;;  %v11204_v7 = vld [vmem:[#allocation19_spill] sm:$0xff] }
 0x3a1   : > { %v7718_v55 = vpop.f32.mrb[207].mxu0  ;;  %v7806_v2 = vpop.f32.mrb[183].mxu1 }
 0x3a2   : > { %v10692_v20 = vadd.f32 %v7716_v39, %v10496_v62  ;;  %v10695_v54 = vadd.f32 %v7804_v21, %v10624_v61  ;;  %v7719_v52 = vadd.f32 %v7718_v55, %v7717_v26  ;;  %v7807_v45 = vadd.f32 %v7806_v2, %v7805_v46 }
 0x3a3   : > { %6103 = vmatmul.mubr.bf16.gmra.mrb[32].mxu1 %v10454_v49 }
 0x3a4   : > { %v10699_v23 = vadd.f32 %v7719_v52, %v10504_v50  ;;  %v10702_v33 = vadd.f32 %v7807_v45, %v10632_v15  ;;  %6110 = vmatprep.mubr.bf16.mxu1 %v10456_v5  ;;  %v6870_v50 = vrot.slane %v4873_v48, 9  ;;  %v5055_v15 = vrot.slane %v11204_v7, 5 }
 0x3a6   : > { %v7720_v35 = vpop.f32.mrb[208].mxu0  ;;  %v7808_v62 = vpop.f32.mrb[184].mxu1  ;;  %v5053_v46 = vsel %vm10002_vm6, %v6870_v50, %v5052_v1 }
 0x3a7   : > { %v7721_v44 = vpop.f32.mrb[209].mxu0  ;;  %v7809_v61 = vpop.f32.mrb[185].mxu1 }
 0x3a8   : > { %v7722_v0 = vadd.f32 %v7721_v44, %v7720_v35  ;;  %v7810_v18 = vadd.f32 %v7809_v61, %v7808_v62  ;;  %v7723_v14 = vpop.f32.mrb[210].mxu0  ;;  %v7811_v29 = vpop.f32.mrb[186].mxu1 }
 0x3a9   : > { %v7724_v49 = vpop.f32.mrb[211].mxu0  ;;  %v7812_v59 = vpop.f32.mrb[187].mxu1 }
 0x3aa   : > { %v10708_v31 = vadd.f32 %v7722_v0, %v10512_v37  ;;  %v10711_v5 = vadd.f32 %v7810_v18, %v10640_v34  ;;  %v7725_v42 = vadd.f32 %v7724_v49, %v7723_v14  ;;  %v7813_v39 = vadd.f32 %v7812_v59, %v7811_v29 }
 0x3ab   : > { %6111 = vmatmul.mubr.bf16.gmra.mrb[36].mxu1 %v10474_v11  ;;  %v5056_v37 = vsel %vm10002_vm6, %v5054_v13, %v5055_v15 }
 0x3ac   : > { %v10715_v21 = vadd.f32 %v7725_v42, %v10520_v43  ;;  %v10718_v26 = vadd.f32 %v7813_v39, %v10648_v25  ;;  %6118 = vmatprep.mubr.bf16.mxu1 %v10656_v56  ;;  %v7034_v35 = vcombine.high %v5053_v46, %v5056_v37 }
 0x3ae   : > { %v7726_v34 = vpop.f32.mrb[212].mxu0  ;;  %v7814_v55 = vpop.f32.mrb[188].mxu1 }
 0x3af   : > { %v7727_v2 = vpop.f32.mrb[213].mxu0  ;;  %v7815_v52 = vpop.f32.mrb[189].mxu1 }
 0x3b0   : > { %v7728_v45 = vadd.f32 %v7727_v2, %v7726_v34  ;;  %v7816_v11 = vadd.f32 %v7815_v52, %v7814_v55  ;;  %v7729_v38 = vpop.f32.mrb[214].mxu0  ;;  %v7817_v43 = vpop.f32.mrb[190].mxu1 }
 0x3b1   : > { %v7730_v62 = vpop.f32.mrb[215].mxu0  ;;  %v7818_v25 = vpop.f32.mrb[191].mxu1 }
 0x3b2   : > { %v10726_v48 = vadd.f32 %v7728_v45, %v10528_v4  ;;  %v10729_v56 = vadd.f32 %v7816_v11, %v10662_v58  ;;  %v7731_v1 = vadd.f32 %v7730_v62, %v7729_v38  ;;  %v7819_v47 = vadd.f32 %v7818_v25, %v7817_v43 }
 0x3b3   : > { %6119 = vmatmul.mubr.bf16.gmra.mrb[40].mxu1 %v10674_v9  ;;  %v7033_v4 = vcombine.low %v5053_v46, %v5056_v37 }
 0x3b4   : > { %v10733_v44 = vadd.f32 %v7731_v1, %v10536_v40  ;;  %v10736_v61 = vadd.f32 %v7819_v47, %v10670_v28  ;;  %6126 = vmatprep.mubr.bf16.mxu1 %v7034_v35 }
 0x3b6   : > { %v7732_v0 = vpop.f32.mrb[216].mxu0  ;;  %v7820_v18 = vpop.f32.mrb[192].mxu1 }
 0x3b7   : > { %v7733_v14 = vpop.f32.mrb[217].mxu0  ;;  %v7821_v29 = vpop.f32.mrb[193].mxu1 }
 0x3b8   : > { %v7734_v49 = vadd.f32 %v7733_v14, %v7732_v0  ;;  %v7822_v59 = vadd.f32 %v7821_v29, %v7820_v18  ;;  %v7735_v58 = vpop.f32.mrb[218].mxu0  ;;  %v7823_v50 = vpop.f32.mrb[194].mxu1 }
 0x3b9   : > { %v7736_v13 = vpop.f32.mrb[219].mxu0  ;;  %v7824_v7 = vpop.f32.mrb[195].mxu1 }
 0x3ba   : > { %v10739_v9 = vadd.f32 %v7734_v49, %v10544_v17  ;;  %v10742_v40 = vadd.f32 %v7822_v59, %v10677_v3  ;;  %v7737_v28 = vadd.f32 %v7736_v13, %v7735_v58  ;;  %v7825_v15 = vadd.f32 %v7824_v7, %v7823_v50 }
 0x3bb   : > { %6127 = vmatmul.mubr.bf16.gmra.mrb[44].mxu1 %v7033_v4 }
 0x3bc   : > { %v10745_v42 = vadd.f32 %v7737_v28, %v10552_v32  ;;  %v10748_v39 = vadd.f32 %v7825_v15, %v10685_v6 }
 0x3be   : > { %v7738_v46 = vpop.f32.mrb[220].mxu0  ;;  %v7826_v37 = vpop.f32.mrb[196].mxu1 }
 0x3bf   : > { %v7739_v34 = vpop.f32.mrb[221].mxu0  ;;  %v7827_v55 = vpop.f32.mrb[197].mxu1 }
 0x3c0   : > { %v7740_v2 = vadd.f32 %v7739_v34, %v7738_v46  ;;  %v7828_v52 = vadd.f32 %v7827_v55, %v7826_v37  ;;  %v7741_v17 = vpop.f32.mrb[222].mxu0  ;;  %v7829_v45 = vpop.f32.mrb[198].mxu1 }
 0x3c1   : > { %v7742_v11 = vpop.f32.mrb[223].mxu0  ;;  %v7830_v3 = vpop.f32.mrb[199].mxu1 }
 0x3c2   : > { %v10751_v38 = vadd.f32 %v7740_v2, %v10560_v12  ;;  %v10754_v43 = vadd.f32 %v7828_v52, %v10692_v20  ;;  %v7743_v32 = vadd.f32 %v7742_v11, %v7741_v17  ;;  %v7831_v35 = vadd.f32 %v7830_v3, %v7829_v45 }
 0x3c4   : > { %v10757_v6 = vadd.f32 %v7743_v32, %v10568_v10  ;;  %v10760_v62 = vadd.f32 %v7831_v35, %v10699_v23 }
 0x3c6   : > { %v7744_v25 = vpop.f32.mrb[224].mxu0  ;;  %v7832_v1 = vpop.f32.mrb[200].mxu1 }
 0x3c7   : > { %v7745_v47 = vpop.f32.mrb[225].mxu0  ;;  %v7833_v0 = vpop.f32.mrb[201].mxu1 }
 0x3c8   : > { %v7746_v18 = vadd.f32 %v7745_v47, %v7744_v25  ;;  %v7834_v14 = vadd.f32 %v7833_v0, %v7832_v1  ;;  %v7747_v29 = vpop.f32.mrb[226].mxu0  ;;  %v7835_v12 = vpop.f32.mrb[202].mxu1 }
 0x3c9   : > { %v7748_v4 = vpop.f32.mrb[227].mxu0  ;;  %v7836_v49 = vpop.f32.mrb[203].mxu1 }
 0x3ca   : > { %v10763_v20 = vadd.f32 %v7746_v18, %v10576_v36  ;;  %v10766_v59 = vadd.f32 %v7834_v14, %v10708_v31  ;;  %v7749_v10 = vadd.f32 %v7748_v4, %v7747_v29  ;;  %v7837_v58 = vadd.f32 %v7836_v49, %v7835_v12 }
 0x3cc   : > { %v10769_v23 = vadd.f32 %v7749_v10, %v10584_v24  ;;  %v10772_v50 = vadd.f32 %v7837_v58, %v10715_v21 }
 0x3ce   : > { %v7750_v13 = vpop.f32.mrb[228].mxu0  ;;  %v7838_v7 = vpop.f32.mrb[204].mxu1 }
 0x3cf   : > { %v7751_v28 = vpop.f32.mrb[229].mxu0  ;;  %v7839_v15 = vpop.f32.mrb[205].mxu1 }
 0x3d0   : > { %v7752_v46 = vadd.f32 %v7751_v28, %v7750_v13  ;;  %v7840_v37 = vadd.f32 %v7839_v15, %v7838_v7  ;;  %v7753_v34 = vpop.f32.mrb[230].mxu0  ;;  %v7841_v36 = vpop.f32.mrb[206].mxu1 }
 0x3d1   : > { %v7754_v55 = vpop.f32.mrb[231].mxu0  ;;  %v7842_v2 = vpop.f32.mrb[207].mxu1 }
 0x3d2   : > { %v10775_v31 = vadd.f32 %v7752_v46, %v10592_v27  ;;  %v10778_v52 = vadd.f32 %v7840_v37, %v10726_v48  ;;  %v7755_v24 = vadd.f32 %v7754_v55, %v7753_v34  ;;  %v7843_v17 = vadd.f32 %v7842_v2, %v7841_v36 }
 0x3d4   : > { %v10781_v21 = vadd.f32 %v7755_v24, %v10600_v51  ;;  %v10784_v45 = vadd.f32 %v7843_v17, %v10733_v44 }
 0x3d6   : > { %v7756_v11 = vpop.f32.mrb[232].mxu0  ;;  %v7844_v3 = vpop.f32.mrb[208].mxu1 }
 0x3d7   : > { %v7757_v32 = vpop.f32.mrb[233].mxu0  ;;  %v7845_v35 = vpop.f32.mrb[209].mxu1 }
 0x3d8   : > { %v7758_v25 = vadd.f32 %v7757_v32, %v7756_v11  ;;  %v7846_v1 = vadd.f32 %v7845_v35, %v7844_v3  ;;  %v7759_v47 = vpop.f32.mrb[234].mxu0  ;;  %v7847_v27 = vpop.f32.mrb[210].mxu1 }
 0x3d9   : > { %v7760_v0 = vpop.f32.mrb[235].mxu0  ;;  %v7848_v18 = vpop.f32.mrb[211].mxu1 }
 0x3da   : > { %v10787_v48 = vadd.f32 %v7758_v25, %v10605_v19  ;;  %v10790_v14 = vadd.f32 %v7846_v1, %v10739_v9  ;;  %v7761_v51 = vadd.f32 %v7760_v0, %v7759_v47  ;;  %v7849_v29 = vadd.f32 %v7848_v18, %v7847_v27 }
 0x3dc   : > { %v10793_v44 = vadd.f32 %v7761_v51, %v10613_v63  ;;  %v10796_v12 = vadd.f32 %v7849_v29, %v10745_v42 }
 0x3de   : > { %v7762_v4 = vpop.f32.mrb[236].mxu0  ;;  %v7850_v49 = vpop.f32.mrb[212].mxu1 }
 0x3df   : > { %v7763_v10 = vpop.f32.mrb[237].mxu0  ;;  %v7851_v58 = vpop.f32.mrb[213].mxu1 }
 0x3e0   : > { %v7764_v13 = vadd.f32 %v7763_v10, %v7762_v4  ;;  %v7852_v7 = vadd.f32 %v7851_v58, %v7850_v49  ;;  %v7765_v28 = vpop.f32.mrb[238].mxu0  ;;  %v7853_v19 = vpop.f32.mrb[214].mxu1 }
 0x3e1   : > { %v7766_v15 = vpop.f32.mrb[239].mxu0  ;;  %v7854_v46 = vpop.f32.mrb[215].mxu1 }
 0x3e2   : > { %v10799_v9 = vadd.f32 %v7764_v13, %v10621_v41  ;;  %v10802_v37 = vadd.f32 %v7852_v7, %v10751_v38  ;;  %v7767_v63 = vadd.f32 %v7766_v15, %v7765_v28  ;;  %v7855_v34 = vadd.f32 %v7854_v46, %v7853_v19 }
 0x3e4   : > { %v10805_v42 = vadd.f32 %v7767_v63, %v10629_v60  ;;  %v10808_v36 = vadd.f32 %v7855_v34, %v10757_v6 }
 0x3e6   : > { %v7768_v55 = vpop.f32.mrb[240].mxu0  ;;  %v7856_v2 = vpop.f32.mrb[216].mxu1 }
 0x3e7   : > { %v7769_v24 = vpop.f32.mrb[241].mxu0  ;;  %v7857_v17 = vpop.f32.mrb[217].mxu1 }
 0x3e8   : > { %v7770_v11 = vadd.f32 %v7769_v24, %v7768_v55  ;;  %v7858_v3 = vadd.f32 %v7857_v17, %v7856_v2  ;;  %v7771_v32 = vpop.f32.mrb[242].mxu0  ;;  %v7859_v41 = vpop.f32.mrb[218].mxu1 }
 0x3e9   : > { %v7772_v35 = vpop.f32.mrb[243].mxu0  ;;  %v7860_v25 = vpop.f32.mrb[219].mxu1 }
 0x3ea   : > { %v10811_v38 = vadd.f32 %v7770_v11, %v10637_v22  ;;  %v10814_v1 = vadd.f32 %v7858_v3, %v10763_v20  ;;  %v7773_v60 = vadd.f32 %v7772_v35, %v7771_v32  ;;  %v7861_v47 = vadd.f32 %v7860_v25, %v7859_v41 }
 0x3ec   : > { %v10817_v6 = vadd.f32 %v7773_v60, %v10645_v53  ;;  %v10820_v27 = vadd.f32 %v7861_v47, %v10769_v23 }
 0x3ee   : > { %v7774_v0 = vpop.f32.mrb[244].mxu0  ;;  %v7862_v18 = vpop.f32.mrb[220].mxu1 }
 0x3ef   : > { %v7775_v51 = vpop.f32.mrb[245].mxu0  ;;  %v7863_v29 = vpop.f32.mrb[221].mxu1 }
 0x3f0   : > { %v7776_v4 = vadd.f32 %v7775_v51, %v7774_v0  ;;  %v7864_v49 = vadd.f32 %v7863_v29, %v7862_v18  ;;  %v7777_v10 = vpop.f32.mrb[246].mxu0  ;;  %v7865_v22 = vpop.f32.mrb[222].mxu1 }
 0x3f1   : > { %v7778_v58 = vpop.f32.mrb[247].mxu0  ;;  %v7866_v13 = vpop.f32.mrb[223].mxu1 }
 0x3f2   : > { %v10823_v20 = vadd.f32 %v7776_v4, %v10659_v57  ;;  %v10826_v7 = vadd.f32 %v7864_v49, %v10775_v31  ;;  %v7779_v53 = vadd.f32 %v7778_v58, %v7777_v10  ;;  %v7867_v28 = vadd.f32 %v7866_v13, %v7865_v22 }
 0x3f4   : > { %v10829_v23 = vadd.f32 %v7779_v53, %v10667_v8  ;;  %v10832_v19 = vadd.f32 %v7867_v28, %v10781_v21 }
 0x3f6   : > { %v7868_v15 = vpop.f32.mrb[224].mxu1  ;;  %v7908_v46 = vpop.f32.mrb[248].mxu0 }
 0x3f7   : > { %v7869_v63 = vpop.f32.mrb[225].mxu1  ;;  %v7909_v34 = vpop.f32.mrb[249].mxu0 }
 0x3f8   : > { %v7870_v55 = vadd.f32 %v7869_v63, %v7868_v15  ;;  %v7910_v2 = vadd.f32 %v7909_v34, %v7908_v46  ;;  %v7871_v24 = vpop.f32.mrb[226].mxu1  ;;  %v7911_v57 = vpop.f32.mrb[250].mxu0 }
 0x3f9   : > { %v7872_v17 = vpop.f32.mrb[227].mxu1  ;;  %v7912_v11 = vpop.f32.mrb[251].mxu0 }
 0x3fa   : > { %v10835_v31 = vadd.f32 %v7870_v55, %v10787_v48  ;;  %v10838_v3 = vadd.f32 %v7910_v2, %v10680_v30  ;;  %v7873_v8 = vadd.f32 %v7872_v17, %v7871_v24  ;;  %v7913_v32 = vadd.f32 %v7912_v11, %v7911_v57 }
 0x3fc   : > { %v10841_v21 = vadd.f32 %v7873_v8, %v10793_v44  ;;  %v10844_v41 = vadd.f32 %v7913_v32, %v10688_v16 }
 0x3fe   : > { %v7874_v35 = vpop.f32.mrb[228].mxu1  ;;  %v7914_v25 = vpop.f32.mrb[252].mxu0 }
 0x3ff   : > { %v7875_v60 = vpop.f32.mrb[229].mxu1  ;;  %v7915_v47 = vpop.f32.mrb[253].mxu0 }
 0x400   : > { %v7876_v0 = vadd.f32 %v7875_v60, %v7874_v35  ;;  %v7916_v18 = vadd.f32 %v7915_v47, %v7914_v25  ;;  %v7877_v51 = vpop.f32.mrb[230].mxu1  ;;  %v7917_v48 = vpop.f32.mrb[254].mxu0 }
 0x401   : > { %v7878_v29 = vpop.f32.mrb[231].mxu1  ;;  %v7918_v4 = vpop.f32.mrb[255].mxu0 }
 0x402   : > { %v10847_v30 = vadd.f32 %v7876_v0, %v10799_v9  ;;  %v10850_v49 = vadd.f32 %v7916_v18, %v10695_v54  ;;  %v7879_v44 = vadd.f32 %v7878_v29, %v7877_v51  ;;  %v7919_v10 = vadd.f32 %v7918_v4, %v7917_v48 }
 0x404   : > { %v10853_v16 = vadd.f32 %v7879_v44, %v10805_v42  ;;  %v10856_v22 = vadd.f32 %v7919_v10, %v10702_v33 }
 0x406   : > { %v7880_v58 = vpop.f32.mrb[232].mxu1  ;;  %v7920_v13 = vpop.f32.mrb[0].mxu0 }
 0x407   : > { %v7881_v53 = vpop.f32.mrb[233].mxu1  ;;  %v7921_v28 = vpop.f32.mrb[1].mxu0 }
 0x408   : > { %v7882_v15 = vadd.f32 %v7881_v53, %v7880_v58  ;;  %v7922_v46 = vadd.f32 %v7921_v28, %v7920_v13  ;;  %v7883_v63 = vpop.f32.mrb[234].mxu1  ;;  %v7923_v9 = vpop.f32.mrb[2].mxu0 }
 0x409   : > { %v7884_v34 = vpop.f32.mrb[235].mxu1  ;;  %v7924_v55 = vpop.f32.mrb[3].mxu0 }
 0x40a   : > { %v10859_v54 = vadd.f32 %v7882_v15, %v10811_v38  ;;  %v10862_v2 = vadd.f32 %v7922_v46, %v10711_v5  ;;  %v7885_v42 = vadd.f32 %v7884_v34, %v7883_v63  ;;  %v7925_v24 = vadd.f32 %v7924_v55, %v7923_v9 }
 0x40c   : > { %v10865_v33 = vadd.f32 %v7885_v42, %v10817_v6  ;;  %v10868_v57 = vadd.f32 %v7925_v24, %v10718_v26 }
 0x40e   : > { %v7886_v17 = vpop.f32.mrb[236].mxu1  ;;  %v7926_v11 = vpop.f32.mrb[4].mxu0 }
 0x40f   : > { %v7887_v8 = vpop.f32.mrb[237].mxu1  ;;  %v7927_v32 = vpop.f32.mrb[5].mxu0 }
 0x410   : > { %v7888_v35 = vadd.f32 %v7887_v8, %v7886_v17  ;;  %v7928_v25 = vadd.f32 %v7927_v32, %v7926_v11  ;;  %v7889_v60 = vpop.f32.mrb[238].mxu1  ;;  %v7929_v38 = vpop.f32.mrb[6].mxu0 }
 0x411   : > { %v7890_v47 = vpop.f32.mrb[239].mxu1  ;;  %v7930_v0 = vpop.f32.mrb[7].mxu0 }
 0x412   : > { %v10871_v5 = vadd.f32 %v7888_v35, %v10823_v20  ;;  %v10874_v18 = vadd.f32 %v7928_v25, %v10729_v56  ;;  %v7891_v6 = vadd.f32 %v7890_v47, %v7889_v60  ;;  %v7931_v51 = vadd.f32 %v7930_v0, %v7929_v38  ;;  %v10885_v56 = vld [vmem:[%s11071_s7] ss:$0 sm:$0xff] }
 0x414   : > { %v10877_v26 = vadd.f32 %v7891_v6, %v10829_v23  ;;  %v10880_v48 = vadd.f32 %v7931_v51, %v10736_v61 }
 0x416   : > { %v7932_v29 = vpop.f32.mrb[8].mxu0  ;;  %v8020_v4 = vpop.f32.mrb[240].mxu1 }
 0x417   : > { %v7933_v44 = vpop.f32.mrb[9].mxu0  ;;  %v8021_v10 = vpop.f32.mrb[241].mxu1 }
 0x418   : > { %v7934_v58 = vadd.f32 %v7933_v44, %v7932_v29  ;;  %v8022_v13 = vadd.f32 %v8021_v10, %v8020_v4  ;;  %v7935_v53 = vpop.f32.mrb[10].mxu0  ;;  %v8023_v20 = vpop.f32.mrb[242].mxu1 }
 0x419   : > { %v7936_v28 = vpop.f32.mrb[11].mxu0  ;;  %v8024_v23 = vpop.f32.mrb[243].mxu1 }
 0x41a   : > { %v10888_v15 = vadd.f32 %v7934_v58, %v10742_v40  ;;  %v6135_v61 = vadd.f32 %v8022_v13, %v10838_v3  ;;  %v7937_v46 = vadd.f32 %v7936_v28, %v7935_v53  ;;  %v8025_v63 = vadd.f32 %v8024_v23, %v8023_v20 }
 0x41c   : > { %v6174_v9 = vadd.f32 %v10885_v56, %v6135_v61  ;;  %v10893_v34 = vadd.f32 %v7937_v46, %v10748_v39  ;;  %v6136_v55 = vadd.f32 %v8025_v63, %v10844_v41 }
 0x41e   : > { %v6206_v42 = vmax.f32 %v6174_v9, 0.0  ;;  %v6175_v24 = vadd.f32 %v10885_v56, %v6136_v55  ;;  %v7938_v17 = vpop.f32.mrb[12].mxu0  ;;  %v8026_v11 = vpop.f32.mrb[244].mxu1 }
 0x41f   : > { %v7939_v8 = vpop.f32.mrb[13].mxu0  ;;  %v8027_v40 = vpop.f32.mrb[245].mxu1 }
 0x420   : > { %6238 = vst [vmem:[%s8668_s19] sm:$0xff] %v6206_v42  ;;  %v6207_v32 = vmax.f32 %v6175_v24, 0.0  ;;  %v7940_v3 = vadd.f32 %v7939_v8, %v7938_v17  ;;  %v8028_v35 = vadd.f32 %v8027_v40, %v8026_v11  ;;  %v7941_v25 = vpop.f32.mrb[14].mxu0  ;;  %v8029_v60 = vpop.f32.mrb[246].mxu1 }
 0x421   : > { %v7942_v38 = vpop.f32.mrb[15].mxu0  ;;  %v8030_v39 = vpop.f32.mrb[247].mxu1 }
 0x422   : > { %6239 = vst [vmem:[%s8668_s19 + $0x8] sm:$0xff] %v6207_v32  ;;  %v10900_v47 = vadd.f32 %v7940_v3, %v10754_v43  ;;  %v6137_v41 = vadd.f32 %v8028_v35, %v10850_v49  ;;  %v7943_v0 = vadd.f32 %v7942_v38, %v7941_v25  ;;  %v8031_v6 = vadd.f32 %v8030_v39, %v8029_v60 }
 0x424   : > { %v6176_v51 = vadd.f32 %v10885_v56, %v6137_v41  ;;  %v10905_v29 = vadd.f32 %v7943_v0, %v10760_v62  ;;  %v6138_v4 = vadd.f32 %v8031_v6, %v10856_v22 }
 0x426   : > { %v6208_v44 = vmax.f32 %v6176_v51, 0.0  ;;  %v6177_v10 = vadd.f32 %v10885_v56, %v6138_v4  ;;  %v7944_v58 = vpop.f32.mrb[16].mxu0  ;;  %v8032_v13 = vpop.f32.mrb[248].mxu1 }
 0x427   : > { %v7945_v53 = vpop.f32.mrb[17].mxu0  ;;  %v8033_v43 = vpop.f32.mrb[249].mxu1 }
 0x428   : > { %6240 = vst [vmem:[%s8668_s19 + $0x10] sm:$0xff] %v6208_v44  ;;  %v6209_v20 = vmax.f32 %v6177_v10, 0.0  ;;  %v7946_v49 = vadd.f32 %v7945_v53, %v7944_v58  ;;  %v8034_v28 = vadd.f32 %v8033_v43, %v8032_v13  ;;  %v7947_v23 = vpop.f32.mrb[18].mxu0  ;;  %v8035_v61 = vpop.f32.mrb[250].mxu1 }
 0x429   : > { %v7948_v46 = vpop.f32.mrb[19].mxu0  ;;  %v8036_v62 = vpop.f32.mrb[251].mxu1 }
 0x42a   : > { %6241 = vst [vmem:[%s8668_s19 + $0x18] sm:$0xff] %v6209_v20  ;;  %v10912_v63 = vadd.f32 %v7946_v49, %v10766_v59  ;;  %v6139_v22 = vadd.f32 %v8034_v28, %v10862_v2  ;;  %v7949_v9 = vadd.f32 %v7948_v46, %v7947_v23  ;;  %v8037_v55 = vadd.f32 %v8036_v62, %v8035_v61 }
 0x42c   : > { %v6178_v42 = vadd.f32 %v10885_v56, %v6139_v22  ;;  %v10917_v24 = vadd.f32 %v7949_v9, %v10772_v50  ;;  %v6140_v17 = vadd.f32 %v8037_v55, %v10868_v57 }
 0x42e   : > { %v6210_v11 = vmax.f32 %v6178_v42, 0.0  ;;  %v6179_v8 = vadd.f32 %v10885_v56, %v6140_v17  ;;  %v7950_v40 = vpop.f32.mrb[20].mxu0  ;;  %v8038_v32 = vpop.f32.mrb[252].mxu1 }
 0x42f   : > { %v7951_v3 = vpop.f32.mrb[21].mxu0  ;;  %v8039_v59 = vpop.f32.mrb[253].mxu1 }
 0x430   : > { %6242 = vst [vmem:[%s8668_s19 + $0x20] sm:$0xff] %v6210_v11  ;;  %v6211_v35 = vmax.f32 %v6179_v8, 0.0  ;;  %v7952_v2 = vadd.f32 %v7951_v3, %v7950_v40  ;;  %v8040_v25 = vadd.f32 %v8039_v59, %v8038_v32  ;;  %v7953_v60 = vpop.f32.mrb[22].mxu0  ;;  %v8041_v38 = vpop.f32.mrb[254].mxu1 }
 0x431   : > { %v7954_v39 = vpop.f32.mrb[23].mxu0  ;;  %v8042_v50 = vpop.f32.mrb[255].mxu1 }
 0x432   : > { %6243 = vst [vmem:[%s8668_s19 + $0x28] sm:$0xff] %v6211_v35  ;;  %v10924_v41 = vadd.f32 %v7952_v2, %v10778_v52  ;;  %v6141_v57 = vadd.f32 %v8040_v25, %v10874_v18  ;;  %v7955_v0 = vadd.f32 %v7954_v39, %v7953_v60  ;;  %v8043_v6 = vadd.f32 %v8042_v50, %v8041_v38 }
 0x434   : > { %v6180_v51 = vadd.f32 %v10885_v56, %v6141_v57  ;;  %v10929_v4 = vadd.f32 %v7955_v0, %v10784_v45  ;;  %v6142_v44 = vadd.f32 %v8043_v6, %v10880_v48 }
 0x436   : > { %v6212_v10 = vmax.f32 %v6180_v51, 0.0  ;;  %v6181_v58 = vadd.f32 %v10885_v56, %v6142_v44  ;;  %v7956_v13 = vpop.f32.mrb[24].mxu0  ;;  %v8044_v53 = vpop.f32.mrb[0].mxu1 }
 0x437   : > { %v7957_v43 = vpop.f32.mrb[25].mxu0  ;;  %v8045_v52 = vpop.f32.mrb[1].mxu1 }
 0x438   : > { %6244 = vst [vmem:[%s8668_s19 + $0x30] sm:$0xff] %v6212_v10  ;;  %v6213_v20 = vmax.f32 %v6181_v58, 0.0  ;;  %v7958_v18 = vadd.f32 %v7957_v43, %v7956_v13  ;;  %v8046_v49 = vadd.f32 %v8045_v52, %v8044_v53  ;;  %v7959_v28 = vpop.f32.mrb[26].mxu0  ;;  %v8047_v23 = vpop.f32.mrb[2].mxu1 }
 0x439   : > { %v7960_v61 = vpop.f32.mrb[27].mxu0  ;;  %v8048_v45 = vpop.f32.mrb[3].mxu1 }
 0x43a   : > { %6245 = vst [vmem:[%s8668_s19 + $0x38] sm:$0xff] %v6213_v20  ;;  %v10936_v46 = vadd.f32 %v7958_v18, %v10790_v14  ;;  %v6143_v48 = vadd.f32 %v8046_v49, %v10888_v15  ;;  %v7961_v62 = vadd.f32 %v7960_v61, %v7959_v28  ;;  %v8049_v22 = vadd.f32 %v8048_v45, %v8047_v23 }
 0x43c   : > { %v6182_v9 = vadd.f32 %v10885_v56, %v6143_v48  ;;  %v10941_v55 = vadd.f32 %v7961_v62, %v10796_v12  ;;  %v6144_v42 = vadd.f32 %v8049_v22, %v10893_v34 }
 0x43e   : > { %v6214_v17 = vmax.f32 %v6182_v9, 0.0  ;;  %v6183_v11 = vadd.f32 %v10885_v56, %v6144_v42  ;;  %v7962_v8 = vpop.f32.mrb[28].mxu0  ;;  %v8050_v40 = vpop.f32.mrb[4].mxu1 }
 0x43f   : > { %v7963_v32 = vpop.f32.mrb[29].mxu0  ;;  %v8051_v14 = vpop.f32.mrb[5].mxu1 }
 0x440   : > { %6246 = vst [vmem:[%s8668_s19 + $0x40] sm:$0xff] %v6214_v17  ;;  %v6215_v3 = vmax.f32 %v6183_v11, 0.0  ;;  %v7964_v15 = vadd.f32 %v7963_v32, %v7962_v8  ;;  %v8052_v59 = vadd.f32 %v8051_v14, %v8050_v40  ;;  %v7965_v35 = vpop.f32.mrb[30].mxu0  ;;  %v8053_v2 = vpop.f32.mrb[6].mxu1 }
 0x441   : > { %v7966_v25 = vpop.f32.mrb[31].mxu0  ;;  %v8054_v12 = vpop.f32.mrb[7].mxu1 }
 0x442   : > { %6247 = vst [vmem:[%s8668_s19 + $0x48] sm:$0xff] %v6215_v3  ;;  %v10948_v60 = vadd.f32 %v7964_v15, %v10802_v37  ;;  %v6145_v34 = vadd.f32 %v8052_v59, %v10900_v47  ;;  %v7967_v38 = vadd.f32 %v7966_v25, %v7965_v35  ;;  %v8055_v39 = vadd.f32 %v8054_v12, %v8053_v2 }
 0x444   : > { %v6184_v50 = vadd.f32 %v10885_v56, %v6145_v34  ;;  %v10953_v57 = vadd.f32 %v7967_v38, %v10808_v36  ;;  %v6146_v0 = vadd.f32 %v8055_v39, %v10905_v29 }
 0x446   : > { %v6216_v6 = vmax.f32 %v6184_v50, 0.0  ;;  %v6185_v51 = vadd.f32 %v10885_v56, %v6146_v0  ;;  %v7968_v44 = vpop.f32.mrb[32].mxu0  ;;  %v8056_v10 = vpop.f32.mrb[8].mxu1 }
 0x447   : > { %v7969_v58 = vpop.f32.mrb[33].mxu0  ;;  %v8057_v37 = vpop.f32.mrb[9].mxu1 }
 0x448   : > { %6248 = vst [vmem:[%s8668_s19 + $0x50] sm:$0xff] %v6216_v6  ;;  %v6217_v13 = vmax.f32 %v6185_v51, 0.0  ;;  %v7970_v47 = vadd.f32 %v7969_v58, %v7968_v44  ;;  %v8058_v53 = vadd.f32 %v8057_v37, %v8056_v10  ;;  %v7971_v43 = vpop.f32.mrb[34].mxu0  ;;  %v8059_v52 = vpop.f32.mrb[10].mxu1 }
 0x449   : > { %v7972_v20 = vpop.f32.mrb[35].mxu0  ;;  %v8060_v36 = vpop.f32.mrb[11].mxu1 }
 0x44a   : > { %6249 = vst [vmem:[%s8668_s19 + $0x58] sm:$0xff] %v6217_v13  ;;  %v10960_v18 = vadd.f32 %v7970_v47, %v10814_v1  ;;  %v6147_v29 = vadd.f32 %v8058_v53, %v10912_v63  ;;  %v7973_v49 = vadd.f32 %v7972_v20, %v7971_v43  ;;  %v8061_v28 = vadd.f32 %v8060_v36, %v8059_v52 }
 0x44c   : > { %v6186_v23 = vadd.f32 %v10885_v56, %v6147_v29  ;;  %v10965_v61 = vadd.f32 %v7973_v49, %v10820_v27  ;;  %v6148_v45 = vadd.f32 %v8061_v28, %v10917_v24 }
 0x44e   : > { %v6218_v48 = vmax.f32 %v6186_v23, 0.0  ;;  %v6187_v62 = vadd.f32 %v10885_v56, %v6148_v45  ;;  %v7974_v22 = vpop.f32.mrb[36].mxu0  ;;  %v8062_v9 = vpop.f32.mrb[12].mxu1 }
 0x44f   : > { %v7975_v42 = vpop.f32.mrb[37].mxu0  ;;  %v8063_v1 = vpop.f32.mrb[13].mxu1 }
 0x450   : > { %6250 = vst [vmem:[%s8668_s19 + $0x60] sm:$0xff] %v6218_v48  ;;  %v6219_v17 = vmax.f32 %v6187_v62, 0.0  ;;  %v7976_v63 = vadd.f32 %v7975_v42, %v7974_v22  ;;  %v8064_v11 = vadd.f32 %v8063_v1, %v8062_v9  ;;  %v7977_v8 = vpop.f32.mrb[38].mxu0  ;;  %v8065_v40 = vpop.f32.mrb[14].mxu1 }
 0x451   : > { %v7978_v32 = vpop.f32.mrb[39].mxu0  ;;  %v8066_v27 = vpop.f32.mrb[15].mxu1 }
 0x452   : > { %6251 = vst [vmem:[%s8668_s19 + $0x68] sm:$0xff] %v6219_v17  ;;  %v10972_v14 = vadd.f32 %v7976_v63, %v10826_v7  ;;  %v6149_v24 = vadd.f32 %v8064_v11, %v10924_v41  ;;  %v7979_v3 = vadd.f32 %v7978_v32, %v7977_v8  ;;  %v8067_v15 = vadd.f32 %v8066_v27, %v8065_v40 }
 0x454   : > { %v6188_v59 = vadd.f32 %v10885_v56, %v6149_v24  ;;  %v10977_v35 = vadd.f32 %v7979_v3, %v10832_v19  ;;  %v6150_v2 = vadd.f32 %v8067_v15, %v10929_v4 }
 0x456   : > { %v6220_v25 = vmax.f32 %v6188_v59, 0.0  ;;  %v6189_v12 = vadd.f32 %v10885_v56, %v6150_v2  ;;  %v7980_v34 = vpop.f32.mrb[40].mxu0  ;;  %v8068_v38 = vpop.f32.mrb[16].mxu1 }
 0x457   : > { %v7981_v39 = vpop.f32.mrb[41].mxu0  ;;  %v8069_v7 = vpop.f32.mrb[17].mxu1 }
 0x458   : > { %6252 = vst [vmem:[%s8668_s19 + $0x70] sm:$0xff] %v6220_v25  ;;  %v6221_v50 = vmax.f32 %v6189_v12, 0.0  ;;  %v7982_v41 = vadd.f32 %v7981_v39, %v7980_v34  ;;  %v8070_v0 = vadd.f32 %v8069_v7, %v8068_v38  ;;  %v7983_v6 = vpop.f32.mrb[42].mxu0  ;;  %v8071_v51 = vpop.f32.mrb[18].mxu1 }
 0x459   : > { %v7984_v44 = vpop.f32.mrb[43].mxu0  ;;  %v8072_v19 = vpop.f32.mrb[19].mxu1 }
 0x45a   : > { %6253 = vst [vmem:[%s8668_s19 + $0x78] sm:$0xff] %v6221_v50  ;;  %v10984_v10 = vadd.f32 %v7982_v41, %v10835_v31  ;;  %v6151_v4 = vadd.f32 %v8070_v0, %v10936_v46  ;;  %v7985_v58 = vadd.f32 %v7984_v44, %v7983_v6  ;;  %v8073_v37 = vadd.f32 %v8072_v19, %v8071_v51 }
 0x45c   : > { %v6190_v13 = vadd.f32 %v10885_v56, %v6151_v4  ;;  %v10989_v47 = vadd.f32 %v7985_v58, %v10841_v21  ;;  %v6152_v53 = vadd.f32 %v8073_v37, %v10941_v55 }
 0x45e   : > { %v6222_v43 = vmax.f32 %v6190_v13, 0.0  ;;  %v6191_v52 = vadd.f32 %v10885_v56, %v6152_v53  ;;  %v7986_v20 = vpop.f32.mrb[44].mxu0  ;;  %v8074_v36 = vpop.f32.mrb[20].mxu1 }
 0x45f   : > { %v7987_v29 = vpop.f32.mrb[45].mxu0  ;;  %v8075_v31 = vpop.f32.mrb[21].mxu1 }
 0x460   : > { %6254 = vst [vmem:[%s8668_s19 + $0x80] sm:$0xff] %v6222_v43  ;;  %v6223_v49 = vmax.f32 %v6191_v52, 0.0  ;;  %v7988_v46 = vadd.f32 %v7987_v29, %v7986_v20  ;;  %v8076_v28 = vadd.f32 %v8075_v31, %v8074_v36  ;;  %v7989_v23 = vpop.f32.mrb[46].mxu0  ;;  %v8077_v45 = vpop.f32.mrb[22].mxu1 }
 0x461   : > { %v7990_v48 = vpop.f32.mrb[47].mxu0  ;;  %v8078_v21 = vpop.f32.mrb[23].mxu1 }
 0x462   : > { %6255 = vst [vmem:[%s8668_s19 + $0x88] sm:$0xff] %v6223_v49  ;;  %v10996_v62 = vadd.f32 %v7988_v46, %v10847_v30  ;;  %v6153_v55 = vadd.f32 %v8076_v28, %v10948_v60  ;;  %v7991_v22 = vadd.f32 %v7990_v48, %v7989_v23  ;;  %v8079_v9 = vadd.f32 %v8078_v21, %v8077_v45 }
 0x464   : > { %v6192_v42 = vadd.f32 %v10885_v56, %v6153_v55  ;;  %v11001_v1 = vadd.f32 %v7991_v22, %v10853_v16  ;;  %v6154_v17 = vadd.f32 %v8079_v9, %v10953_v57 }
 0x466   : > { %v6224_v63 = vmax.f32 %v6192_v42, 0.0  ;;  %v6193_v11 = vadd.f32 %v10885_v56, %v6154_v17  ;;  %v7992_v8 = vpop.f32.mrb[48].mxu0  ;;  %v8080_v40 = vpop.f32.mrb[24].mxu1 }
 0x467   : > { %v7993_v32 = vpop.f32.mrb[49].mxu0  ;;  %v8081_v30 = vpop.f32.mrb[25].mxu1 }
 0x468   : > { %6256 = vst [vmem:[%s8668_s19 + $0x90] sm:$0xff] %v6224_v63  ;;  %v6225_v27 = vmax.f32 %v6193_v11, 0.0  ;;  %v7994_v60 = vadd.f32 %v7993_v32, %v7992_v8  ;;  %v8082_v24 = vadd.f32 %v8081_v30, %v8080_v40  ;;  %v7995_v3 = vpop.f32.mrb[50].mxu0  ;;  %v8083_v15 = vpop.f32.mrb[26].mxu1 }
 0x469   : > { %v7996_v59 = vpop.f32.mrb[51].mxu0  ;;  %v8084_v16 = vpop.f32.mrb[27].mxu1 }
 0x46a   : > { %6257 = vst [vmem:[%s8668_s19 + $0x98] sm:$0xff] %v6225_v27  ;;  %v11008_v2 = vadd.f32 %v7994_v60, %v10859_v54  ;;  %v6155_v57 = vadd.f32 %v8082_v24, %v10960_v18  ;;  %v7997_v25 = vadd.f32 %v7996_v59, %v7995_v3  ;;  %v8085_v12 = vadd.f32 %v8084_v16, %v8083_v15 }
 0x46c   : > { %v6194_v34 = vadd.f32 %v10885_v56, %v6155_v57  ;;  %v11013_v38 = vadd.f32 %v7997_v25, %v10865_v33  ;;  %v6156_v39 = vadd.f32 %v8085_v12, %v10965_v61 }
 0x46e   : > { %v6226_v7 = vmax.f32 %v6194_v34, 0.0  ;;  %v6195_v50 = vadd.f32 %v10885_v56, %v6156_v39  ;;  %v7998_v41 = vpop.f32.mrb[52].mxu0  ;;  %v8086_v0 = vpop.f32.mrb[28].mxu1 }
 0x46f   : > { %v7999_v6 = vpop.f32.mrb[53].mxu0  ;;  %v8087_v54 = vpop.f32.mrb[29].mxu1 }
 0x470   : > { %6258 = vst [vmem:[%s8668_s19 + $0xa0] sm:$0xff] %v6226_v7  ;;  %v6227_v51 = vmax.f32 %v6195_v50, 0.0  ;;  %v8000_v18 = vadd.f32 %v7999_v6, %v7998_v41  ;;  %v8088_v44 = vadd.f32 %v8087_v54, %v8086_v0  ;;  %v8001_v19 = vpop.f32.mrb[54].mxu0  ;;  %v8089_v4 = vpop.f32.mrb[30].mxu1 }
 0x471   : > { %v8002_v58 = vpop.f32.mrb[55].mxu0  ;;  %v8090_v33 = vpop.f32.mrb[31].mxu1 }
 0x472   : > { %6259 = vst [vmem:[%s8668_s19 + $0xa8] sm:$0xff] %v6227_v51  ;;  %v5835_v37 = vadd.f32 %v8000_v18, %v10871_v5  ;;  %v6157_v61 = vadd.f32 %v8088_v44, %v10972_v14  ;;  %v8003_v13 = vadd.f32 %v8002_v58, %v8001_v19  ;;  %v8091_v53 = vadd.f32 %v8090_v33, %v8089_v4 }
 0x474   : > { %v6196_v43 = vadd.f32 %v10885_v56, %v6157_v61  ;;  %v5836_v52 = vadd.f32 %v8003_v13, %v10877_v26  ;;  %v6158_v20 = vadd.f32 %v8091_v53, %v10977_v35 }
 0x476   : > { %v6228_v36 = vmax.f32 %v6196_v43, 0.0  ;;  %v6197_v29 = vadd.f32 %v10885_v56, %v6158_v20  ;;  %v8092_v31 = vpop.f32.mrb[32].mxu1 }
 0x477   : > { %v8093_v49 = vpop.f32.mrb[33].mxu1 }
 0x478   : > { %6260 = vst [vmem:[%s8668_s19 + $0xb0] sm:$0xff] %v6228_v36  ;;  %v6229_v46 = vmax.f32 %v6197_v29, 0.0  ;;  %v8094_v5 = vadd.f32 %v8093_v49, %v8092_v31  ;;  %v8095_v28 = vpop.f32.mrb[34].mxu1 }
 0x479   : > { %v8096_v14 = vpop.f32.mrb[35].mxu1 }
 0x47a   : > { %6261 = vst [vmem:[%s8668_s19 + $0xb8] sm:$0xff] %v6229_v46  ;;  %v6159_v23 = vadd.f32 %v8094_v5, %v10984_v10  ;;  %v8097_v45 = vadd.f32 %v8096_v14, %v8095_v28 }
 0x47c   : > { %v6198_v26 = vadd.f32 %v10885_v56, %v6159_v23  ;;  %v6160_v35 = vadd.f32 %v8097_v45, %v10989_v47 }
 0x47e   : > { %v6230_v48 = vmax.f32 %v6198_v26, 0.0  ;;  %v6199_v21 = vadd.f32 %v10885_v56, %v6160_v35  ;;  %v8098_v55 = vpop.f32.mrb[36].mxu1 }
 0x47f   : > { %v8099_v22 = vpop.f32.mrb[37].mxu1 }
 0x480   : > { %6262 = vst [vmem:[%s8668_s19 + $0xc0] sm:$0xff] %v6230_v48  ;;  %v6231_v9 = vmax.f32 %v6199_v21, 0.0  ;;  %v8100_v42 = vadd.f32 %v8099_v22, %v8098_v55  ;;  %v8101_v17 = vpop.f32.mrb[38].mxu1 }
 0x481   : > { %v8102_v63 = vpop.f32.mrb[39].mxu1 }
 0x482   : > { %6263 = vst [vmem:[%s8668_s19 + $0xc8] sm:$0xff] %v6231_v9  ;;  %v6161_v10 = vadd.f32 %v8100_v42, %v10996_v62  ;;  %v8103_v11 = vadd.f32 %v8102_v63, %v8101_v17 }
 0x484   : > { %v6200_v8 = vadd.f32 %v10885_v56, %v6161_v10  ;;  %v6162_v47 = vadd.f32 %v8103_v11, %v11001_v1 }
 0x486   : > { %v6232_v40 = vmax.f32 %v6200_v8, 0.0  ;;  %v6201_v32 = vadd.f32 %v10885_v56, %v6162_v47  ;;  %v8104_v30 = vpop.f32.mrb[40].mxu1 }
 0x487   : > { %v8105_v27 = vpop.f32.mrb[41].mxu1 }
 0x488   : > { %6264 = vst [vmem:[%s8668_s19 + $0xd0] sm:$0xff] %v6232_v40  ;;  %v6233_v60 = vmax.f32 %v6201_v32, 0.0  ;;  %v8106_v24 = vadd.f32 %v8105_v27, %v8104_v30  ;;  %v8107_v3 = vpop.f32.mrb[42].mxu1 }
 0x489   : > { %v8108_v15 = vpop.f32.mrb[43].mxu1 }
 0x48a   : > { %6265 = vst [vmem:[%s8668_s19 + $0xd8] sm:$0xff] %v6233_v60  ;;  %v6163_v62 = vadd.f32 %v8106_v24, %v11008_v2  ;;  %v8109_v59 = vadd.f32 %v8108_v15, %v8107_v3 }
 0x48c   : > { %v6202_v16 = vadd.f32 %v10885_v56, %v6163_v62  ;;  %v6164_v1 = vadd.f32 %v8109_v59, %v11013_v38 }
 0x48e   : > { %v6234_v57 = vmax.f32 %v6202_v16, 0.0  ;;  %v6203_v25 = vadd.f32 %v10885_v56, %v6164_v1  ;;  %v8110_v12 = vpop.f32.mrb[44].mxu1 }
 0x48f   : > { %v8111_v34 = vpop.f32.mrb[45].mxu1 }
 0x490   : > { %6266 = vst [vmem:[%s8668_s19 + $0xe0] sm:$0xff] %v6234_v57  ;;  %v6235_v39 = vmax.f32 %v6203_v25, 0.0  ;;  %v8112_v7 = vadd.f32 %v8111_v34, %v8110_v12  ;;  %v8113_v50 = vpop.f32.mrb[46].mxu1 }
 0x491   : > { %v8114_v41 = vpop.f32.mrb[47].mxu1 }
 0x492   : > { %6267 = vst [vmem:[%s8668_s19 + $0xe8] sm:$0xff] %v6235_v39  ;;  %v6165_v0 = vadd.f32 %v8112_v7, %v5835_v37  ;;  %v8115_v2 = vadd.f32 %v8114_v41, %v8113_v50 }
 0x494   : > { %v6204_v6 = vadd.f32 %v10885_v56, %v6165_v0  ;;  %v6166_v54 = vadd.f32 %v8115_v2, %v5836_v52 }
 0x496   : > { %v6236_v51 = vmax.f32 %v6204_v6, 0.0  ;;  %v6205_v38 = vadd.f32 %v10885_v56, %v6166_v54 }
 0x498   : > { %6268 = vst [vmem:[%s8668_s19 + $0xf0] sm:$0xff] %v6236_v51  ;;  %v6237_v18 = vmax.f32 %v6205_v38, 0.0 }
 0x49a   : > { %6269 = vst [vmem:[%s8668_s19 + $0xf8] sm:$0xff] %v6237_v18 }
 0x49b PF: > { %s18_s9 = sadd.s32 1, %s8474_s9   ;;  %s11205_s27 = smov %s8466_s29 }
 0x49c   : > { %p15_p13 = scmp.ge.s32.totalorder %s18_s9, 6   ;;  %s11206_s28 = smov %s8470_s30 }
 0x49d   : > { %s11207_s29 = smov %s11210_s10  ;;  %s11208_s30 = smov %s11214_s11 }
 0x49e   :  { %17 = sbr.rel (!%p15_p13) target bundleno = 3 (0x3), region = 124 }

</bundles_post_ra>
